<compile_context>
chip_gen: v6e
topology: v6e:2x2x1
jax: 0.10.0
libtpu: 0.0.40
codegen_flags: <defaults>
</compile_context>

<pallas_src>
import functools
from math import sqrt

import jax
import jax.numpy as jnp
from jax.experimental import pallas as pl
from jax.experimental.pallas import tpu as pltpu

NEG_INF = -100000.0

# Matmul-input dtype. jnp.float32 keeps the correctness check tight; switch to
# jnp.bfloat16 on v5e/v6e for ~2x MXU throughput (accumulators, softmax and
# layernorm statistics stay in float32 either way -- v5e-safe).
MXU_DTYPE = jnp.float32
_SUBLANE = 16 if MXU_DTYPE == jnp.bfloat16 else 8


# ----------------------------------------------------------------------------
# helpers
# ----------------------------------------------------------------------------
def _round_up(x, m):
    return ((x + m - 1) // m) * m


def _pick_tile(dim, target, align):
    """Largest align-multiple tile <= target that divides dim, else full dim."""
    if dim <= target:
        return dim
    t = (target // align) * align
    while t >= align:
        if dim % t == 0:
            return t
        t -= align
    return dim


# ----------------------------------------------------------------------------
# Tiled linear kernel: y = act(LN?(x) @ W + b) (+ residual)
#   LN prologue is only enabled when the whole K axis fits in one tile.
# ----------------------------------------------------------------------------
def _linear_kernel(*refs, activation, fuse_ln, fuse_res, eps):
    it = iter(refs)
    x_ref, w_ref, b_ref = next(it), next(it), next(it)
    g_ref = next(it) if fuse_ln else None
    bb_ref = next(it) if fuse_ln else None
    r_ref = next(it) if fuse_res else None
    o_ref, acc_ref = next(it), next(it)

    k = pl.program_id(2)

    @pl.when(k == 0)
    def _init():
        acc_ref[...] = jnp.zeros_like(acc_ref)

    x = x_ref[...]
    if fuse_ln:
        xf = x.astype(jnp.float32)
        mu = jnp.mean(xf, axis=-1, keepdims=True)
        xc = xf - mu
        var = jnp.mean(xc * xc, axis=-1, keepdims=True)
        x = xc * jax.lax.rsqrt(var + eps) * g_ref[...] + bb_ref[...]
    acc_ref[...] += jnp.dot(x.astype(MXU_DTYPE), w_ref[...].astype(MXU_DTYPE),
                            preferred_element_type=jnp.float32)

    @pl.when(k == pl.num_programs(2) - 1)
    def _finalize():
        out = acc_ref[...] + b_ref[...].astype(jnp.float32)
        if activation == "relu":
            out = jnp.maximum(out, 0.0)
        if fuse_res:
            out = out + r_ref[...].astype(jnp.float32)
        o_ref[...] = out.astype(o_ref.dtype)


def linear(x, w, b, *, activation=None, ln=None, residual=None, eps=1e-5,
           tm=256, tn=256, tk=512):
    """x: (M, K), w: (K, N), b: (N,) -> (M, N), pipelined over M/N/K tiles.

    ln=(gamma, beta): fuse LayerNorm(x) into the GEMM prologue (K one tile).
    residual: (M, N) tensor added in the GEMM epilogue.
    """
    M, K = x.shape
    Kw, N = w.shape
    assert K == Kw

    # LayerNorm fusion needs the full feature row in one K tile.
    if ln is not None and K > 2048:
        x = layernorm(x, *ln, eps=eps)       # very wide E: standalone LN
        ln = None
    tk_ = K if ln is not None else _pick_tile(K, tk, 128)
    tn_ = _pick_tile(N, tn, 128)

    # Row-tile hardening: pad M so we never fall back to a huge full-M tile.
    Mp = _round_up(M, _SUBLANE)
    tm_ = _pick_tile(Mp, tm, _SUBLANE)
    if tm_ > tm:
        tm_ = max((tm // _SUBLANE) * _SUBLANE, _SUBLANE)
        Mp = _round_up(M, tm_)
    x_p = x if Mp == M else jnp.pad(x, ((0, Mp - M), (0, 0)))
    r_p = None
    if residual is not None:
        r_p = residual if Mp == M else jnp.pad(residual, ((0, Mp - M), (0, 0)))

    grid = (Mp // tm_, N // tn_, K // tk_)

    in_specs = [
        pl.BlockSpec((tm_, tk_), lambda i, j, k: (i, k)),
        pl.BlockSpec((tk_, tn_), lambda i, j, k: (k, j)),
        pl.BlockSpec((1, tn_), lambda i, j, k: (0, j)),
    ]
    args = [x_p, w, b.reshape(1, N)]
    if ln is not None:
        gamma, beta = ln
        in_specs += [pl.BlockSpec((1, K), lambda i, j, k: (0, 0)),
                     pl.BlockSpec((1, K), lambda i, j, k: (0, 0))]
        args += [gamma.reshape(1, K), beta.reshape(1, K)]
    if residual is not None:
        in_specs.append(pl.BlockSpec((tm_, tn_), lambda i, j, k: (i, j)))
        args.append(r_p)

    kernel = functools.partial(_linear_kernel, activation=activation,
                               fuse_ln=ln is not None,
                               fuse_res=residual is not None, eps=eps)
    out = pl.pallas_call(
        kernel,
        out_shape=jax.ShapeDtypeStruct((Mp, N), x.dtype),
        grid=grid,
        in_specs=in_specs,
        out_specs=pl.BlockSpec((tm_, tn_), lambda i, j, k: (i, j)),
        scratch_shapes=[pltpu.VMEM((tm_, tn_), jnp.float32)],
        compiler_params=pltpu.CompilerParams(
            dimension_semantics=("parallel", "parallel", "arbitrary")),
    )(*args)
    return out if Mp == M else out[:M]


# ----------------------------------------------------------------------------
# Standalone LayerNorm kernel (only used as a fallback for very wide E)
# ----------------------------------------------------------------------------
def _layernorm_kernel(x_ref, g_ref, b_ref, o_ref, *, eps):
    x = x_ref[...].astype(jnp.float32)
    mu = jnp.mean(x, axis=-1, keepdims=True)
    xc = x - mu
    var = jnp.mean(xc * xc, axis=-1, keepdims=True)
    inv = jax.lax.rsqrt(var + eps)
    o_ref[...] = (xc * inv * g_ref[...] + b_ref[...]).astype(o_ref.dtype)


def layernorm(x, gamma, beta, *, eps=1e-5, tm=256):
    M, E = x.shape
    Mp = _round_up(M, 8)
    tm_ = _pick_tile(Mp, tm, 8)
    if tm_ > tm:
        tm_ = (tm // 8) * 8
        Mp = _round_up(M, tm_)
    xp = x if Mp == M else jnp.pad(x, ((0, Mp - M), (0, 0)))
    kernel = functools.partial(_layernorm_kernel, eps=eps)
    out = pl.pallas_call(
        kernel,
        out_shape=jax.ShapeDtypeStruct((Mp, E), x.dtype),
        grid=(Mp // tm_,),
        in_specs=[pl.BlockSpec((tm_, E), lambda i: (i, 0)),
                  pl.BlockSpec((1, E), lambda i: (0, 0)),
                  pl.BlockSpec((1, E), lambda i: (0, 0))],
        out_specs=pl.BlockSpec((tm_, E), lambda i: (i, 0)),
        compiler_params=pltpu.CompilerParams(dimension_semantics=("parallel",)),
    )(xp, gamma.reshape(1, E), beta.reshape(1, E))
    return out if Mp == M else out[:M]


# ----------------------------------------------------------------------------
# Flash attention kernel: grid = (B, q_blocks, kv_blocks)
#   q_ref:  (1, tq,  QW)  -- Q in columns [0:E] of the fused slab
#   kv_ref: (1, tkv, KVW) -- K in [k_off:k_off+E], V in [v_off:v_off+E]
#   Online-softmax accumulators (per head) live in VMEM scratch; the output is
#   one lane-dense (tq, E) store at the last kv block.
# ----------------------------------------------------------------------------
def _flash_attn_kernel(mask_ref, q_ref, kv_ref, o_ref, m_sc, l_sc, acc_sc, *,
                       n_heads, head_dim, scale, causal, k_off, v_off):
    ki = pl.program_id(2)
    E = n_heads * head_dim

    @pl.when(ki == 0)
    def _init():
        m_sc[...] = jnp.full_like(m_sc, -jnp.inf)
        l_sc[...] = jnp.zeros_like(l_sc)
        acc_sc[...] = jnp.zeros_like(acc_sc)

    q = q_ref[0, :, 0:E].astype(jnp.float32) * scale          # (tq, E)
    k = kv_ref[0, :, k_off:k_off + E]                          # (tkv, E)
    v = kv_ref[0, :, v_off:v_off + E]                          # (tkv, E)
    tq = q.shape[0]
    tkv = k.shape[0]

    # Head-batched layout, built once per block (no per-matmul lane slices).
    q4 = q.reshape(tq, n_heads, head_dim).swapaxes(0, 1).astype(MXU_DTYPE)
    k4 = k.reshape(tkv, n_heads, head_dim).swapaxes(0, 1).astype(MXU_DTYPE)
    v4 = v.reshape(tkv, n_heads, head_dim).swapaxes(0, 1).astype(MXU_DTYPE)

    s = jnp.einsum('hqd,hkd->hqk', q4, k4,
                   preferred_element_type=jnp.float32)         # (h, tq, tkv)

    # Padding mask (+ causal mask built in-kernel from global offsets).
    mask = jnp.broadcast_to(mask_ref[0] != 0, (tq, tkv))
    if causal:
        q0 = pl.program_id(1) * tq
        k0 = ki * tkv
        row = jax.lax.broadcasted_iota(jnp.int32, (tq, tkv), 0) + q0
        col = jax.lax.broadcasted_iota(jnp.int32, (tq, tkv), 1) + k0
        mask = jnp.logical_or(mask, col > row)
    s = jnp.where(mask[None, :, :], NEG_INF, s)

    # Online softmax update (all statistics in f32 -- v5e-safe).
    blk_max = jnp.max(s, axis=-1, keepdims=True)               # (h, tq, 1)
    m_prev = m_sc[...]
    m_new = jnp.maximum(m_prev, blk_max)
    alpha = jnp.exp(m_prev - m_new)
    p = jnp.exp(s - m_new)                                     # (h, tq, tkv)
    l_sc[...] = alpha * l_sc[...] + jnp.sum(p, axis=-1, keepdims=True)
    m_sc[...] = m_new

    pv = jnp.einsum('hqk,hkd->hqd', p.astype(MXU_DTYPE), v4,
                    preferred_element_type=jnp.float32)        # (h, tq, d)
    acc_sc[...] = alpha * acc_sc[...] + pv

    @pl.when(ki == pl.num_programs(2) - 1)
    def _finalize():
        o = acc_sc[...] * pl.reciprocal(l_sc[...], approx=True)   # (h, tq, d)
        o = o.swapaxes(0, 1).reshape(tq, E)                       # lane-dense
        o_ref[0] = o.astype(o_ref.dtype)


def flash_attention(q_arr, kv_arr, pad_mask, *, embed_dim, n_heads, causal,
                    k_off, v_off, tq=256, tkv=256):
    """q_arr: (B, m, QW) with Q in cols [0:E]; kv_arr: (B, n, KVW) with K/V at
    k_off/v_off; pad_mask: (B, 1, n) int32, nonzero == do not attend."""
    B, m_len, QW = q_arr.shape
    _, n_len, KVW = kv_arr.shape
    E = embed_dim
    head_dim = E // n_heads
    scale = 1.0 / sqrt(E)          # NOTE: sqrt(embed_dim), as in the module

    tq_ = _pick_tile(m_len, tq, 8)
    tkv_ = _pick_tile(n_len, tkv, 128)
    grid = (B, m_len // tq_, n_len // tkv_)

    kernel = functools.partial(_flash_attn_kernel, n_heads=n_heads,
                               head_dim=head_dim, scale=scale, causal=causal,
                               k_off=k_off, v_off=v_off)
    return pl.pallas_call(
        kernel,
        out_shape=jax.ShapeDtypeStruct((B, m_len, E), q_arr.dtype),
        grid=grid,
        in_specs=[
            pl.BlockSpec((1, 1, tkv_), lambda b, qi, ki: (b, 0, ki)),
            pl.BlockSpec((1, tq_, QW), lambda b, qi, ki: (b, qi, 0)),
            pl.BlockSpec((1, tkv_, KVW), lambda b, qi, ki: (b, ki, 0)),
        ],
        out_specs=pl.BlockSpec((1, tq_, E), lambda b, qi, ki: (b, qi, 0)),
        scratch_shapes=[
            pltpu.VMEM((n_heads, tq_, 1), jnp.float32),        # running max
            pltpu.VMEM((n_heads, tq_, 1), jnp.float32),        # running sum
            pltpu.VMEM((n_heads, tq_, head_dim), jnp.float32),  # output acc
        ],
        compiler_params=pltpu.CompilerParams(
            dimension_semantics=("parallel", "parallel", "arbitrary")),
    )(pad_mask, q_arr, kv_arr)


# ----------------------------------------------------------------------------
# DecoderLayer forward (pre-norm residual blocks, dropout p=0 -> identity).
# Takes the pre-fused kernel params produced by build_kernel_params().
# ----------------------------------------------------------------------------
def decoder_layer(kp, x, encodings, src_mask=None, *, n_heads):
    """x: (m, bsz, E); encodings: (n, bsz, E); src_mask: (n, bsz) bool."""
    m, B, E = x.shape
    n = encodings.shape[0]

    # Single boundary transpose into batch-major rows; everything downstream
    # (LN-fused GEMMs, attention, residual-fused GEMMs) stays in this layout.
    xb = x.transpose(1, 0, 2).reshape(B * m, E)
    eb = encodings.transpose(1, 0, 2).reshape(B * n, E)

    no_pad_m = jnp.zeros((B, 1, m), jnp.int32)
    if src_mask is not None:
        pad_n = src_mask.T.reshape(B, 1, n).astype(jnp.int32)
    else:
        pad_n = jnp.zeros((B, 1, n), jnp.int32)

    # -- causal self-attention: LN fused into QKV GEMM, residual into out-proj
    qkv = linear(xb, kp["self_wqkv"], kp["self_bqkv"], ln=kp["ln_self"])
    qkv3 = qkv.reshape(B, m, 3 * E)
    pooled = flash_attention(qkv3, qkv3, no_pad_m, embed_dim=E,
                             n_heads=n_heads, causal=True, k_off=E, v_off=2 * E)
    xb = linear(pooled.reshape(B * m, E), kp["self_wo"], kp["self_bo"],
                residual=xb)

    # -- encoder attention: LN fused into Q GEMM; K|V fused GEMM on encodings
    q = linear(xb, kp["enc_wq"], kp["enc_bq"], ln=kp["ln_enc"])
    kv = linear(eb, kp["enc_wkv"], kp["enc_bkv"])
    pooled = flash_attention(q.reshape(B, m, E), kv.reshape(B, n, 2 * E),
                             pad_n, embed_dim=E, n_heads=n_heads,
                             causal=False, k_off=0, v_off=E)
    xb = linear(pooled.reshape(B * m, E), kp["enc_wo"], kp["enc_bo"],
                residual=xb)

    # -- feed-forward: LN + ReLU fused into FF1, residual fused into FF2
    ffp = kp["ff"]
    f = linear(xb, ffp["w1"], ffp["b1"], ln=kp["ln_ff"], activation="relu")
    xb = linear(f, ffp["w2"], ffp["b2"], residual=xb)

    return xb.reshape(B, m, E).transpose(1, 0, 2)


# ----------------------------------------------------------------------------
# Parameter init (Glorot-uniform weights, zero bias; LayerNorm gamma/beta)
# ----------------------------------------------------------------------------
def glorot_linear_params(key, input_dim, output_dim):
    limit = sqrt(6.0 / (input_dim + output_dim))
    w = jax.random.uniform(key, (input_dim, output_dim), jnp.float32,
                           -limit, limit)
    b = jnp.zeros((output_dim,), jnp.float32)
    return w, b


def init_mha_params(key, embed_dim):
    kq, kk, kv, ko = jax.random.split(key, 4)
    wq, bq = glorot_linear_params(kq, embed_dim, embed_dim)
    wk, bk = glorot_linear_params(kk, embed_dim, embed_dim)
    wv, bv = glorot_linear_params(kv, embed_dim, embed_dim)
    wo, bo = glorot_linear_params(ko, embed_dim, embed_dim)
    return dict(wq=wq, bq=bq, wk=wk, bk=bk, wv=wv, bv=bv, wo=wo, bo=bo)


def init_layernorm_params(key, embed_dim):
    k1, k2 = jax.random.split(key)
    gamma = 1.0 + 0.05 * jax.random.normal(k1, (embed_dim,), jnp.float32)
    beta = 0.05 * jax.random.normal(k2, (embed_dim,), jnp.float32)
    return gamma, beta


def init_decoder_layer_params(key, embed_dim, n_heads, hidden_dim):
    ks = jax.random.split(key, 7)
    w1, b1 = glorot_linear_params(ks[5], embed_dim, hidden_dim)
    w2, b2 = glorot_linear_params(ks[6], hidden_dim, embed_dim)
    return {
        "ln_self": init_layernorm_params(ks[0], embed_dim),
        "self_att": init_mha_params(ks[1], embed_dim),
        "ln_enc": init_layernorm_params(ks[2], embed_dim),
        "enc_att": init_mha_params(ks[3], embed_dim),
        "ln_ff": init_layernorm_params(ks[4], embed_dim),
        "ff": {"w1": w1, "b1": b1, "w2": w2, "b2": b2},
    }


def build_kernel_params(params):
    """Pre-fuse QKV / KV projection weights ONCE (outside the jitted forward)."""
    sa, ea = params["self_att"], params["enc_att"]
    return {
        "ln_self": params["ln_self"],
        "ln_enc": params["ln_enc"],
        "ln_ff": params["ln_ff"],
        "self_wqkv": jnp.concatenate([sa["wq"], sa["wk"], sa["wv"]], axis=1),
        "self_bqkv": jnp.concatenate([sa["bq"], sa["bk"], sa["bv"]]),
        "self_wo": sa["wo"], "self_bo": sa["bo"],
        "enc_wq": ea["wq"], "enc_bq": ea["bq"],
        "enc_wkv": jnp.concatenate([ea["wk"], ea["wv"]], axis=1),
        "enc_bkv": jnp.concatenate([ea["bk"], ea["bv"]]),
        "enc_wo": ea["wo"], "enc_bo": ea["bo"],
        "ff": params["ff"],
    }


# ----------------------------------------------------------------------------
# Pure-JAX reference (mirrors the PyTorch module math exactly)
# ----------------------------------------------------------------------------
def ref_layernorm(gamma, beta, x, eps=1e-5):
    mu = x.mean(-1, keepdims=True)
    var = ((x - mu) ** 2).mean(-1, keepdims=True)
    return (x - mu) / jnp.sqrt(var + eps) * gamma + beta


def ref_mha(p, queries, keys, values, n_heads, in_mask=None, causal=False):
    m, B, E = queries.shape
    n = keys.shape[0]
    d = E // n_heads
    q = (queries @ p["wq"] + p["bq"]).reshape(m, B, n_heads, d)
    k = (keys @ p["wk"] + p["bk"]).reshape(n, B, n_heads, d)
    v = (values @ p["wv"] + p["bv"]).reshape(n, B, n_heads, d)
    pot = jnp.einsum('mbhd,nbhd->mnbh', q, k) / sqrt(E)
    if in_mask is not None:
        pot = jnp.where(in_mask.reshape(1, n, B, 1), NEG_INF, pot)
    if causal:
        cm = jnp.triu(jnp.ones((m, n)), k=1).reshape(m, n, 1, 1) == 1
        pot = jnp.where(cm, NEG_INF, pot)
    w = jax.nn.softmax(pot, axis=1)
    pooled = jnp.einsum('mnbh,nbhd->mbhd', w, v).reshape(m, B, E)
    return pooled @ p["wo"] + p["bo"]


def ref_decoder_layer(params, x, encodings, src_mask, n_heads):
    h = ref_layernorm(*params["ln_self"], x)
    x = x + ref_mha(params["self_att"], h, h, h, n_heads, None, True)
    h = ref_layernorm(*params["ln_enc"], x)
    x = x + ref_mha(params["enc_att"], h, encodings, encodings, n_heads,
                    src_mask, False)
    h = ref_layernorm(*params["ln_ff"], x)
    ffp = params["ff"]
    f = jnp.maximum(h @ ffp["w1"] + ffp["b1"], 0.0) @ ffp["w2"] + ffp["b2"]
    return x + f


# ----------------------------------------------------------------------------
if __name__ == "__main__":
    key = jax.random.PRNGKey(0)
    m, n, bsz = 8, 16, 2
    embed_dim, n_heads, hidden_dim = 128, 4, 256

    kp_key, kx, ke = jax.random.split(key, 3)
    params = init_decoder_layer_params(kp_key, embed_dim, n_heads, hidden_dim)
    kparams = build_kernel_params(params)          # fused weights, built once
    x = jax.random.normal(kx, (m, bsz, embed_dim), jnp.float32)
    encodings = jax.random.normal(ke, (n, bsz, embed_dim), jnp.float32)
    # Source padding mask: mask the last two source positions of batch elem 1.
    src_mask = (jnp.zeros((n, bsz), dtype=bool)
                .at[n - 1, 1].set(True)
                .at[n - 2, 1].set(True))

    fwd = jax.jit(decoder_layer, static_argnames=("n_heads",))
    out = fwd(kparams, x, encodings, src_mask, n_heads=n_heads)
    out = jax.block_until_ready(out)

    ref = ref_decoder_layer(params, x, encodings, src_mask, n_heads)
    assert out.shape == (m, bsz, embed_dim)
    max_err = float(jnp.max(jnp.abs(out - ref)))
    # Tolerance allows for the EUP approx-reciprocal in the softmax denominator.
    assert jnp.allclose(out, ref, atol=2e-2, rtol=2e-2), max_err

    print("KERNEL_OK")
</pallas_src>

<mosaic_0001>
module attributes {stable_mosaic.version = 11 : i64} {
  func.func @_linear_kernel(%arg0: i32, %arg1: i32, %arg2: i32, %arg3: memref<16x128xf32, #tpu.memory_space<vmem>>, %arg4: memref<128x128xf32, #tpu.memory_space<vmem>>, %arg5: memref<1x128xf32, #tpu.memory_space<vmem>>, %arg6: memref<1x128xf32, #tpu.memory_space<vmem>>, %arg7: memref<1x128xf32, #tpu.memory_space<vmem>>, %arg8: memref<16x128xf32, #tpu.memory_space<vmem>>, %arg9: memref<16x128xf32, #tpu.memory_space<vmem>>) attributes {dimension_semantics = [#tpu.dimension_semantics<parallel>, #tpu.dimension_semantics<parallel>, #tpu.dimension_semantics<arbitrary>], iteration_bounds = array<i64: 1, 3, 1>, scalar_prefetch = 0 : i64, scratch_operands = 1 : i64, tpu.core_type = #tpu.core_type<tc>, window_params = [{transform_indices = @transform_0, window_bounds = array<i64: 16, 128>}, {transform_indices = @transform_1, window_bounds = array<i64: 128, 128>}, {transform_indices = @transform_2, window_bounds = array<i64: 1, 128>}, {pipeline_mode = #tpu.pipeline_mode<synchronous>, transform_indices = @transform_3, window_bounds = array<i64: 1, 128>}, {pipeline_mode = #tpu.pipeline_mode<synchronous>, transform_indices = @transform_4, window_bounds = array<i64: 1, 128>}, {transform_indices = @transform_5, window_bounds = array<i64: 16, 128>}]} {
    %c0_i32 = arith.constant 0 : i32
    %0 = arith.cmpi eq, %arg2, %c0_i32 : i32
    %1 = arith.extui %0 : i1 to i32
    %c0_i32_0 = arith.constant 0 : i32
    %2 = arith.cmpi ne, %1, %c0_i32_0 : i32
    scf.if %2 {
      %cst_19 = arith.constant 0.000000e+00 : f32
      %34 = vector.broadcast %cst_19 : f32 to vector<16x128xf32>
      %c0_20 = arith.constant 0 : index
      %c0_21 = arith.constant 0 : index
      %35 = vector.load %arg9[%c0_20, %c0_21] : memref<16x128xf32, #tpu.memory_space<vmem>>, vector<16x128xf32>
      tpu.vector_store %arg9[%c0_20, %c0_21], %34 {strides = array<i32>} : memref<16x128xf32, #tpu.memory_space<vmem>>, vector<16x128xf32>,
    } else {
    }
    %c0 = arith.constant 0 : index
    %c0_1 = arith.constant 0 : index
    %3 = vector.load %arg3[%c0, %c0_1] : memref<16x128xf32, #tpu.memory_space<vmem>>, vector<16x128xf32>
    %cst = arith.constant dense<0.000000e+00> : vector<16xf32>
    %4 = vector.multi_reduction <add>, %3, %cst [1] : vector<16x128xf32> to vector<16xf32>
    %5 = vector.shape_cast %4 : vector<16xf32> to vector<16x1xf32>
    %cst_2 = arith.constant 1.280000e+02 : f32
    %6 = vector.broadcast %cst_2 : f32 to vector<16x1xf32>
    %7 = arith.divf %5, %6 : vector<16x1xf32>
    %8 = vector.broadcast %7 : vector<16x1xf32> to vector<16x128xf32>
    %9 = arith.subf %3, %8 : vector<16x128xf32>
    %10 = arith.mulf %9, %9 : vector<16x128xf32>
    %cst_3 = arith.constant dense<0.000000e+00> : vector<16xf32>
    %11 = vector.multi_reduction <add>, %10, %cst_3 [1] : vector<16x128xf32> to vector<16xf32>
    %12 = vector.shape_cast %11 : vector<16xf32> to vector<16x1xf32>
    %cst_4 = arith.constant 1.280000e+02 : f32
    %13 = vector.broadcast %cst_4 : f32 to vector<16x1xf32>
    %14 = arith.divf %12, %13 : vector<16x1xf32>
    %cst_5 = arith.constant 9.99999974E-6 : f32
    %15 = vector.broadcast %cst_5 : f32 to vector<16x1xf32>
    %16 = arith.addf %14, %15 : vector<16x1xf32>
    %17 = math.rsqrt %16 : vector<16x1xf32>
    %18 = vector.broadcast %17 : vector<16x1xf32> to vector<16x128xf32>
    %19 = arith.mulf %9, %18 : vector<16x128xf32>
    %c0_6 = arith.constant 0 : index
    %c0_7 = arith.constant 0 : index
    %20 = vector.load %arg6[%c0_6, %c0_7] : memref<1x128xf32, #tpu.memory_space<vmem>>, vector<1x128xf32>
    %21 = vector.broadcast %20 : vector<1x128xf32> to vector<16x128xf32>
    %22 = arith.mulf %19, %21 : vector<16x128xf32>
    %c0_8 = arith.constant 0 : index
    %c0_9 = arith.constant 0 : index
    %23 = vector.load %arg7[%c0_8, %c0_9] : memref<1x128xf32, #tpu.memory_space<vmem>>, vector<1x128xf32>
    %24 = vector.broadcast %23 : vector<1x128xf32> to vector<16x128xf32>
    %25 = arith.addf %22, %24 : vector<16x128xf32>
    %c0_10 = arith.constant 0 : index
    %c0_11 = arith.constant 0 : index
    %26 = vector.load %arg9[%c0_10, %c0_11] : memref<16x128xf32, #tpu.memory_space<vmem>>, vector<16x128xf32>
    %c0_12 = arith.constant 0 : index
    %c0_13 = arith.constant 0 : index
    %27 = vector.load %arg4[%c0_12, %c0_13] : memref<128x128xf32, #tpu.memory_space<vmem>>, vector<128x128xf32>
    %cst_14 = arith.constant dense<0.000000e+00> : vector<16x128xf32>
    %28 = tpu.matmul %25, %27, %cst_14 {dimension_numbers = #tpu.dot_dimension_numbers<[1], [0], [0], [1], [0, 0, 1, 1], [], []>} : vector<16x128xf32>, vector<128x128xf32>, vector<16x128xf32> -> vector<16x128xf32>
    %29 = arith.addf %26, %28 : vector<16x128xf32>
    %c0_15 = arith.constant 0 : index
    %c0_16 = arith.constant 0 : index
    %30 = vector.load %arg9[%c0_15, %c0_16] : memref<16x128xf32, #tpu.memory_space<vmem>>, vector<16x128xf32>
    tpu.vector_store %arg9[%c0_15, %c0_16], %29 {strides = array<i32>} : memref<16x128xf32, #tpu.memory_space<vmem>>, vector<16x128xf32>,
    %c0_i32_17 = arith.constant 0 : i32
    %31 = arith.cmpi eq, %arg2, %c0_i32_17 : i32
    %32 = arith.extui %31 : i1 to i32
    %c0_i32_18 = arith.constant 0 : i32
    %33 = arith.cmpi ne, %32, %c0_i32_18 : i32
    scf.if %33 {
      %c0_19 = arith.constant 0 : index
      %c0_20 = arith.constant 0 : index
      %34 = vector.load %arg9[%c0_19, %c0_20] : memref<16x128xf32, #tpu.memory_space<vmem>>, vector<16x128xf32>
      %c0_21 = arith.constant 0 : index
      %c0_22 = arith.constant 0 : index
      %35 = vector.load %arg5[%c0_21, %c0_22] : memref<1x128xf32, #tpu.memory_space<vmem>>, vector<1x128xf32>
      %36 = vector.broadcast %35 : vector<1x128xf32> to vector<16x128xf32>
      %37 = arith.addf %34, %36 : vector<16x128xf32>
      %c0_23 = arith.constant 0 : index
      %c0_24 = arith.constant 0 : index
      %38 = vector.load %arg8[%c0_23, %c0_24] : memref<16x128xf32, #tpu.memory_space<vmem>>, vector<16x128xf32>
      tpu.vector_store %arg8[%c0_23, %c0_24], %37 {strides = array<i32>} : memref<16x128xf32, #tpu.memory_space<vmem>>, vector<16x128xf32>,
    } else {
    }
    return
  }
  func.func @transform_0(%arg0: i32, %arg1: i32, %arg2: i32) -> (i32, i32) {
    %c0_i32 = arith.constant 0 : i32
    return %arg0, %arg2 : i32, i32
  }
  func.func @transform_1(%arg0: i32, %arg1: i32, %arg2: i32) -> (i32, i32) {
    %c0_i32 = arith.constant 0 : i32
    return %arg2, %arg1 : i32, i32
  }
  func.func @transform_2(%arg0: i32, %arg1: i32, %arg2: i32) -> (i32, i32) {
    %c0_i32 = arith.constant 0 : i32
    %c0_i32_0 = arith.constant 0 : i32
    return %c0_i32, %arg1 : i32, i32
  }
  func.func @transform_3(%arg0: i32, %arg1: i32, %arg2: i32) -> (i32, i32) {
    %c0_i32 = arith.constant 0 : i32
    %c0_i32_0 = arith.constant 0 : i32
    %c0_i32_1 = arith.constant 0 : i32
    return %c0_i32, %c0_i32_0 : i32, i32
  }
  func.func @transform_4(%arg0: i32, %arg1: i32, %arg2: i32) -> (i32, i32) {
    %c0_i32 = arith.constant 0 : i32
    %c0_i32_0 = arith.constant 0 : i32
    %c0_i32_1 = arith.constant 0 : i32
    return %c0_i32, %c0_i32_0 : i32, i32
  }
  func.func @transform_5(%arg0: i32, %arg1: i32, %arg2: i32) -> (i32, i32) {
    %c0_i32 = arith.constant 0 : i32
    return %arg0, %arg1 : i32, i32
  }
}

module attributes {stable_mosaic.version = 11 : i64} {
  func.func @_linear_kernel(%arg0: i32, %arg1: i32, %arg2: i32, %arg3: memref<16x128xf32, #tpu.memory_space<vmem>>, %arg4: memref<128x128xf32, #tpu.memory_space<vmem>>, %arg5: memref<1x128xf32, #tpu.memory_space<vmem>>, %arg6: memref<1x128xf32, #tpu.memory_space<vmem>>, %arg7: memref<1x128xf32, #tpu.memory_space<vmem>>, %arg8: memref<16x128xf32, #tpu.memory_space<vmem>>, %arg9: memref<16x128xf32, #tpu.memory_space<vmem>>) attributes {dimension_semantics = [#tpu.dimension_semantics<parallel>, #tpu.dimension_semantics<parallel>, #tpu.dimension_semantics<arbitrary>], iteration_bounds = array<i64: 1, 1, 1>, scalar_prefetch = 0 : i64, scratch_operands = 1 : i64, tpu.core_type = #tpu.core_type<tc>, window_params = [{transform_indices = @transform_0, window_bounds = array<i64: 16, 128>}, {transform_indices = @transform_1, window_bounds = array<i64: 128, 128>}, {transform_indices = @transform_2, window_bounds = array<i64: 1, 128>}, {pipeline_mode = #tpu.pipeline_mode<synchronous>, transform_indices = @transform_3, window_bounds = array<i64: 1, 128>}, {pipeline_mode = #tpu.pipeline_mode<synchronous>, transform_indices = @transform_4, window_bounds = array<i64: 1, 128>}, {transform_indices = @transform_5, window_bounds = array<i64: 16, 128>}]} {
    %c0_i32 = arith.constant 0 : i32
    %0 = arith.cmpi eq, %arg2, %c0_i32 : i32
    %1 = arith.extui %0 : i1 to i32
    %c0_i32_0 = arith.constant 0 : i32
    %2 = arith.cmpi ne, %1, %c0_i32_0 : i32
    scf.if %2 {
      %cst_19 = arith.constant 0.000000e+00 : f32
      %34 = vector.broadcast %cst_19 : f32 to vector<16x128xf32>
      %c0_20 = arith.constant 0 : index
      %c0_21 = arith.constant 0 : index
      %35 = vector.load %arg9[%c0_20, %c0_21] : memref<16x128xf32, #tpu.memory_space<vmem>>, vector<16x128xf32>
      tpu.vector_store %arg9[%c0_20, %c0_21], %34 {strides = array<i32>} : memref<16x128xf32, #tpu.memory_space<vmem>>, vector<16x128xf32>,
    } else {
    }
    %c0 = arith.constant 0 : index
    %c0_1 = arith.constant 0 : index
    %3 = vector.load %arg3[%c0, %c0_1] : memref<16x128xf32, #tpu.memory_space<vmem>>, vector<16x128xf32>
    %cst = arith.constant dense<0.000000e+00> : vector<16xf32>
    %4 = vector.multi_reduction <add>, %3, %cst [1] : vector<16x128xf32> to vector<16xf32>
    %5 = vector.shape_cast %4 : vector<16xf32> to vector<16x1xf32>
    %cst_2 = arith.constant 1.280000e+02 : f32
    %6 = vector.broadcast %cst_2 : f32 to vector<16x1xf32>
    %7 = arith.divf %5, %6 : vector<16x1xf32>
    %8 = vector.broadcast %7 : vector<16x1xf32> to vector<16x128xf32>
    %9 = arith.subf %3, %8 : vector<16x128xf32>
    %10 = arith.mulf %9, %9 : vector<16x128xf32>
    %cst_3 = arith.constant dense<0.000000e+00> : vector<16xf32>
    %11 = vector.multi_reduction <add>, %10, %cst_3 [1] : vector<16x128xf32> to vector<16xf32>
    %12 = vector.shape_cast %11 : vector<16xf32> to vector<16x1xf32>
    %cst_4 = arith.constant 1.280000e+02 : f32
    %13 = vector.broadcast %cst_4 : f32 to vector<16x1xf32>
    %14 = arith.divf %12, %13 : vector<16x1xf32>
    %cst_5 = arith.constant 9.99999974E-6 : f32
    %15 = vector.broadcast %cst_5 : f32 to vector<16x1xf32>
    %16 = arith.addf %14, %15 : vector<16x1xf32>
    %17 = math.rsqrt %16 : vector<16x1xf32>
    %18 = vector.broadcast %17 : vector<16x1xf32> to vector<16x128xf32>
    %19 = arith.mulf %9, %18 : vector<16x128xf32>
    %c0_6 = arith.constant 0 : index
    %c0_7 = arith.constant 0 : index
    %20 = vector.load %arg6[%c0_6, %c0_7] : memref<1x128xf32, #tpu.memory_space<vmem>>, vector<1x128xf32>
    %21 = vector.broadcast %20 : vector<1x128xf32> to vector<16x128xf32>
    %22 = arith.mulf %19, %21 : vector<16x128xf32>
    %c0_8 = arith.constant 0 : index
    %c0_9 = arith.constant 0 : index
    %23 = vector.load %arg7[%c0_8, %c0_9] : memref<1x128xf32, #tpu.memory_space<vmem>>, vector<1x128xf32>
    %24 = vector.broadcast %23 : vector<1x128xf32> to vector<16x128xf32>
    %25 = arith.addf %22, %24 : vector<16x128xf32>
    %c0_10 = arith.constant 0 : index
    %c0_11 = arith.constant 0 : index
    %26 = vector.load %arg9[%c0_10, %c0_11] : memref<16x128xf32, #tpu.memory_space<vmem>>, vector<16x128xf32>
    %c0_12 = arith.constant 0 : index
    %c0_13 = arith.constant 0 : index
    %27 = vector.load %arg4[%c0_12, %c0_13] : memref<128x128xf32, #tpu.memory_space<vmem>>, vector<128x128xf32>
    %cst_14 = arith.constant dense<0.000000e+00> : vector<16x128xf32>
    %28 = tpu.matmul %25, %27, %cst_14 {dimension_numbers = #tpu.dot_dimension_numbers<[1], [0], [0], [1], [0, 0, 1, 1], [], []>} : vector<16x128xf32>, vector<128x128xf32>, vector<16x128xf32> -> vector<16x128xf32>
    %29 = arith.addf %26, %28 : vector<16x128xf32>
    %c0_15 = arith.constant 0 : index
    %c0_16 = arith.constant 0 : index
    %30 = vector.load %arg9[%c0_15, %c0_16] : memref<16x128xf32, #tpu.memory_space<vmem>>, vector<16x128xf32>
    tpu.vector_store %arg9[%c0_15, %c0_16], %29 {strides = array<i32>} : memref<16x128xf32, #tpu.memory_space<vmem>>, vector<16x128xf32>,
    %c0_i32_17 = arith.constant 0 : i32
    %31 = arith.cmpi eq, %arg2, %c0_i32_17 : i32
    %32 = arith.extui %31 : i1 to i32
    %c0_i32_18 = arith.constant 0 : i32
    %33 = arith.cmpi ne, %32, %c0_i32_18 : i32
    scf.if %33 {
      %c0_19 = arith.constant 0 : index
      %c0_20 = arith.constant 0 : index
      %34 = vector.load %arg9[%c0_19, %c0_20] : memref<16x128xf32, #tpu.memory_space<vmem>>, vector<16x128xf32>
      %c0_21 = arith.constant 0 : index
      %c0_22 = arith.constant 0 : index
      %35 = vector.load %arg5[%c0_21, %c0_22] : memref<1x128xf32, #tpu.memory_space<vmem>>, vector<1x128xf32>
      %36 = vector.broadcast %35 : vector<1x128xf32> to vector<16x128xf32>
      %37 = arith.addf %34, %36 : vector<16x128xf32>
      %c0_23 = arith.constant 0 : index
      %c0_24 = arith.constant 0 : index
      %38 = vector.load %arg8[%c0_23, %c0_24] : memref<16x128xf32, #tpu.memory_space<vmem>>, vector<16x128xf32>
      tpu.vector_store %arg8[%c0_23, %c0_24], %37 {strides = array<i32>} : memref<16x128xf32, #tpu.memory_space<vmem>>, vector<16x128xf32>,
    } else {
    }
    return
  }
  func.func @transform_0(%arg0: i32, %arg1: i32, %arg2: i32) -> (i32, i32) {
    %c0_i32 = arith.constant 0 : i32
    return %arg0, %arg2 : i32, i32
  }
  func.func @transform_1(%arg0: i32, %arg1: i32, %arg2: i32) -> (i32, i32) {
    %c0_i32 = arith.constant 0 : i32
    return %arg2, %arg1 : i32, i32
  }
  func.func @transform_2(%arg0: i32, %arg1: i32, %arg2: i32) -> (i32, i32) {
    %c0_i32 = arith.constant 0 : i32
    %c0_i32_0 = arith.constant 0 : i32
    return %c0_i32, %arg1 : i32, i32
  }
  func.func @transform_3(%arg0: i32, %arg1: i32, %arg2: i32) -> (i32, i32) {
    %c0_i32 = arith.constant 0 : i32
    %c0_i32_0 = arith.constant 0 : i32
    %c0_i32_1 = arith.constant 0 : i32
    return %c0_i32, %c0_i32_0 : i32, i32
  }
  func.func @transform_4(%arg0: i32, %arg1: i32, %arg2: i32) -> (i32, i32) {
    %c0_i32 = arith.constant 0 : i32
    %c0_i32_0 = arith.constant 0 : i32
    %c0_i32_1 = arith.constant 0 : i32
    return %c0_i32, %c0_i32_0 : i32, i32
  }
  func.func @transform_5(%arg0: i32, %arg1: i32, %arg2: i32) -> (i32, i32) {
    %c0_i32 = arith.constant 0 : i32
    return %arg0, %arg1 : i32, i32
  }
}

module attributes {stable_mosaic.version = 11 : i64} {
  func.func @_flash_attn_kernel(%arg0: i32, %arg1: i32, %arg2: i32, %arg3: memref<1x1x8xi32, #tpu.memory_space<vmem>>, %arg4: memref<1x8x384xf32, #tpu.memory_space<vmem>>, %arg5: memref<1x8x384xf32, #tpu.memory_space<vmem>>, %arg6: memref<1x8x128xf32, #tpu.memory_space<vmem>>, %arg7: memref<4x8x1xf32, #tpu.memory_space<vmem>>, %arg8: memref<4x8x1xf32, #tpu.memory_space<vmem>>, %arg9: memref<4x8x32xf32, #tpu.memory_space<vmem>>) attributes {dimension_semantics = [#tpu.dimension_semantics<parallel>, #tpu.dimension_semantics<parallel>, #tpu.dimension_semantics<arbitrary>], iteration_bounds = array<i64: 2, 1, 1>, scalar_prefetch = 0 : i64, scratch_operands = 3 : i64, tpu.core_type = #tpu.core_type<tc>, window_params = [{transform_indices = @transform_0, window_bounds = array<i64: 1, 1, 8>}, {transform_indices = @transform_1, window_bounds = array<i64: 1, 8, 384>}, {transform_indices = @transform_2, window_bounds = array<i64: 1, 8, 384>}, {transform_indices = @transform_3, window_bounds = array<i64: 1, 8, 128>}]} {
    %c0_i32 = arith.constant 0 : i32
    %0 = arith.cmpi eq, %arg2, %c0_i32 : i32
    %1 = arith.extui %0 : i1 to i32
    %c0_i32_0 = arith.constant 0 : i32
    %2 = arith.cmpi ne, %1, %c0_i32_0 : i32
    scf.if %2 {
      %cst_37 = arith.constant 0xFF800000 : f32
      %64 = vector.broadcast %cst_37 : f32 to vector<4x8x1xf32>
      %c0_38 = arith.constant 0 : index
      %c0_39 = arith.constant 0 : index
      %c0_40 = arith.constant 0 : index
      %65 = vector.load %arg7[%c0_38, %c0_39, %c0_40] : memref<4x8x1xf32, #tpu.memory_space<vmem>>, vector<4x8x1xf32>
      tpu.vector_store %arg7[%c0_38, %c0_39, %c0_40], %64 {strides = array<i32>} : memref<4x8x1xf32, #tpu.memory_space<vmem>>, vector<4x8x1xf32>,
      %cst_41 = arith.constant 0.000000e+00 : f32
      %66 = vector.broadcast %cst_41 : f32 to vector<4x8x1xf32>
      %c0_42 = arith.constant 0 : index
      %c0_43 = arith.constant 0 : index
      %c0_44 = arith.constant 0 : index
      %67 = vector.load %arg8[%c0_42, %c0_43, %c0_44] : memref<4x8x1xf32, #tpu.memory_space<vmem>>, vector<4x8x1xf32>
      tpu.vector_store %arg8[%c0_42, %c0_43, %c0_44], %66 {strides = array<i32>} : memref<4x8x1xf32, #tpu.memory_space<vmem>>, vector<4x8x1xf32>,
      %cst_45 = arith.constant 0.000000e+00 : f32
      %68 = vector.broadcast %cst_45 : f32 to vector<4x8x32xf32>
      %c0_46 = arith.constant 0 : index
      %c0_47 = arith.constant 0 : index
      %c0_48 = arith.constant 0 : index
      %69 = vector.load %arg9[%c0_46, %c0_47, %c0_48] : memref<4x8x32xf32, #tpu.memory_space<vmem>>, vector<4x8x32xf32>
      tpu.vector_store %arg9[%c0_46, %c0_47, %c0_48], %68 {strides = array<i32>} : memref<4x8x32xf32, #tpu.memory_space<vmem>>, vector<4x8x32xf32>,
    } else {
    }
    %c0 = arith.constant 0 : index
    %c0_1 = arith.constant 0 : index
    %c0_2 = arith.constant 0 : index
    %3 = vector.load %arg4[%c0, %c0_1, %c0_2] : memref<1x8x384xf32, #tpu.memory_space<vmem>>, vector<1x8x128xf32>
    %4 = vector.shape_cast %3 : vector<1x8x128xf32> to vector<8x128xf32>
    %cst = arith.constant 0.0883883461 : f32
    %5 = vector.broadcast %cst : f32 to vector<8x128xf32>
    %6 = arith.mulf %4, %5 : vector<8x128xf32>
    %c0_3 = arith.constant 0 : index
    %c0_4 = arith.constant 0 : index
    %c128 = arith.constant 128 : index
    %7 = vector.load %arg5[%c0_3, %c0_4, %c128] : memref<1x8x384xf32, #tpu.memory_space<vmem>>, vector<1x8x128xf32>
    %8 = vector.shape_cast %7 : vector<1x8x128xf32> to vector<8x128xf32>
    %c0_5 = arith.constant 0 : index
    %c0_6 = arith.constant 0 : index
    %c256 = arith.constant 256 : index
    %9 = vector.load %arg5[%c0_5, %c0_6, %c256] : memref<1x8x384xf32, #tpu.memory_space<vmem>>, vector<1x8x128xf32>
    %10 = vector.shape_cast %9 : vector<1x8x128xf32> to vector<8x128xf32>
    %11 = vector.shape_cast %6 : vector<8x128xf32> to vector<8x4x32xf32>
    %12 = tpu.transpose %11, [1, 0, 2] : vector<8x4x32xf32> -> vector<4x8x32xf32>
    %13 = vector.shape_cast %8 : vector<8x128xf32> to vector<8x4x32xf32>
    %14 = tpu.transpose %13, [1, 0, 2] : vector<8x4x32xf32> -> vector<4x8x32xf32>
    %15 = vector.shape_cast %10 : vector<8x128xf32> to vector<8x4x32xf32>
    %16 = tpu.transpose %15, [1, 0, 2] : vector<8x4x32xf32> -> vector<4x8x32xf32>
    "tpu.trace_start"() <{level = 10 : i32, message = "hqd,hkd->hqk"}> : () -> ()
    %cst_7 = arith.constant dense<0.000000e+00> : vector<4x8x8xf32>
    %17 = tpu.matmul %12, %14, %cst_7 {dimension_numbers = #tpu.dot_dimension_numbers<[2], [2], [1], [1], [0, 0, 0, 1, 1, 1], [0], [0]>} : vector<4x8x32xf32>, vector<4x8x32xf32>, vector<4x8x8xf32> -> vector<4x8x8xf32>
    "tpu.trace_stop"() : () -> ()
    %c0_8 = arith.constant 0 : index
    %c0_9 = arith.constant 0 : index
    %c0_10 = arith.constant 0 : index
    %18 = vector.load %arg3[%c0_8, %c0_9, %c0_10] : memref<1x1x8xi32, #tpu.memory_space<vmem>>, vector<1x1x8xi32>
    %19 = vector.shape_cast %18 : vector<1x1x8xi32> to vector<1x8xi32>
    %c0_i32_11 = arith.constant 0 : i32
    %20 = vector.broadcast %c0_i32_11 : i32 to vector<1x8xi32>
    %21 = arith.cmpi ne, %19, %20 : vector<1x8xi32>
    %22 = vector.shape_cast %21 : vector<1x8xi1> to vector<1x8xi1>
    %23 = vector.broadcast %22 : vector<1x8xi1> to vector<8x8xi1>
    %c8_i32 = arith.constant 8 : i32
    %24 = arith.muli %arg1, %c8_i32 : i32
    %c8_i32_12 = arith.constant 8 : i32
    %25 = arith.muli %arg2, %c8_i32_12 : i32
    %26 = tpu.iota {dimensions = array<i32: 0>} : vector<8x8xi32>
    %27 = vector.broadcast %24 : i32 to vector<8x8xi32>
    %28 = arith.addi %26, %27 : vector<8x8xi32>
    %29 = tpu.iota {dimensions = array<i32: 1>} : vector<8x8xi32>
    %30 = vector.broadcast %25 : i32 to vector<8x8xi32>
    %31 = arith.addi %29, %30 : vector<8x8xi32>
    %32 = arith.cmpi sgt, %31, %28 : vector<8x8xi32>
    %33 = arith.ori %23, %32 : vector<8x8xi1>
    %34 = vector.shape_cast %33 : vector<8x8xi1> to vector<1x8x8xi1>
    %cst_13 = arith.constant -1.000000e+05 : f32
    %35 = vector.shape_cast %34 : vector<1x8x8xi1> to vector<1x8x8xi1>
    %36 = vector.broadcast %35 : vector<1x8x8xi1> to vector<4x8x8xi1>
    %37 = vector.broadcast %cst_13 : f32 to vector<4x8x8xf32>
    %38 = arith.select %36, %37, %17 : vector<4x8x8xi1>, vector<4x8x8xf32>
    %cst_14 = arith.constant dense<0xFF800000> : vector<4x8xf32>
    %39 = vector.multi_reduction <maximumf>, %38, %cst_14 [2] : vector<4x8x8xf32> to vector<4x8xf32>
    %40 = vector.shape_cast %39 : vector<4x8xf32> to vector<4x8x1xf32>
    %c0_15 = arith.constant 0 : index
    %c0_16 = arith.constant 0 : index
    %c0_17 = arith.constant 0 : index
    %41 = vector.load %arg7[%c0_15, %c0_16, %c0_17] : memref<4x8x1xf32, #tpu.memory_space<vmem>>, vector<4x8x1xf32>
    %42 = arith.maximumf %41, %40 : vector<4x8x1xf32>
    %43 = arith.subf %41, %42 : vector<4x8x1xf32>
    %44 = math.exp %43 : vector<4x8x1xf32>
    %45 = vector.broadcast %42 : vector<4x8x1xf32> to vector<4x8x8xf32>
    %46 = arith.subf %38, %45 : vector<4x8x8xf32>
    %47 = math.exp %46 : vector<4x8x8xf32>
    %c0_18 = arith.constant 0 : index
    %c0_19 = arith.constant 0 : index
    %c0_20 = arith.constant 0 : index
    %48 = vector.load %arg8[%c0_18, %c0_19, %c0_20] : memref<4x8x1xf32, #tpu.memory_space<vmem>>, vector<4x8x1xf32>
    %49 = arith.mulf %44, %48 : vector<4x8x1xf32>
    %cst_21 = arith.constant dense<0.000000e+00> : vector<4x8xf32>
    %50 = vector.multi_reduction <add>, %47, %cst_21 [2] : vector<4x8x8xf32> to vector<4x8xf32>
    %51 = vector.shape_cast %50 : vector<4x8xf32> to vector<4x8x1xf32>
    %52 = arith.addf %49, %51 : vector<4x8x1xf32>
    %c0_22 = arith.constant 0 : index
    %c0_23 = arith.constant 0 : index
    %c0_24 = arith.constant 0 : index
    %53 = vector.load %arg8[%c0_22, %c0_23, %c0_24] : memref<4x8x1xf32, #tpu.memory_space<vmem>>, vector<4x8x1xf32>
    tpu.vector_store %arg8[%c0_22, %c0_23, %c0_24], %52 {strides = array<i32>} : memref<4x8x1xf32, #tpu.memory_space<vmem>>, vector<4x8x1xf32>,
    %c0_25 = arith.constant 0 : index
    %c0_26 = arith.constant 0 : index
    %c0_27 = arith.constant 0 : index
    %54 = vector.load %arg7[%c0_25, %c0_26, %c0_27] : memref<4x8x1xf32, #tpu.memory_space<vmem>>, vector<4x8x1xf32>
    tpu.vector_store %arg7[%c0_25, %c0_26, %c0_27], %42 {strides = array<i32>} : memref<4x8x1xf32, #tpu.memory_space<vmem>>, vector<4x8x1xf32>,
    "tpu.trace_start"() <{level = 10 : i32, message = "hqk,hkd->hqd"}> : () -> ()
    %cst_28 = arith.constant dense<0.000000e+00> : vector<4x8x32xf32>
    %55 = tpu.matmul %47, %16, %cst_28 {dimension_numbers = #tpu.dot_dimension_numbers<[2], [1], [1], [2], [0, 0, 0, 1, 1, 2], [0], [0]>} : vector<4x8x8xf32>, vector<4x8x32xf32>, vector<4x8x32xf32> -> vector<4x8x32xf32>
    "tpu.trace_stop"() : () -> ()
    %c0_29 = arith.constant 0 : index
    %c0_30 = arith.constant 0 : index
    %c0_31 = arith.constant 0 : index
    %56 = vector.load %arg9[%c0_29, %c0_30, %c0_31] : memref<4x8x32xf32, #tpu.memory_space<vmem>>, vector<4x8x32xf32>
    %57 = vector.broadcast %44 : vector<4x8x1xf32> to vector<4x8x32xf32>
    %58 = arith.mulf %57, %56 : vector<4x8x32xf32>
    %59 = arith.addf %58, %55 : vector<4x8x32xf32>
    %c0_32 = arith.constant 0 : index
    %c0_33 = arith.constant 0 : index
    %c0_34 = arith.constant 0 : index
    %60 = vector.load %arg9[%c0_32, %c0_33, %c0_34] : memref<4x8x32xf32, #tpu.memory_space<vmem>>, vector<4x8x32xf32>
    tpu.vector_store %arg9[%c0_32, %c0_33, %c0_34], %59 {strides = array<i32>} : memref<4x8x32xf32, #tpu.memory_space<vmem>>, vector<4x8x32xf32>,
    %c0_i32_35 = arith.constant 0 : i32
    %61 = arith.cmpi eq, %arg2, %c0_i32_35 : i32
    %62 = arith.extui %61 : i1 to i32
    %c0_i32_36 = arith.constant 0 : i32
    %63 = arith.cmpi ne, %62, %c0_i32_36 : i32
    scf.if %63 {
      %c0_37 = arith.constant 0 : index
      %c0_38 = arith.constant 0 : index
      %c0_39 = arith.constant 0 : index
      %64 = vector.load %arg9[%c0_37, %c0_38, %c0_39] : memref<4x8x32xf32, #tpu.memory_space<vmem>>, vector<4x8x32xf32>
      %c0_40 = arith.constant 0 : index
      %c0_41 = arith.constant 0 : index
      %c0_42 = arith.constant 0 : index
      %65 = vector.load %arg8[%c0_40, %c0_41, %c0_42] : memref<4x8x1xf32, #tpu.memory_space<vmem>>, vector<4x8x1xf32>
      %66 = tpu.reciprocal %65 {approx = true} : vector<4x8x1xf32> -> vector<4x8x1xf32>
      %67 = vector.broadcast %66 : vector<4x8x1xf32> to vector<4x8x32xf32>
      %68 = arith.mulf %64, %67 : vector<4x8x32xf32>
      %69 = tpu.transpose %68, [1, 0, 2] : vector<4x8x32xf32> -> vector<8x4x32xf32>
      %70 = vector.shape_cast %69 : vector<8x4x32xf32> to vector<8x128xf32>
      %c0_43 = arith.constant 0 : index
      %c0_44 = arith.constant 0 : index
      %c0_45 = arith.constant 0 : index
      %71 = vector.load %arg6[%c0_43, %c0_44, %c0_45] : memref<1x8x128xf32, #tpu.memory_space<vmem>>, vector<1x8x128xf32>
      %72 = vector.shape_cast %71 : vector<1x8x128xf32> to vector<8x128xf32>
      %73 = vector.shape_cast %70 : vector<8x128xf32> to vector<1x8x128xf32>
      tpu.vector_store %arg6[%c0_43, %c0_44, %c0_45], %73 {strides = array<i32>} : memref<1x8x128xf32, #tpu.memory_space<vmem>>, vector<1x8x128xf32>,
    } else {
    }
    return
  }
  func.func @transform_0(%arg0: i32, %arg1: i32, %arg2: i32) -> (i32, i32, i32) {
    %c0_i32 = arith.constant 0 : i32
    %c0_i32_0 = arith.constant 0 : i32
    return %arg0, %c0_i32, %arg2 : i32, i32, i32
  }
  func.func @transform_1(%arg0: i32, %arg1: i32, %arg2: i32) -> (i32, i32, i32) {
    %c0_i32 = arith.constant 0 : i32
    %c0_i32_0 = arith.constant 0 : i32
    return %arg0, %arg1, %c0_i32 : i32, i32, i32
  }
  func.func @transform_2(%arg0: i32, %arg1: i32, %arg2: i32) -> (i32, i32, i32) {
    %c0_i32 = arith.constant 0 : i32
    %c0_i32_0 = arith.constant 0 : i32
    return %arg0, %arg2, %c0_i32 : i32, i32, i32
  }
  func.func @transform_3(%arg0: i32, %arg1: i32, %arg2: i32) -> (i32, i32, i32) {
    %c0_i32 = arith.constant 0 : i32
    %c0_i32_0 = arith.constant 0 : i32
    return %arg0, %arg1, %c0_i32 : i32, i32, i32
  }
}

module attributes {stable_mosaic.version = 11 : i64} {
  func.func @_linear_kernel(%arg0: i32, %arg1: i32, %arg2: i32, %arg3: memref<16x128xf32, #tpu.memory_space<vmem>>, %arg4: memref<128x128xf32, #tpu.memory_space<vmem>>, %arg5: memref<1x128xf32, #tpu.memory_space<vmem>>, %arg6: memref<16x128xf32, #tpu.memory_space<vmem>>, %arg7: memref<16x128xf32, #tpu.memory_space<vmem>>, %arg8: memref<16x128xf32, #tpu.memory_space<vmem>>) attributes {dimension_semantics = [#tpu.dimension_semantics<parallel>, #tpu.dimension_semantics<parallel>, #tpu.dimension_semantics<arbitrary>], iteration_bounds = array<i64: 1, 1, 1>, scalar_prefetch = 0 : i64, scratch_operands = 1 : i64, tpu.core_type = #tpu.core_type<tc>, window_params = [{transform_indices = @transform_0, window_bounds = array<i64: 16, 128>}, {transform_indices = @transform_1, window_bounds = array<i64: 128, 128>}, {transform_indices = @transform_2, window_bounds = array<i64: 1, 128>}, {transform_indices = @transform_3, window_bounds = array<i64: 16, 128>}, {transform_indices = @transform_4, window_bounds = array<i64: 16, 128>}]} {
    %c0_i32 = arith.constant 0 : i32
    %0 = arith.cmpi eq, %arg2, %c0_i32 : i32
    %1 = arith.extui %0 : i1 to i32
    %c0_i32_0 = arith.constant 0 : i32
    %2 = arith.cmpi ne, %1, %c0_i32_0 : i32
    scf.if %2 {
      %cst_10 = arith.constant 0.000000e+00 : f32
      %12 = vector.broadcast %cst_10 : f32 to vector<16x128xf32>
      %c0_11 = arith.constant 0 : index
      %c0_12 = arith.constant 0 : index
      %13 = vector.load %arg8[%c0_11, %c0_12] : memref<16x128xf32, #tpu.memory_space<vmem>>, vector<16x128xf32>
      tpu.vector_store %arg8[%c0_11, %c0_12], %12 {strides = array<i32>} : memref<16x128xf32, #tpu.memory_space<vmem>>, vector<16x128xf32>,
    } else {
    }
    %c0 = arith.constant 0 : index
    %c0_1 = arith.constant 0 : index
    %3 = vector.load %arg3[%c0, %c0_1] : memref<16x128xf32, #tpu.memory_space<vmem>>, vector<16x128xf32>
    %c0_2 = arith.constant 0 : index
    %c0_3 = arith.constant 0 : index
    %4 = vector.load %arg8[%c0_2, %c0_3] : memref<16x128xf32, #tpu.memory_space<vmem>>, vector<16x128xf32>
    %c0_4 = arith.constant 0 : index
    %c0_5 = arith.constant 0 : index
    %5 = vector.load %arg4[%c0_4, %c0_5] : memref<128x128xf32, #tpu.memory_space<vmem>>, vector<128x128xf32>
    %cst = arith.constant dense<0.000000e+00> : vector<16x128xf32>
    %6 = tpu.matmul %3, %5, %cst {dimension_numbers = #tpu.dot_dimension_numbers<[1], [0], [0], [1], [0, 0, 1, 1], [], []>} : vector<16x128xf32>, vector<128x128xf32>, vector<16x128xf32> -> vector<16x128xf32>
    %7 = arith.addf %4, %6 : vector<16x128xf32>
    %c0_6 = arith.constant 0 : index
    %c0_7 = arith.constant 0 : index
    %8 = vector.load %arg8[%c0_6, %c0_7] : memref<16x128xf32, #tpu.memory_space<vmem>>, vector<16x128xf32>
    tpu.vector_store %arg8[%c0_6, %c0_7], %7 {strides = array<i32>} : memref<16x128xf32, #tpu.memory_space<vmem>>, vector<16x128xf32>,
    %c0_i32_8 = arith.constant 0 : i32
    %9 = arith.cmpi eq, %arg2, %c0_i32_8 : i32
    %10 = arith.extui %9 : i1 to i32
    %c0_i32_9 = arith.constant 0 : i32
    %11 = arith.cmpi ne, %10, %c0_i32_9 : i32
    scf.if %11 {
      %c0_10 = arith.constant 0 : index
      %c0_11 = arith.constant 0 : index
      %12 = vector.load %arg8[%c0_10, %c0_11] : memref<16x128xf32, #tpu.memory_space<vmem>>, vector<16x128xf32>
      %c0_12 = arith.constant 0 : index
      %c0_13 = arith.constant 0 : index
      %13 = vector.load %arg5[%c0_12, %c0_13] : memref<1x128xf32, #tpu.memory_space<vmem>>, vector<1x128xf32>
      %14 = vector.broadcast %13 : vector<1x128xf32> to vector<16x128xf32>
      %15 = arith.addf %12, %14 : vector<16x128xf32>
      %c0_14 = arith.constant 0 : index
      %c0_15 = arith.constant 0 : index
      %16 = vector.load %arg6[%c0_14, %c0_15] : memref<16x128xf32, #tpu.memory_space<vmem>>, vector<16x128xf32>
      %17 = arith.addf %15, %16 : vector<16x128xf32>
      %c0_16 = arith.constant 0 : index
      %c0_17 = arith.constant 0 : index
      %18 = vector.load %arg7[%c0_16, %c0_17] : memref<16x128xf32, #tpu.memory_space<vmem>>, vector<16x128xf32>
      tpu.vector_store %arg7[%c0_16, %c0_17], %17 {strides = array<i32>} : memref<16x128xf32, #tpu.memory_space<vmem>>, vector<16x128xf32>,
    } else {
    }
    return
  }
  func.func @transform_0(%arg0: i32, %arg1: i32, %arg2: i32) -> (i32, i32) {
    %c0_i32 = arith.constant 0 : i32
    return %arg0, %arg2 : i32, i32
  }
  func.func @transform_1(%arg0: i32, %arg1: i32, %arg2: i32) -> (i32, i32) {
    %c0_i32 = arith.constant 0 : i32
    return %arg2, %arg1 : i32, i32
  }
  func.func @transform_2(%arg0: i32, %arg1: i32, %arg2: i32) -> (i32, i32) {
    %c0_i32 = arith.constant 0 : i32
    %c0_i32_0 = arith.constant 0 : i32
    return %c0_i32, %arg1 : i32, i32
  }
  func.func @transform_3(%arg0: i32, %arg1: i32, %arg2: i32) -> (i32, i32) {
    %c0_i32 = arith.constant 0 : i32
    return %arg0, %arg1 : i32, i32
  }
  func.func @transform_4(%arg0: i32, %arg1: i32, %arg2: i32) -> (i32, i32) {
    %c0_i32 = arith.constant 0 : i32
    return %arg0, %arg1 : i32, i32
  }
}

module attributes {stable_mosaic.version = 11 : i64} {
  func.func @_linear_kernel(%arg0: i32, %arg1: i32, %arg2: i32, %arg3: memref<32x128xf32, #tpu.memory_space<vmem>>, %arg4: memref<128x256xf32, #tpu.memory_space<vmem>>, %arg5: memref<1x256xf32, #tpu.memory_space<vmem>>, %arg6: memref<32x256xf32, #tpu.memory_space<vmem>>, %arg7: memref<32x256xf32, #tpu.memory_space<vmem>>) attributes {dimension_semantics = [#tpu.dimension_semantics<parallel>, #tpu.dimension_semantics<parallel>, #tpu.dimension_semantics<arbitrary>], iteration_bounds = array<i64: 1, 1, 1>, scalar_prefetch = 0 : i64, scratch_operands = 1 : i64, tpu.core_type = #tpu.core_type<tc>, window_params = [{transform_indices = @transform_0, window_bounds = array<i64: 32, 128>}, {transform_indices = @transform_1, window_bounds = array<i64: 128, 256>}, {transform_indices = @transform_2, window_bounds = array<i64: 1, 256>}, {transform_indices = @transform_3, window_bounds = array<i64: 32, 256>}]} {
    %c0_i32 = arith.constant 0 : i32
    %0 = arith.cmpi eq, %arg2, %c0_i32 : i32
    %1 = arith.extui %0 : i1 to i32
    %c0_i32_0 = arith.constant 0 : i32
    %2 = arith.cmpi ne, %1, %c0_i32_0 : i32
    scf.if %2 {
      %cst_10 = arith.constant 0.000000e+00 : f32
      %12 = vector.broadcast %cst_10 : f32 to vector<32x256xf32>
      %c0_11 = arith.constant 0 : index
      %c0_12 = arith.constant 0 : index
      %13 = vector.load %arg7[%c0_11, %c0_12] : memref<32x256xf32, #tpu.memory_space<vmem>>, vector<32x256xf32>
      tpu.vector_store %arg7[%c0_11, %c0_12], %12 {strides = array<i32>} : memref<32x256xf32, #tpu.memory_space<vmem>>, vector<32x256xf32>,
    } else {
    }
    %c0 = arith.constant 0 : index
    %c0_1 = arith.constant 0 : index
    %3 = vector.load %arg3[%c0, %c0_1] : memref<32x128xf32, #tpu.memory_space<vmem>>, vector<32x128xf32>
    %c0_2 = arith.constant 0 : index
    %c0_3 = arith.constant 0 : index
    %4 = vector.load %arg7[%c0_2, %c0_3] : memref<32x256xf32, #tpu.memory_space<vmem>>, vector<32x256xf32>
    %c0_4 = arith.constant 0 : index
    %c0_5 = arith.constant 0 : index
    %5 = vector.load %arg4[%c0_4, %c0_5] : memref<128x256xf32, #tpu.memory_space<vmem>>, vector<128x256xf32>
    %cst = arith.constant dense<0.000000e+00> : vector<32x256xf32>
    %6 = tpu.matmul %3, %5, %cst {dimension_numbers = #tpu.dot_dimension_numbers<[1], [0], [0], [1], [0, 0, 1, 1], [], []>} : vector<32x128xf32>, vector<128x256xf32>, vector<32x256xf32> -> vector<32x256xf32>
    %7 = arith.addf %4, %6 : vector<32x256xf32>
    %c0_6 = arith.constant 0 : index
    %c0_7 = arith.constant 0 : index
    %8 = vector.load %arg7[%c0_6, %c0_7] : memref<32x256xf32, #tpu.memory_space<vmem>>, vector<32x256xf32>
    tpu.vector_store %arg7[%c0_6, %c0_7], %7 {strides = array<i32>} : memref<32x256xf32, #tpu.memory_space<vmem>>, vector<32x256xf32>,
    %c0_i32_8 = arith.constant 0 : i32
    %9 = arith.cmpi eq, %arg2, %c0_i32_8 : i32
    %10 = arith.extui %9 : i1 to i32
    %c0_i32_9 = arith.constant 0 : i32
    %11 = arith.cmpi ne, %10, %c0_i32_9 : i32
    scf.if %11 {
      %c0_10 = arith.constant 0 : index
      %c0_11 = arith.constant 0 : index
      %12 = vector.load %arg7[%c0_10, %c0_11] : memref<32x256xf32, #tpu.memory_space<vmem>>, vector<32x256xf32>
      %c0_12 = arith.constant 0 : index
      %c0_13 = arith.constant 0 : index
      %13 = vector.load %arg5[%c0_12, %c0_13] : memref<1x256xf32, #tpu.memory_space<vmem>>, vector<1x256xf32>
      %14 = vector.broadcast %13 : vector<1x256xf32> to vector<32x256xf32>
      %15 = arith.addf %12, %14 : vector<32x256xf32>
      %c0_14 = arith.constant 0 : index
      %c0_15 = arith.constant 0 : index
      %16 = vector.load %arg6[%c0_14, %c0_15] : memref<32x256xf32, #tpu.memory_space<vmem>>, vector<32x256xf32>
      tpu.vector_store %arg6[%c0_14, %c0_15], %15 {strides = array<i32>} : memref<32x256xf32, #tpu.memory_space<vmem>>, vector<32x256xf32>,
    } else {
    }
    return
  }
  func.func @transform_0(%arg0: i32, %arg1: i32, %arg2: i32) -> (i32, i32) {
    %c0_i32 = arith.constant 0 : i32
    return %arg0, %arg2 : i32, i32
  }
  func.func @transform_1(%arg0: i32, %arg1: i32, %arg2: i32) -> (i32, i32) {
    %c0_i32 = arith.constant 0 : i32
    return %arg2, %arg1 : i32, i32
  }
  func.func @transform_2(%arg0: i32, %arg1: i32, %arg2: i32) -> (i32, i32) {
    %c0_i32 = arith.constant 0 : i32
    %c0_i32_0 = arith.constant 0 : i32
    return %c0_i32, %arg1 : i32, i32
  }
  func.func @transform_3(%arg0: i32, %arg1: i32, %arg2: i32) -> (i32, i32) {
    %c0_i32 = arith.constant 0 : i32
    return %arg0, %arg1 : i32, i32
  }
}

module attributes {stable_mosaic.version = 11 : i64} {
  func.func @_linear_kernel(%arg0: i32, %arg1: i32, %arg2: i32, %arg3: memref<16x128xf32, #tpu.memory_space<vmem>>, %arg4: memref<128x256xf32, #tpu.memory_space<vmem>>, %arg5: memref<1x256xf32, #tpu.memory_space<vmem>>, %arg6: memref<1x128xf32, #tpu.memory_space<vmem>>, %arg7: memref<1x128xf32, #tpu.memory_space<vmem>>, %arg8: memref<16x256xf32, #tpu.memory_space<vmem>>, %arg9: memref<16x256xf32, #tpu.memory_space<vmem>>) attributes {dimension_semantics = [#tpu.dimension_semantics<parallel>, #tpu.dimension_semantics<parallel>, #tpu.dimension_semantics<arbitrary>], iteration_bounds = array<i64: 1, 1, 1>, scalar_prefetch = 0 : i64, scratch_operands = 1 : i64, tpu.core_type = #tpu.core_type<tc>, window_params = [{transform_indices = @transform_0, window_bounds = array<i64: 16, 128>}, {transform_indices = @transform_1, window_bounds = array<i64: 128, 256>}, {transform_indices = @transform_2, window_bounds = array<i64: 1, 256>}, {pipeline_mode = #tpu.pipeline_mode<synchronous>, transform_indices = @transform_3, window_bounds = array<i64: 1, 128>}, {pipeline_mode = #tpu.pipeline_mode<synchronous>, transform_indices = @transform_4, window_bounds = array<i64: 1, 128>}, {transform_indices = @transform_5, window_bounds = array<i64: 16, 256>}]} {
    %c0_i32 = arith.constant 0 : i32
    %0 = arith.cmpi eq, %arg2, %c0_i32 : i32
    %1 = arith.extui %0 : i1 to i32
    %c0_i32_0 = arith.constant 0 : i32
    %2 = arith.cmpi ne, %1, %c0_i32_0 : i32
    scf.if %2 {
      %cst_19 = arith.constant 0.000000e+00 : f32
      %34 = vector.broadcast %cst_19 : f32 to vector<16x256xf32>
      %c0_20 = arith.constant 0 : index
      %c0_21 = arith.constant 0 : index
      %35 = vector.load %arg9[%c0_20, %c0_21] : memref<16x256xf32, #tpu.memory_space<vmem>>, vector<16x256xf32>
      tpu.vector_store %arg9[%c0_20, %c0_21], %34 {strides = array<i32>} : memref<16x256xf32, #tpu.memory_space<vmem>>, vector<16x256xf32>,
    } else {
    }
    %c0 = arith.constant 0 : index
    %c0_1 = arith.constant 0 : index
    %3 = vector.load %arg3[%c0, %c0_1] : memref<16x128xf32, #tpu.memory_space<vmem>>, vector<16x128xf32>
    %cst = arith.constant dense<0.000000e+00> : vector<16xf32>
    %4 = vector.multi_reduction <add>, %3, %cst [1] : vector<16x128xf32> to vector<16xf32>
    %5 = vector.shape_cast %4 : vector<16xf32> to vector<16x1xf32>
    %cst_2 = arith.constant 1.280000e+02 : f32
    %6 = vector.broadcast %cst_2 : f32 to vector<16x1xf32>
    %7 = arith.divf %5, %6 : vector<16x1xf32>
    %8 = vector.broadcast %7 : vector<16x1xf32> to vector<16x128xf32>
    %9 = arith.subf %3, %8 : vector<16x128xf32>
    %10 = arith.mulf %9, %9 : vector<16x128xf32>
    %cst_3 = arith.constant dense<0.000000e+00> : vector<16xf32>
    %11 = vector.multi_reduction <add>, %10, %cst_3 [1] : vector<16x128xf32> to vector<16xf32>
    %12 = vector.shape_cast %11 : vector<16xf32> to vector<16x1xf32>
    %cst_4 = arith.constant 1.280000e+02 : f32
    %13 = vector.broadcast %cst_4 : f32 to vector<16x1xf32>
    %14 = arith.divf %12, %13 : vector<16x1xf32>
    %cst_5 = arith.constant 9.99999974E-6 : f32
    %15 = vector.broadcast %cst_5 : f32 to vector<16x1xf32>
    %16 = arith.addf %14, %15 : vector<16x1xf32>
    %17 = math.rsqrt %16 : vector<16x1xf32>
    %18 = vector.broadcast %17 : vector<16x1xf32> to vector<16x128xf32>
    %19 = arith.mulf %9, %18 : vector<16x128xf32>
    %c0_6 = arith.constant 0 : index
    %c0_7 = arith.constant 0 : index
    %20 = vector.load %arg6[%c0_6, %c0_7] : memref<1x128xf32, #tpu.memory_space<vmem>>, vector<1x128xf32>
    %21 = vector.broadcast %20 : vector<1x128xf32> to vector<16x128xf32>
    %22 = arith.mulf %19, %21 : vector<16x128xf32>
    %c0_8 = arith.constant 0 : index
    %c0_9 = arith.constant 0 : index
    %23 = vector.load %arg7[%c0_8, %c0_9] : memref<1x128xf32, #tpu.memory_space<vmem>>, vector<1x128xf32>
    %24 = vector.broadcast %23 : vector<1x128xf32> to vector<16x128xf32>
    %25 = arith.addf %22, %24 : vector<16x128xf32>
    %c0_10 = arith.constant 0 : index
    %c0_11 = arith.constant 0 : index
    %26 = vector.load %arg9[%c0_10, %c0_11] : memref<16x256xf32, #tpu.memory_space<vmem>>, vector<16x256xf32>
    %c0_12 = arith.constant 0 : index
    %c0_13 = arith.constant 0 : index
    %27 = vector.load %arg4[%c0_12, %c0_13] : memref<128x256xf32, #tpu.memory_space<vmem>>, vector<128x256xf32>
    %cst_14 = arith.constant dense<0.000000e+00> : vector<16x256xf32>
    %28 = tpu.matmul %25, %27, %cst_14 {dimension_numbers = #tpu.dot_dimension_numbers<[1], [0], [0], [1], [0, 0, 1, 1], [], []>} : vector<16x128xf32>, vector<128x256xf32>, vector<16x256xf32> -> vector<16x256xf32>
    %29 = arith.addf %26, %28 : vector<16x256xf32>
    %c0_15 = arith.constant 0 : index
    %c0_16 = arith.constant 0 : index
    %30 = vector.load %arg9[%c0_15, %c0_16] : memref<16x256xf32, #tpu.memory_space<vmem>>, vector<16x256xf32>
    tpu.vector_store %arg9[%c0_15, %c0_16], %29 {strides = array<i32>} : memref<16x256xf32, #tpu.memory_space<vmem>>, vector<16x256xf32>,
    %c0_i32_17 = arith.constant 0 : i32
    %31 = arith.cmpi eq, %arg2, %c0_i32_17 : i32
    %32 = arith.extui %31 : i1 to i32
    %c0_i32_18 = arith.constant 0 : i32
    %33 = arith.cmpi ne, %32, %c0_i32_18 : i32
    scf.if %33 {
      %c0_19 = arith.constant 0 : index
      %c0_20 = arith.constant 0 : index
      %34 = vector.load %arg9[%c0_19, %c0_20] : memref<16x256xf32, #tpu.memory_space<vmem>>, vector<16x256xf32>
      %c0_21 = arith.constant 0 : index
      %c0_22 = arith.constant 0 : index
      %35 = vector.load %arg5[%c0_21, %c0_22] : memref<1x256xf32, #tpu.memory_space<vmem>>, vector<1x256xf32>
      %36 = vector.broadcast %35 : vector<1x256xf32> to vector<16x256xf32>
      %37 = arith.addf %34, %36 : vector<16x256xf32>
      %cst_23 = arith.constant 0.000000e+00 : f32
      %38 = vector.broadcast %cst_23 : f32 to vector<16x256xf32>
      %39 = arith.maximumf %37, %38 : vector<16x256xf32>
      %c0_24 = arith.constant 0 : index
      %c0_25 = arith.constant 0 : index
      %40 = vector.load %arg8[%c0_24, %c0_25] : memref<16x256xf32, #tpu.memory_space<vmem>>, vector<16x256xf32>
      tpu.vector_store %arg8[%c0_24, %c0_25], %39 {strides = array<i32>} : memref<16x256xf32, #tpu.memory_space<vmem>>, vector<16x256xf32>,
    } else {
    }
    return
  }
  func.func @transform_0(%arg0: i32, %arg1: i32, %arg2: i32) -> (i32, i32) {
    %c0_i32 = arith.constant 0 : i32
    return %arg0, %arg2 : i32, i32
  }
  func.func @transform_1(%arg0: i32, %arg1: i32, %arg2: i32) -> (i32, i32) {
    %c0_i32 = arith.constant 0 : i32
    return %arg2, %arg1 : i32, i32
  }
  func.func @transform_2(%arg0: i32, %arg1: i32, %arg2: i32) -> (i32, i32) {
    %c0_i32 = arith.constant 0 : i32
    %c0_i32_0 = arith.constant 0 : i32
    return %c0_i32, %arg1 : i32, i32
  }
  func.func @transform_3(%arg0: i32, %arg1: i32, %arg2: i32) -> (i32, i32) {
    %c0_i32 = arith.constant 0 : i32
    %c0_i32_0 = arith.constant 0 : i32
    %c0_i32_1 = arith.constant 0 : i32
    return %c0_i32, %c0_i32_0 : i32, i32
  }
  func.func @transform_4(%arg0: i32, %arg1: i32, %arg2: i32) -> (i32, i32) {
    %c0_i32 = arith.constant 0 : i32
    %c0_i32_0 = arith.constant 0 : i32
    %c0_i32_1 = arith.constant 0 : i32
    return %c0_i32, %c0_i32_0 : i32, i32
  }
  func.func @transform_5(%arg0: i32, %arg1: i32, %arg2: i32) -> (i32, i32) {
    %c0_i32 = arith.constant 0 : i32
    return %arg0, %arg1 : i32, i32
  }
}

module attributes {stable_mosaic.version = 11 : i64} {
  func.func @_flash_attn_kernel(%arg0: i32, %arg1: i32, %arg2: i32, %arg3: memref<1x1x16xi32, #tpu.memory_space<vmem>>, %arg4: memref<1x8x128xf32, #tpu.memory_space<vmem>>, %arg5: memref<1x16x256xf32, #tpu.memory_space<vmem>>, %arg6: memref<1x8x128xf32, #tpu.memory_space<vmem>>, %arg7: memref<4x8x1xf32, #tpu.memory_space<vmem>>, %arg8: memref<4x8x1xf32, #tpu.memory_space<vmem>>, %arg9: memref<4x8x32xf32, #tpu.memory_space<vmem>>) attributes {dimension_semantics = [#tpu.dimension_semantics<parallel>, #tpu.dimension_semantics<parallel>, #tpu.dimension_semantics<arbitrary>], iteration_bounds = array<i64: 2, 1, 1>, scalar_prefetch = 0 : i64, scratch_operands = 3 : i64, tpu.core_type = #tpu.core_type<tc>, window_params = [{transform_indices = @transform_0, window_bounds = array<i64: 1, 1, 16>}, {transform_indices = @transform_1, window_bounds = array<i64: 1, 8, 128>}, {transform_indices = @transform_2, window_bounds = array<i64: 1, 16, 256>}, {transform_indices = @transform_3, window_bounds = array<i64: 1, 8, 128>}]} {
    %c0_i32 = arith.constant 0 : i32
    %0 = arith.cmpi eq, %arg2, %c0_i32 : i32
    %1 = arith.extui %0 : i1 to i32
    %c0_i32_0 = arith.constant 0 : i32
    %2 = arith.cmpi ne, %1, %c0_i32_0 : i32
    scf.if %2 {
      %cst_37 = arith.constant 0xFF800000 : f32
      %54 = vector.broadcast %cst_37 : f32 to vector<4x8x1xf32>
      %c0_38 = arith.constant 0 : index
      %c0_39 = arith.constant 0 : index
      %c0_40 = arith.constant 0 : index
      %55 = vector.load %arg7[%c0_38, %c0_39, %c0_40] : memref<4x8x1xf32, #tpu.memory_space<vmem>>, vector<4x8x1xf32>
      tpu.vector_store %arg7[%c0_38, %c0_39, %c0_40], %54 {strides = array<i32>} : memref<4x8x1xf32, #tpu.memory_space<vmem>>, vector<4x8x1xf32>,
      %cst_41 = arith.constant 0.000000e+00 : f32
      %56 = vector.broadcast %cst_41 : f32 to vector<4x8x1xf32>
      %c0_42 = arith.constant 0 : index
      %c0_43 = arith.constant 0 : index
      %c0_44 = arith.constant 0 : index
      %57 = vector.load %arg8[%c0_42, %c0_43, %c0_44] : memref<4x8x1xf32, #tpu.memory_space<vmem>>, vector<4x8x1xf32>
      tpu.vector_store %arg8[%c0_42, %c0_43, %c0_44], %56 {strides = array<i32>} : memref<4x8x1xf32, #tpu.memory_space<vmem>>, vector<4x8x1xf32>,
      %cst_45 = arith.constant 0.000000e+00 : f32
      %58 = vector.broadcast %cst_45 : f32 to vector<4x8x32xf32>
      %c0_46 = arith.constant 0 : index
      %c0_47 = arith.constant 0 : index
      %c0_48 = arith.constant 0 : index
      %59 = vector.load %arg9[%c0_46, %c0_47, %c0_48] : memref<4x8x32xf32, #tpu.memory_space<vmem>>, vector<4x8x32xf32>
      tpu.vector_store %arg9[%c0_46, %c0_47, %c0_48], %58 {strides = array<i32>} : memref<4x8x32xf32, #tpu.memory_space<vmem>>, vector<4x8x32xf32>,
    } else {
    }
    %c0 = arith.constant 0 : index
    %c0_1 = arith.constant 0 : index
    %c0_2 = arith.constant 0 : index
    %3 = vector.load %arg4[%c0, %c0_1, %c0_2] : memref<1x8x128xf32, #tpu.memory_space<vmem>>, vector<1x8x128xf32>
    %4 = vector.shape_cast %3 : vector<1x8x128xf32> to vector<8x128xf32>
    %cst = arith.constant 0.0883883461 : f32
    %5 = vector.broadcast %cst : f32 to vector<8x128xf32>
    %6 = arith.mulf %4, %5 : vector<8x128xf32>
    %c0_3 = arith.constant 0 : index
    %c0_4 = arith.constant 0 : index
    %c0_5 = arith.constant 0 : index
    %7 = vector.load %arg5[%c0_3, %c0_4, %c0_5] : memref<1x16x256xf32, #tpu.memory_space<vmem>>, vector<1x16x128xf32>
    %8 = vector.shape_cast %7 : vector<1x16x128xf32> to vector<16x128xf32>
    %c0_6 = arith.constant 0 : index
    %c0_7 = arith.constant 0 : index
    %c128 = arith.constant 128 : index
    %9 = vector.load %arg5[%c0_6, %c0_7, %c128] : memref<1x16x256xf32, #tpu.memory_space<vmem>>, vector<1x16x128xf32>
    %10 = vector.shape_cast %9 : vector<1x16x128xf32> to vector<16x128xf32>
    %11 = vector.shape_cast %6 : vector<8x128xf32> to vector<8x4x32xf32>
    %12 = tpu.transpose %11, [1, 0, 2] : vector<8x4x32xf32> -> vector<4x8x32xf32>
    %13 = vector.shape_cast %8 : vector<16x128xf32> to vector<16x4x32xf32>
    %14 = tpu.transpose %13, [1, 0, 2] : vector<16x4x32xf32> -> vector<4x16x32xf32>
    %15 = vector.shape_cast %10 : vector<16x128xf32> to vector<16x4x32xf32>
    %16 = tpu.transpose %15, [1, 0, 2] : vector<16x4x32xf32> -> vector<4x16x32xf32>
    "tpu.trace_start"() <{level = 10 : i32, message = "hqd,hkd->hqk"}> : () -> ()
    %cst_8 = arith.constant dense<0.000000e+00> : vector<4x8x16xf32>
    %17 = tpu.matmul %12, %14, %cst_8 {dimension_numbers = #tpu.dot_dimension_numbers<[2], [2], [1], [1], [0, 0, 0, 1, 1, 1], [0], [0]>} : vector<4x8x32xf32>, vector<4x16x32xf32>, vector<4x8x16xf32> -> vector<4x8x16xf32>
    "tpu.trace_stop"() : () -> ()
    %c0_9 = arith.constant 0 : index
    %c0_10 = arith.constant 0 : index
    %c0_11 = arith.constant 0 : index
    %18 = vector.load %arg3[%c0_9, %c0_10, %c0_11] : memref<1x1x16xi32, #tpu.memory_space<vmem>>, vector<1x1x16xi32>
    %19 = vector.shape_cast %18 : vector<1x1x16xi32> to vector<1x16xi32>
    %c0_i32_12 = arith.constant 0 : i32
    %20 = vector.broadcast %c0_i32_12 : i32 to vector<1x16xi32>
    %21 = arith.cmpi ne, %19, %20 : vector<1x16xi32>
    %22 = vector.shape_cast %21 : vector<1x16xi1> to vector<1x16xi1>
    %23 = vector.broadcast %22 : vector<1x16xi1> to vector<8x16xi1>
    %24 = vector.shape_cast %23 : vector<8x16xi1> to vector<1x8x16xi1>
    %cst_13 = arith.constant -1.000000e+05 : f32
    %25 = vector.shape_cast %24 : vector<1x8x16xi1> to vector<1x8x16xi1>
    %26 = vector.broadcast %25 : vector<1x8x16xi1> to vector<4x8x16xi1>
    %27 = vector.broadcast %cst_13 : f32 to vector<4x8x16xf32>
    %28 = arith.select %26, %27, %17 : vector<4x8x16xi1>, vector<4x8x16xf32>
    %cst_14 = arith.constant dense<0xFF800000> : vector<4x8xf32>
    %29 = vector.multi_reduction <maximumf>, %28, %cst_14 [2] : vector<4x8x16xf32> to vector<4x8xf32>
    %30 = vector.shape_cast %29 : vector<4x8xf32> to vector<4x8x1xf32>
    %c0_15 = arith.constant 0 : index
    %c0_16 = arith.constant 0 : index
    %c0_17 = arith.constant 0 : index
    %31 = vector.load %arg7[%c0_15, %c0_16, %c0_17] : memref<4x8x1xf32, #tpu.memory_space<vmem>>, vector<4x8x1xf32>
    %32 = arith.maximumf %31, %30 : vector<4x8x1xf32>
    %33 = arith.subf %31, %32 : vector<4x8x1xf32>
    %34 = math.exp %33 : vector<4x8x1xf32>
    %35 = vector.broadcast %32 : vector<4x8x1xf32> to vector<4x8x16xf32>
    %36 = arith.subf %28, %35 : vector<4x8x16xf32>
    %37 = math.exp %36 : vector<4x8x16xf32>
    %c0_18 = arith.constant 0 : index
    %c0_19 = arith.constant 0 : index
    %c0_20 = arith.constant 0 : index
    %38 = vector.load %arg8[%c0_18, %c0_19, %c0_20] : memref<4x8x1xf32, #tpu.memory_space<vmem>>, vector<4x8x1xf32>
    %39 = arith.mulf %34, %38 : vector<4x8x1xf32>
    %cst_21 = arith.constant dense<0.000000e+00> : vector<4x8xf32>
    %40 = vector.multi_reduction <add>, %37, %cst_21 [2] : vector<4x8x16xf32> to vector<4x8xf32>
    %41 = vector.shape_cast %40 : vector<4x8xf32> to vector<4x8x1xf32>
    %42 = arith.addf %39, %41 : vector<4x8x1xf32>
    %c0_22 = arith.constant 0 : index
    %c0_23 = arith.constant 0 : index
    %c0_24 = arith.constant 0 : index
    %43 = vector.load %arg8[%c0_22, %c0_23, %c0_24] : memref<4x8x1xf32, #tpu.memory_space<vmem>>, vector<4x8x1xf32>
    tpu.vector_store %arg8[%c0_22, %c0_23, %c0_24], %42 {strides = array<i32>} : memref<4x8x1xf32, #tpu.memory_space<vmem>>, vector<4x8x1xf32>,
    %c0_25 = arith.constant 0 : index
    %c0_26 = arith.constant 0 : index
    %c0_27 = arith.constant 0 : index
    %44 = vector.load %arg7[%c0_25, %c0_26, %c0_27] : memref<4x8x1xf32, #tpu.memory_space<vmem>>, vector<4x8x1xf32>
    tpu.vector_store %arg7[%c0_25, %c0_26, %c0_27], %32 {strides = array<i32>} : memref<4x8x1xf32, #tpu.memory_space<vmem>>, vector<4x8x1xf32>,
    "tpu.trace_start"() <{level = 10 : i32, message = "hqk,hkd->hqd"}> : () -> ()
    %cst_28 = arith.constant dense<0.000000e+00> : vector<4x8x32xf32>
    %45 = tpu.matmul %37, %16, %cst_28 {dimension_numbers = #tpu.dot_dimension_numbers<[2], [1], [1], [2], [0, 0, 0, 1, 1, 2], [0], [0]>} : vector<4x8x16xf32>, vector<4x16x32xf32>, vector<4x8x32xf32> -> vector<4x8x32xf32>
    "tpu.trace_stop"() : () -> ()
    %c0_29 = arith.constant 0 : index
    %c0_30 = arith.constant 0 : index
    %c0_31 = arith.constant 0 : index
    %46 = vector.load %arg9[%c0_29, %c0_30, %c0_31] : memref<4x8x32xf32, #tpu.memory_space<vmem>>, vector<4x8x32xf32>
    %47 = vector.broadcast %34 : vector<4x8x1xf32> to vector<4x8x32xf32>
    %48 = arith.mulf %47, %46 : vector<4x8x32xf32>
    %49 = arith.addf %48, %45 : vector<4x8x32xf32>
    %c0_32 = arith.constant 0 : index
    %c0_33 = arith.constant 0 : index
    %c0_34 = arith.constant 0 : index
    %50 = vector.load %arg9[%c0_32, %c0_33, %c0_34] : memref<4x8x32xf32, #tpu.memory_space<vmem>>, vector<4x8x32xf32>
    tpu.vector_store %arg9[%c0_32, %c0_33, %c0_34], %49 {strides = array<i32>} : memref<4x8x32xf32, #tpu.memory_space<vmem>>, vector<4x8x32xf32>,
    %c0_i32_35 = arith.constant 0 : i32
    %51 = arith.cmpi eq, %arg2, %c0_i32_35 : i32
    %52 = arith.extui %51 : i1 to i32
    %c0_i32_36 = arith.constant 0 : i32
    %53 = arith.cmpi ne, %52, %c0_i32_36 : i32
    scf.if %53 {
      %c0_37 = arith.constant 0 : index
      %c0_38 = arith.constant 0 : index
      %c0_39 = arith.constant 0 : index
      %54 = vector.load %arg9[%c0_37, %c0_38, %c0_39] : memref<4x8x32xf32, #tpu.memory_space<vmem>>, vector<4x8x32xf32>
      %c0_40 = arith.constant 0 : index
      %c0_41 = arith.constant 0 : index
      %c0_42 = arith.constant 0 : index
      %55 = vector.load %arg8[%c0_40, %c0_41, %c0_42] : memref<4x8x1xf32, #tpu.memory_space<vmem>>, vector<4x8x1xf32>
      %56 = tpu.reciprocal %55 {approx = true} : vector<4x8x1xf32> -> vector<4x8x1xf32>
      %57 = vector.broadcast %56 : vector<4x8x1xf32> to vector<4x8x32xf32>
      %58 = arith.mulf %54, %57 : vector<4x8x32xf32>
      %59 = tpu.transpose %58, [1, 0, 2] : vector<4x8x32xf32> -> vector<8x4x32xf32>
      %60 = vector.shape_cast %59 : vector<8x4x32xf32> to vector<8x128xf32>
      %c0_43 = arith.constant 0 : index
      %c0_44 = arith.constant 0 : index
      %c0_45 = arith.constant 0 : index
      %61 = vector.load %arg6[%c0_43, %c0_44, %c0_45] : memref<1x8x128xf32, #tpu.memory_space<vmem>>, vector<1x8x128xf32>
      %62 = vector.shape_cast %61 : vector<1x8x128xf32> to vector<8x128xf32>
      %63 = vector.shape_cast %60 : vector<8x128xf32> to vector<1x8x128xf32>
      tpu.vector_store %arg6[%c0_43, %c0_44, %c0_45], %63 {strides = array<i32>} : memref<1x8x128xf32, #tpu.memory_space<vmem>>, vector<1x8x128xf32>,
    } else {
    }
    return
  }
  func.func @transform_0(%arg0: i32, %arg1: i32, %arg2: i32) -> (i32, i32, i32) {
    %c0_i32 = arith.constant 0 : i32
    %c0_i32_0 = arith.constant 0 : i32
    return %arg0, %c0_i32, %arg2 : i32, i32, i32
  }
  func.func @transform_1(%arg0: i32, %arg1: i32, %arg2: i32) -> (i32, i32, i32) {
    %c0_i32 = arith.constant 0 : i32
    %c0_i32_0 = arith.constant 0 : i32
    return %arg0, %arg1, %c0_i32 : i32, i32, i32
  }
  func.func @transform_2(%arg0: i32, %arg1: i32, %arg2: i32) -> (i32, i32, i32) {
    %c0_i32 = arith.constant 0 : i32
    %c0_i32_0 = arith.constant 0 : i32
    return %arg0, %arg2, %c0_i32 : i32, i32, i32
  }
  func.func @transform_3(%arg0: i32, %arg1: i32, %arg2: i32) -> (i32, i32, i32) {
    %c0_i32 = arith.constant 0 : i32
    %c0_i32_0 = arith.constant 0 : i32
    return %arg0, %arg1, %c0_i32 : i32, i32, i32
  }
}

module attributes {stable_mosaic.version = 11 : i64} {
  func.func @_linear_kernel(%arg0: i32, %arg1: i32, %arg2: i32, %arg3: memref<16x256xf32, #tpu.memory_space<vmem>>, %arg4: memref<256x128xf32, #tpu.memory_space<vmem>>, %arg5: memref<1x128xf32, #tpu.memory_space<vmem>>, %arg6: memref<16x128xf32, #tpu.memory_space<vmem>>, %arg7: memref<16x128xf32, #tpu.memory_space<vmem>>, %arg8: memref<16x128xf32, #tpu.memory_space<vmem>>) attributes {dimension_semantics = [#tpu.dimension_semantics<parallel>, #tpu.dimension_semantics<parallel>, #tpu.dimension_semantics<arbitrary>], iteration_bounds = array<i64: 1, 1, 1>, scalar_prefetch = 0 : i64, scratch_operands = 1 : i64, tpu.core_type = #tpu.core_type<tc>, window_params = [{transform_indices = @transform_0, window_bounds = array<i64: 16, 256>}, {transform_indices = @transform_1, window_bounds = array<i64: 256, 128>}, {transform_indices = @transform_2, window_bounds = array<i64: 1, 128>}, {transform_indices = @transform_3, window_bounds = array<i64: 16, 128>}, {transform_indices = @transform_4, window_bounds = array<i64: 16, 128>}]} {
    %c0_i32 = arith.constant 0 : i32
    %0 = arith.cmpi eq, %arg2, %c0_i32 : i32
    %1 = arith.extui %0 : i1 to i32
    %c0_i32_0 = arith.constant 0 : i32
    %2 = arith.cmpi ne, %1, %c0_i32_0 : i32
    scf.if %2 {
      %cst_10 = arith.constant 0.000000e+00 : f32
      %12 = vector.broadcast %cst_10 : f32 to vector<16x128xf32>
      %c0_11 = arith.constant 0 : index
      %c0_12 = arith.constant 0 : index
      %13 = vector.load %arg8[%c0_11, %c0_12] : memref<16x128xf32, #tpu.memory_space<vmem>>, vector<16x128xf32>
      tpu.vector_store %arg8[%c0_11, %c0_12], %12 {strides = array<i32>} : memref<16x128xf32, #tpu.memory_space<vmem>>, vector<16x128xf32>,
    } else {
    }
    %c0 = arith.constant 0 : index
    %c0_1 = arith.constant 0 : index
    %3 = vector.load %arg3[%c0, %c0_1] : memref<16x256xf32, #tpu.memory_space<vmem>>, vector<16x256xf32>
    %c0_2 = arith.constant 0 : index
    %c0_3 = arith.constant 0 : index
    %4 = vector.load %arg8[%c0_2, %c0_3] : memref<16x128xf32, #tpu.memory_space<vmem>>, vector<16x128xf32>
    %c0_4 = arith.constant 0 : index
    %c0_5 = arith.constant 0 : index
    %5 = vector.load %arg4[%c0_4, %c0_5] : memref<256x128xf32, #tpu.memory_space<vmem>>, vector<256x128xf32>
    %cst = arith.constant dense<0.000000e+00> : vector<16x128xf32>
    %6 = tpu.matmul %3, %5, %cst {dimension_numbers = #tpu.dot_dimension_numbers<[1], [0], [0], [1], [0, 0, 1, 1], [], []>} : vector<16x256xf32>, vector<256x128xf32>, vector<16x128xf32> -> vector<16x128xf32>
    %7 = arith.addf %4, %6 : vector<16x128xf32>
    %c0_6 = arith.constant 0 : index
    %c0_7 = arith.constant 0 : index
    %8 = vector.load %arg8[%c0_6, %c0_7] : memref<16x128xf32, #tpu.memory_space<vmem>>, vector<16x128xf32>
    tpu.vector_store %arg8[%c0_6, %c0_7], %7 {strides = array<i32>} : memref<16x128xf32, #tpu.memory_space<vmem>>, vector<16x128xf32>,
    %c0_i32_8 = arith.constant 0 : i32
    %9 = arith.cmpi eq, %arg2, %c0_i32_8 : i32
    %10 = arith.extui %9 : i1 to i32
    %c0_i32_9 = arith.constant 0 : i32
    %11 = arith.cmpi ne, %10, %c0_i32_9 : i32
    scf.if %11 {
      %c0_10 = arith.constant 0 : index
      %c0_11 = arith.constant 0 : index
      %12 = vector.load %arg8[%c0_10, %c0_11] : memref<16x128xf32, #tpu.memory_space<vmem>>, vector<16x128xf32>
      %c0_12 = arith.constant 0 : index
      %c0_13 = arith.constant 0 : index
      %13 = vector.load %arg5[%c0_12, %c0_13] : memref<1x128xf32, #tpu.memory_space<vmem>>, vector<1x128xf32>
      %14 = vector.broadcast %13 : vector<1x128xf32> to vector<16x128xf32>
      %15 = arith.addf %12, %14 : vector<16x128xf32>
      %c0_14 = arith.constant 0 : index
      %c0_15 = arith.constant 0 : index
      %16 = vector.load %arg6[%c0_14, %c0_15] : memref<16x128xf32, #tpu.memory_space<vmem>>, vector<16x128xf32>
      %17 = arith.addf %15, %16 : vector<16x128xf32>
      %c0_16 = arith.constant 0 : index
      %c0_17 = arith.constant 0 : index
      %18 = vector.load %arg7[%c0_16, %c0_17] : memref<16x128xf32, #tpu.memory_space<vmem>>, vector<16x128xf32>
      tpu.vector_store %arg7[%c0_16, %c0_17], %17 {strides = array<i32>} : memref<16x128xf32, #tpu.memory_space<vmem>>, vector<16x128xf32>,
    } else {
    }
    return
  }
  func.func @transform_0(%arg0: i32, %arg1: i32, %arg2: i32) -> (i32, i32) {
    %c0_i32 = arith.constant 0 : i32
    return %arg0, %arg2 : i32, i32
  }
  func.func @transform_1(%arg0: i32, %arg1: i32, %arg2: i32) -> (i32, i32) {
    %c0_i32 = arith.constant 0 : i32
    return %arg2, %arg1 : i32, i32
  }
  func.func @transform_2(%arg0: i32, %arg1: i32, %arg2: i32) -> (i32, i32) {
    %c0_i32 = arith.constant 0 : i32
    %c0_i32_0 = arith.constant 0 : i32
    return %c0_i32, %arg1 : i32, i32
  }
  func.func @transform_3(%arg0: i32, %arg1: i32, %arg2: i32) -> (i32, i32) {
    %c0_i32 = arith.constant 0 : i32
    return %arg0, %arg1 : i32, i32
  }
  func.func @transform_4(%arg0: i32, %arg1: i32, %arg2: i32) -> (i32, i32) {
    %c0_i32 = arith.constant 0 : i32
    return %arg0, %arg1 : i32, i32
  }
}

</mosaic_0001>

<bundles_post_ra>
// kernel: decoder_layer.11
= control target key start
LH: loop header
LB: loop body
LE: loop exit
PB: predicated region body
PF: predicated region fallthrough
CT: control target
= control target key end

     0   :  { %s294_s1 = inlined_call_operand.vmem [shape: f32[128,128], index: 1, kind: input, shape index: {}]   ;;  %s295_s0 = inlined_call_operand.vmem [shape: f32[16,128], index: 0, kind: input, shape index: {}]   ;;  %s296_s2 = inlined_call_operand.vmem [shape: f32[1,128], index: 2, kind: input, shape index: {}]   ;;  %s297_s3 = inlined_call_operand.vmem [shape: f32[16,128], index: 3, kind: input, shape index: {}]   ;;  %s298_s4 = inlined_call_operand.vmem [shape: f32[16,128], index: 4, kind: output, shape index: {}]  }
   0x1   :  { %v42_v0 = vld [vmem:[%s294_s1 + $0x78] sm:$0xff]  ;;  %v41_v1 = vld [vmem:[%s294_s1 + $0x70] sm:$0xff]  ;;  %v40_v2 = vld [vmem:[%s294_s1 + $0x68] sm:$0xff] }
   0x2   :  { %165 = vmatprep.subr.mxu0 %v42_v0  ;;  %v39_v3 = vld [vmem:[%s294_s1 + $0x60] sm:$0xff]  ;;  %v38_v5 = vld [vmem:[%s294_s1 + $0x58] sm:$0xff]  ;;  %v37_v6 = vld [vmem:[%s294_s1 + $0x50] sm:$0xff] }
   0x3   :  { %166 = vmatpush3.msra.mxu0 %v42_v0  ;;  %v23_v4 = vld [vmem:[%s295_s0] sm:$0xff]  ;;  %v36_v7 = vld [vmem:[%s294_s1 + $0x48] sm:$0xff]  ;;  %v34_v9 = vld [vmem:[%s294_s1 + $0x38] sm:$0xff] }
   0x4   :  { %167 = vmatprep.subr.mxu0 %v41_v1  ;;  %197 = vmatprep.mubr.f32.mxu0 %v23_v4  ;;  %v35_v8 = vld [vmem:[%s294_s1 + $0x40] sm:$0xff]  ;;  %v33_v10 = vld [vmem:[%s294_s1 + $0x30] sm:$0xff]  ;;  %v32_v11 = vld [vmem:[%s294_s1 + $0x28] sm:$0xff] }
   0x5   :  { %168 = vmatpush3.msra.mxu0 %v41_v1  ;;  %v31_v12 = vld [vmem:[%s294_s1 + $0x20] sm:$0xff]  ;;  %v30_v13 = vld [vmem:[%s294_s1 + $0x18] sm:$0xff]  ;;  %v29_v14 = vld [vmem:[%s294_s1 + $0x10] sm:$0xff] }
   0x6   :  { %169 = vmatprep.subr.mxu0 %v40_v2  ;;  %v28_v15 = vld [vmem:[%s294_s1 + $0x8] sm:$0xff]  ;;  %v27_v16 = vld [vmem:[%s294_s1] sm:$0xff] }
   0x7   :  { %170 = vmatpush3.msra.mxu0 %v40_v2  ;;  %v24_v17 = vld [vmem:[%s295_s0 + $0x8] sm:$0xff]  ;;  %v146_v18 = vld [vmem:[%s296_s2] ss:$0 sm:$0xff] }
   0x8   :  { %171 = vmatprep.subr.mxu0 %v39_v3  ;;  %v137_v20 = vld [vmem:[%s297_s3 + $0x8] sm:$0xff]  ;;  %v136_v23 = vld [vmem:[%s297_s3] sm:$0xff] }
   0x9   :  { %172 = vmatpush3.msra.mxu0 %v39_v3 }
   0xa   :  { %173 = vmatprep.subr.mxu0 %v38_v5 }
   0xb   :  { %174 = vmatpush3.msra.mxu0 %v38_v5 }
   0xc   :  { %175 = vmatprep.subr.mxu0 %v37_v6 }
   0xd   :  { %176 = vmatpush3.msra.mxu0 %v37_v6 }
   0xe   :  { %177 = vmatprep.subr.mxu0 %v36_v7 }
   0xf   :  { %178 = vmatpush3.msra.mxu0 %v36_v7 }
  0x10   :  { %179 = vmatprep.subr.mxu0 %v35_v8 }
  0x11   :  { %180 = vmatpush3.msra.mxu0 %v35_v8 }
  0x12   :  { %181 = vmatprep.subr.mxu0 %v34_v9 }
  0x13   :  { %182 = vmatpush3.msra.mxu0 %v34_v9 }
  0x14   :  { %183 = vmatprep.subr.mxu0 %v33_v10 }
  0x15   :  { %184 = vmatpush3.msra.mxu0 %v33_v10 }
  0x16   :  { %185 = vmatprep.subr.mxu0 %v32_v11 }
  0x17   :  { %186 = vmatpush3.msra.mxu0 %v32_v11 }
  0x18   :  { %187 = vmatprep.subr.mxu0 %v31_v12 }
  0x19   :  { %188 = vmatpush3.msra.mxu0 %v31_v12 }
  0x1a   :  { %189 = vmatprep.subr.mxu0 %v30_v13 }
  0x1b   :  { %190 = vmatpush3.msra.mxu0 %v30_v13 }
  0x1c   :  { %191 = vmatprep.subr.mxu0 %v29_v14 }
  0x1d   :  { %192 = vmatpush3.msra.mxu0 %v29_v14 }
  0x1e   :  { %193 = vmatprep.subr.mxu0 %v28_v15 }
  0x1f   :  { %194 = vmatpush3.msra.mxu0 %v28_v15 }
  0x20   :  { %195 = vmatprep.subr.mxu0 %v27_v16 }
  0x21   :  { %196 = vmatpush3.msra.mxu0 %v27_v16 }
  0x22   :  { %198 = vmatmul.mubr.f32.vlgmr.msra.gmra.mxu0 %v24_v17 }
  0xe2   :  { %v199_v19 = vpop.f32.mrf.mxu0 }
  0xe3   :  { %v135_v21 = vadd.f32 %v199_v19, %v146_v18 }
  0xe4   :  { %v109_v22 = vpop.f32.mrf.mxu0 }
  0xe5   :  { %v139_v24 = vadd.f32 %v137_v20, %v135_v21  ;;  %v134_v25 = vadd.f32 %v146_v18, %v109_v22 }
  0xe7   :  { %141 = vst [vmem:[%s298_s4 + $0x8] sm:$0xff] %v139_v24  ;;  %v138_v26 = vadd.f32 %v136_v23, %v134_v25 }
  0xe9   :  { %140 = vst [vmem:[%s298_s4] sm:$0xff] %v138_v26 }

// kernel: decoder_layer.12
= control target key start
LH: loop header
LB: loop body
LE: loop exit
PB: predicated region body
PF: predicated region fallthrough
CT: control target
= control target key end

     0   :  { %s345_s0 = inlined_call_operand.vmem [shape: f32[16,128], index: 0, kind: input, shape index: {}]   ;;  %s346_s1 = inlined_call_operand.vmem [shape: f32[128,128], index: 1, kind: input, shape index: {}]   ;;  %s347_s3 = inlined_call_operand.vmem [shape: f32[1,128], index: 3, kind: input, shape index: {}]   ;;  %s348_s4 = inlined_call_operand.vmem [shape: f32[1,128], index: 4, kind: input, shape index: {}]   ;;  %s349_s2 = inlined_call_operand.vmem [shape: f32[1,128], index: 2, kind: input, shape index: {}]   ;;  %s350_s5 = inlined_call_operand.vmem [shape: f32[16,128], index: 5, kind: output, shape index: {}]  }
   0x1   :  { %v26_v0 = vld [vmem:[%s345_s0] sm:$0xff]  ;;  %v27_v1 = vld [vmem:[%s345_s0 + $0x8] sm:$0xff]  ;;  %v86_v2 = vld [vmem:[%s346_s1 + $0x78] sm:$0xff] }
   0x2   :  { %28 = vadd.xlane.f32.xlu0 %v26_v0  ;;  %v85_v3 = vld [vmem:[%s346_s1 + $0x70] sm:$0xff]  ;;  %207 = vmatprep.subr.mxu0 %v86_v2  ;;  %v84_v12 = vld [vmem:[%s346_s1 + $0x68] sm:$0xff]  ;;  %v83_v13 = vld [vmem:[%s346_s1 + $0x60] sm:$0xff] }
   0x3   :  { %208 = vmatpush3.msra.mxu0 %v86_v2  ;;  %v82_v14 = vld [vmem:[%s346_s1 + $0x58] sm:$0xff]  ;;  %v81_v15 = vld [vmem:[%s346_s1 + $0x50] sm:$0xff]  ;;  %v80_v16 = vld [vmem:[%s346_s1 + $0x48] sm:$0xff] }
   0x4   :  { %209 = vmatprep.subr.mxu0 %v85_v3  ;;  %v79_v17 = vld [vmem:[%s346_s1 + $0x40] sm:$0xff]  ;;  %v78_v18 = vld [vmem:[%s346_s1 + $0x38] sm:$0xff]  ;;  %v77_v19 = vld [vmem:[%s346_s1 + $0x30] sm:$0xff] }
   0x5   :  { %210 = vmatpush3.msra.mxu0 %v85_v3  ;;  %v76_v20 = vld [vmem:[%s346_s1 + $0x28] sm:$0xff]  ;;  %v75_v21 = vld [vmem:[%s346_s1 + $0x20] sm:$0xff]  ;;  %v74_v22 = vld [vmem:[%s346_s1 + $0x18] sm:$0xff] }
   0x6   :  { %30 = vadd.xlane.f32.xlu0 %v27_v1  ;;  %211 = vmatprep.subr.mxu0 %v84_v12  ;;  %v73_v23 = vld [vmem:[%s346_s1 + $0x10] sm:$0xff]  ;;  %v72_v24 = vld [vmem:[%s346_s1 + $0x8] sm:$0xff]  ;;  %v71_v25 = vld [vmem:[%s346_s1] sm:$0xff] }
   0x7   :  { %212 = vmatpush3.msra.mxu0 %v84_v12  ;;  %v186_v33 = vld [vmem:[%s347_s3] ss:$0 sm:$0xff] }
   0x8   :  { %213 = vmatprep.subr.mxu0 %v83_v13  ;;  %v187_v35 = vld [vmem:[%s348_s4] ss:$0 sm:$0xff] }
   0x9   :  { %214 = vmatpush3.msra.mxu0 %v83_v13  ;;  %v188_v42 = vld [vmem:[%s349_s2] ss:$0 sm:$0xff] }
   0xa   :  { %215 = vmatprep.subr.mxu0 %v82_v14 }
   0xb   :  { %216 = vmatpush3.msra.mxu0 %v82_v14 }
   0xc   :  { %217 = vmatprep.subr.mxu0 %v81_v15 }
   0xd   :  { %218 = vmatpush3.msra.mxu0 %v81_v15 }
   0xe   :  { %219 = vmatprep.subr.mxu0 %v80_v16 }
   0xf   :  { %220 = vmatpush3.msra.mxu0 %v80_v16 }
  0x10   :  { %221 = vmatprep.subr.mxu0 %v79_v17 }
  0x11   :  { %222 = vmatpush3.msra.mxu0 %v79_v17 }
  0x12   :  { %223 = vmatprep.subr.mxu0 %v78_v18 }
  0x13   :  { %224 = vmatpush3.msra.mxu0 %v78_v18 }
  0x14   :  { %225 = vmatprep.subr.mxu0 %v77_v19 }
  0x15   :  { %226 = vmatpush3.msra.mxu0 %v77_v19 }
  0x16   :  { %227 = vmatprep.subr.mxu0 %v76_v20 }
  0x17   :  { %228 = vmatpush3.msra.mxu0 %v76_v20 }
  0x18   :  { %229 = vmatprep.subr.mxu0 %v75_v21 }
  0x19   :  { %230 = vmatpush3.msra.mxu0 %v75_v21 }
  0x1a   :  { %231 = vmatprep.subr.mxu0 %v74_v22 }
  0x1b   :  { %232 = vmatpush3.msra.mxu0 %v74_v22 }
  0x1c   :  { %233 = vmatprep.subr.mxu0 %v73_v23 }
  0x1d   :  { %234 = vmatpush3.msra.mxu0 %v73_v23 }
  0x1e   :  { %235 = vmatprep.subr.mxu0 %v72_v24 }
  0x1f   :  { %236 = vmatpush3.msra.mxu0 %v72_v24 }
  0x20   :  { %237 = vmatprep.subr.mxu0 %v71_v25 }
  0x21   :  { %238 = vmatpush3.msra.mxu0 %v71_v25 }
  0x8b   :  { %v29_v4 = vpop.xlane.xlu0 %28 }
  0x8c   :  { %v33_v5 = vmul.f32 0.0078125, %v29_v4 }
  0x8e   :  { %v35_v6 = vsub.f32 %v26_v0, %v33_v5 }
  0x8f   :  { %v31_v7 = vpop.xlane.xlu0 %30 }
  0x90   :  { %v34_v8 = vmul.f32 0.0078125, %v31_v7  ;;  %v37_v9 = vmul.f32 %v35_v6, %v35_v6 }
  0x92   :  { %v36_v10 = vsub.f32 %v27_v1, %v34_v8  ;;  %39 = vadd.xlane.f32.xlu1 %v37_v9 }
  0x94   :  { %v38_v11 = vmul.f32 %v36_v10, %v36_v10 }
  0x96   :  { %41 = vadd.xlane.f32.xlu1 %v38_v11 }
 0x11b   :  { %v40_v26 = vpop.xlane.xlu1 %39 }
 0x11c   :  { %v43_v27 = vmul.f32 0.0078125, %v40_v26 }
 0x11e   :  { %v45_v28 = vadd.f32 1e-05, %v43_v27 }
 0x11f   :  { %v42_v29 = vpop.xlane.xlu1 %41 }
 0x120   :  { %242 = vrsqrt.f32 %v45_v28  ;;  %v44_v30 = vmul.f32 0.0078125, %v42_v29 }
 0x122   :  { %v46_v31 = vadd.f32 1e-05, %v44_v30 }
 0x124   :  { %244 = vrsqrt.f32 %v46_v31 }
 0x12d   :  { %v243_v32 = vpop.eup %242 }
 0x12e   :  { %v49_v34 = vmul.f32 %v243_v32, %v35_v6 }
 0x130   :  { %v58_v36 = vmul.f32 %v186_v33, %v49_v34 }
 0x131   :  { %v245_v37 = vpop.eup %244 }
 0x132   :  { %v50_v38 = vmul.f32 %v245_v37, %v36_v10  ;;  %v67_v39 = vadd.f32 %v187_v35, %v58_v36 }
 0x134   :  { %v59_v40 = vmul.f32 %v186_v33, %v50_v38  ;;  %239 = vmatprep.mubr.f32.mxu0 %v67_v39 }
 0x136   :  { %v68_v41 = vadd.f32 %v187_v35, %v59_v40 }
 0x138   :  { %240 = vmatmul.mubr.f32.vlgmr.msra.gmra.mxu0 %v68_v41 }
 0x1f8   :  { %v241_v43 = vpop.f32.mrf.mxu0 }
 0x1f9   :  { %v179_v44 = vadd.f32 %v241_v43, %v188_v42 }
 0x1fa   :  { %v153_v45 = vpop.f32.mrf.mxu0 }
 0x1fb   :  { %181 = vst [vmem:[%s350_s5 + $0x8] sm:$0xff] %v179_v44  ;;  %v178_v46 = vadd.f32 %v188_v42, %v153_v45 }
 0x1fd   :  { %180 = vst [vmem:[%s350_s5] sm:$0xff] %v178_v46 }

// kernel: decoder_layer.9
= control target key start
LH: loop header
LB: loop body
LE: loop exit
PB: predicated region body
PF: predicated region fallthrough
CT: control target
= control target key end

     0   :  { %10 = vsyncpa [#allocation4], 0  ;;  %s1017_s0 = inlined_call_operand.vmem [shape: f32[16,128], index: 0, kind: input, shape index: {}]   ;;  %s1018_s1 = inlined_call_operand.hbm [shape: f32[128,384], index: 1, kind: input, shape index: {}]   ;;  %s1019_s2 = inlined_call_operand.vmem [shape: f32[1,384], index: 2, kind: input, shape index: {}]   ;;  %s1020_s3 = inlined_call_operand.vmem [shape: f32[1,128], index: 3, kind: input, shape index: {}]   ;;  %s1021_s4 = inlined_call_operand.vmem [shape: f32[1,128], index: 4, kind: input, shape index: {}]   ;;  %s1022_s5 = inlined_call_operand.vmem [shape: f32[16,384], index: 5, kind: output, shape index: {}]  }
   0x1   :  { %12 = vsyncpa [#allocation4 + $0x1], 0  ;;  %s874_s18 = smov 0   ;;  %s876_s19 = smov 0  }
   0x2   :  { %s878_s20 = smov 0   ;;  %s880_s21 = smov 0  }
   0x3   :  { %s882_s22 = smov 0   ;;  %s884_s23 = smov 0  }
   0x4 LB: > { %s628_s24 = sadd.s32 4294967295, %s838_s23   ;;  %s33_s25 = sadd.s32 1, %s834_s22  ;;  %s838_s23 = sphi %s884_s23, %s18_s23   ;;  %s834_s22 = sphi %s882_s22, %s1031_s22   ;;  %s830_s21 = sphi %s880_s21, %s1030_s21   ;;  %s826_s20 = sphi %s878_s20, %s1029_s20   ;;  %s822_s19 = sphi %s876_s19, %s1028_s19   ;;  %s818_s18 = sphi %s874_s18, %s1027_s18  }
   0x5   : > { %p35_p0 = scmp.ge.s32.totalorder %s33_s25, 3  ;;  %s74_s26 = sadd.s32 1, %s826_s20 }
   0x6   : > { %p81_p1 = scmp.ne.s32.totalorder %s826_s20, %s822_s19  ;;  %p82_p2 = scmp.eq.s32.totalorder %s838_s23, 0 }
   0x7   : > { %s1033_s25 = smov (%p35_p0, %s33_s25), 0  ;;  %p87_p4 = scmp.ne.s32.totalorder %s822_s19, %s818_s18 }
   0x8   : > { %p910_p3 = por %p82_p2, %p81_p1  ;;  %s70_s28 = ssub.s32 %s834_s22, %s1033_s25 }
   0x9   : > { %p88_p5 = scmp.eq.s32.totalorder %s628_s24, 0  ;;  %p72_p6 = scmp.eq.s32.totalorder %s70_s28, 0 }
   0xa   : > { %p181_p7 = scmp.eq.s32.totalorder %s628_s24, 2  ;;  %p704_p10 = scmp.lt.s32.totalorder %s838_s23, 3 }
   0xb   : > { %p917_p8 = por %p88_p5, %p87_p4  ;;  %s225_s7 = sand.u32 1, %s826_s20  }
   0xc   : > { %s922_s30 = scalar_select %p72_p6, %s826_s20, %s74_s26  }
   0xd   : > { %p924_p9 = por %p181_p7, %p81_p1  ;;  %s634_s8 = sshll.u32 %s834_s22, 7 }
   0xe   : > { %s633_s9 = sshll.u32 %s225_s7, 7  ;;  %s237_s12 = scalar_lea.hbm %s1018_s1, %s634_s8 }
   0xf   : > { %s229_s13 = scalar_lea.vmem [#allocation3], %s633_s9  ;;  %p936_p11 = pnand %p704_p10, %p910_p3 }
  0x10   : > { %s238_s14 = sshll.u32 %s229_s13, 4  ;;  %p635_p12 = scmp.ge.s32.totalorder %s838_s23, 1  ;;  %s239_s14 = int_to_ptr.vmem [resolvable:$true] %s238_s14 }
  0x11   : > { %s226_s16 = scalar_lea.sflag [#allocation4], %s225_s7  ;;  %p762_p13 = pneg %p936_p11 }
  0x12   : > { %s773_s17 = scalar_lea.vmem %s239_s14, 2048  ;;  %s840_s18 = smov [#allocation3]  }
  0x13   : > { %p774_p0 = scmp.ne.s32.totalorder %s239_s14, %s773_s17  ;;  %s778_s24 = sshll.u32 %s840_s18, 4  ;;  %s779_s24 = int_to_ptr.vmem [resolvable:$false] %s778_s24 }
  0x14   : > { %s780_s26 = scalar_lea.vmem %s779_s24, 4096  ;;  %p781_p4 = scmp.lt.s32.totalorder %s239_s14, %s779_s24 }
  0x15   : > { %p776_p1 = pnand %p774_p0, %p762_p13  ;;  %p782_p5 = scmp.lt.s32.totalorder %s780_s26, %s773_s17 }
  0x17   : > { %p777_p2 = pneg %p776_p1  ;;  %p783_p3 = por %p782_p5, %p781_p4 }
  0x19   : > { %p784_p6 = pnand %p783_p3, %p777_p2 }
  0x1b   : > { %787 = shalt.err (!%p784_p6)
}
  0x1c   : > { %s841_s27 = smov 384   ;;  %s842_s28 = smov 128  }
  0x1d   : > { %s843_s7 = smov 8   ;;  %p252_p7 = scmp.lt.s32.totalorder %s838_s23, 4 }
  0x1e   : > { %703 = dma.hbm_to_vmem [thread:$0]  (!%p936_p11), %s237_s12, 2048, %s239_s14, %s226_s16, %s841_s27, %s842_s28, %s843_s7  }
  0x1f   : > { %p253_p10 = pnand %p635_p12, %p252_p7 }
  0x20   : > { %s949_s8 = sand.u32 (!%p253_p10), 1, %s822_s19  }
  0x21   : > { %256 = sbr.rel (%p253_p10) target bundleno = 556 (0x22c), region = 40  ;;  %s636_s9 = sshll.u32 (!%p253_p10), %s949_s8, 7 }
  0x22   : > { %s259_s10 = scalar_lea.sflag (!%p253_p10), [#allocation4], %s949_s8  ;;  %s953_s11 = scalar_lea.vmem (!%p253_p10), [#allocation3], %s636_s9 }
  0x26   : > { %813 = dma.done.wait (%p917_p8), %s259_s10, 2048  }
  0x27   : > { %815 = vsyncadd (%p917_p8), %s259_s10, 4294965248  ;;  %v319_v0 = vld [vmem:[%s1017_s0] sm:$0xff]  ;;  %v320_v1 = vld [vmem:[%s1017_s0 + $0x8] sm:$0xff]  ;;  %p309_p8 = scmp.lt.s32.totalorder %s830_s21, 2  ;;  %s637_s7 = sshll.u32 %s949_s8, 4 }
  0x28   : > { %321 = vadd.xlane.f32.xlu0 %v319_v0  ;;  %v379_v2 = vld [vmem:[%s953_s11 + $0x78] sm:$0xff]  ;;  %v378_v3 = vld [vmem:[%s953_s11 + $0x70] sm:$0xff]  ;;  %v377_v12 = vld [vmem:[%s953_s11 + $0x68] sm:$0xff]  ;;  %s298_s9 = scalar_lea.vmem [#allocation5], %s637_s7  ;;  %s642_s10 = sshll.u32 (%p924_p9), %s830_s21, 3 }
  0x29   : > { %663 = vmatprep.subr.mxu0 %v379_v2  ;;  %v376_v13 = vld [vmem:[%s953_s11 + $0x60] sm:$0xff]  ;;  %v375_v14 = vld [vmem:[%s953_s11 + $0x58] sm:$0xff]  ;;  %v374_v15 = vld [vmem:[%s953_s11 + $0x50] sm:$0xff]  ;;  %s310_s24 = scalar_select %p309_p8, %s830_s21, 2 }
  0x2a   : > { %664 = vmatpush3.msra.mxu0 %v379_v2  ;;  %v373_v16 = vld [vmem:[%s953_s11 + $0x48] sm:$0xff]  ;;  %v372_v17 = vld [vmem:[%s953_s11 + $0x40] sm:$0xff]  ;;  %v371_v18 = vld [vmem:[%s953_s11 + $0x38] sm:$0xff]  ;;  %s486_s13 = scalar_lea.vmem (%p924_p9), %s1022_s5, %s642_s10 }
  0x2b   : > { %665 = vmatprep.subr.mxu0 %v378_v3  ;;  %v370_v19 = vld [vmem:[%s953_s11 + $0x30] sm:$0xff]  ;;  %v369_v20 = vld [vmem:[%s953_s11 + $0x28] sm:$0xff]  ;;  %v368_v21 = vld [vmem:[%s953_s11 + $0x20] sm:$0xff]  ;;  %s311_s28 = scalar_lea.vmem %s1019_s2, %s310_s24 }
  0x2c   : > { %323 = vadd.xlane.f32.xlu0 %v320_v1  ;;  %666 = vmatpush3.msra.mxu0 %v378_v3  ;;  %v367_v22 = vld [vmem:[%s953_s11 + $0x18] sm:$0xff]  ;;  %v366_v23 = vld [vmem:[%s953_s11 + $0x10] sm:$0xff]  ;;  %v365_v24 = vld [vmem:[%s953_s11 + $0x8] sm:$0xff] }
  0x2d   : > { %667 = vmatprep.subr.mxu0 %v377_v12  ;;  %v364_v25 = vld [vmem:[%s953_s11] sm:$0xff] }
  0x2e   : > { %668 = vmatpush3.msra.mxu0 %v377_v12  ;;  %v638_v33 = vld [vmem:[%s1020_s3] ss:$0 sm:$0xff] }
  0x2f   : > { %669 = vmatprep.subr.mxu0 %v376_v13  ;;  %v639_v35 = vld [vmem:[%s1021_s4] ss:$0 sm:$0xff] }
  0x30   : > { %670 = vmatpush3.msra.mxu0 %v376_v13  ;;  %v640_v42 = vld [vmem:[%s311_s28] ss:$0 sm:$0xff] }
  0x31   : > { %671 = vmatprep.subr.mxu0 %v375_v14 }
  0x32   : > { %672 = vmatpush3.msra.mxu0 %v375_v14 }
  0x33   : > { %673 = vmatprep.subr.mxu0 %v374_v15 }
  0x34   : > { %674 = vmatpush3.msra.mxu0 %v374_v15 }
  0x35   : > { %675 = vmatprep.subr.mxu0 %v373_v16 }
  0x36   : > { %676 = vmatpush3.msra.mxu0 %v373_v16 }
  0x37   : > { %677 = vmatprep.subr.mxu0 %v372_v17 }
  0x38   : > { %678 = vmatpush3.msra.mxu0 %v372_v17 }
  0x39   : > { %679 = vmatprep.subr.mxu0 %v371_v18 }
  0x3a   : > { %680 = vmatpush3.msra.mxu0 %v371_v18 }
  0x3b   : > { %681 = vmatprep.subr.mxu0 %v370_v19 }
  0x3c   : > { %682 = vmatpush3.msra.mxu0 %v370_v19 }
  0x3d   : > { %683 = vmatprep.subr.mxu0 %v369_v20 }
  0x3e   : > { %684 = vmatpush3.msra.mxu0 %v369_v20 }
  0x3f   : > { %685 = vmatprep.subr.mxu0 %v368_v21 }
  0x40   : > { %686 = vmatpush3.msra.mxu0 %v368_v21 }
  0x41   : > { %687 = vmatprep.subr.mxu0 %v367_v22 }
  0x42   : > { %688 = vmatpush3.msra.mxu0 %v367_v22 }
  0x43   : > { %689 = vmatprep.subr.mxu0 %v366_v23 }
  0x44   : > { %690 = vmatpush3.msra.mxu0 %v366_v23 }
  0x45   : > { %691 = vmatprep.subr.mxu0 %v365_v24 }
  0x46   : > { %692 = vmatpush3.msra.mxu0 %v365_v24 }
  0x47   : > { %693 = vmatprep.subr.mxu0 %v364_v25 }
  0x48   : > { %694 = vmatpush3.msra.mxu0 %v364_v25 }
  0xb1   : > { %v322_v4 = vpop.xlane.xlu0 %321 }
  0xb2   : > { %v326_v5 = vmul.f32 0.0078125, %v322_v4 }
  0xb4   : > { %v328_v6 = vsub.f32 %v319_v0, %v326_v5 }
  0xb5   : > { %v324_v7 = vpop.xlane.xlu0 %323 }
  0xb6   : > { %v327_v8 = vmul.f32 0.0078125, %v324_v7  ;;  %v330_v9 = vmul.f32 %v328_v6, %v328_v6 }
  0xb8   : > { %v329_v10 = vsub.f32 %v320_v1, %v327_v8  ;;  %332 = vadd.xlane.f32.xlu1 %v330_v9 }
  0xba   : > { %v331_v11 = vmul.f32 %v329_v10, %v329_v10 }
  0xbc   : > { %334 = vadd.xlane.f32.xlu1 %v331_v11 }
 0x141   : > { %v333_v26 = vpop.xlane.xlu1 %332 }
 0x142   : > { %v336_v27 = vmul.f32 0.0078125, %v333_v26 }
 0x144   : > { %v338_v28 = vadd.f32 1e-05, %v336_v27 }
 0x145   : > { %v335_v29 = vpop.xlane.xlu1 %334 }
 0x146   : > { %756 = vrsqrt.f32 %v338_v28  ;;  %v337_v30 = vmul.f32 0.0078125, %v335_v29 }
 0x148   : > { %v339_v31 = vadd.f32 1e-05, %v337_v30 }
 0x14a   : > { %758 = vrsqrt.f32 %v339_v31 }
 0x153   : > { %v757_v32 = vpop.eup %756 }
 0x154   : > { %v342_v34 = vmul.f32 %v757_v32, %v328_v6 }
 0x156   : > { %v351_v36 = vmul.f32 %v638_v33, %v342_v34 }
 0x157   : > { %v759_v37 = vpop.eup %758 }
 0x158   : > { %v343_v38 = vmul.f32 %v759_v37, %v329_v10  ;;  %v360_v39 = vadd.f32 %v639_v35, %v351_v36 }
 0x15a   : > { %v352_v40 = vmul.f32 %v638_v33, %v343_v38  ;;  %695 = vmatprep.mubr.f32.mxu0 %v360_v39 }
 0x15c   : > { %v361_v41 = vadd.f32 %v639_v35, %v352_v40 }
 0x15e   : > { %696 = vmatmul.mubr.f32.vlgmr.msra.gmra.mxu0 %v361_v41 }
 0x21e   : > { %v697_v43 = vpop.f32.mrf.mxu0 }
 0x21f   : > { %v472_v44 = vadd.f32 %v697_v43, %v640_v42  ;;  %481 = sbr.rel (!%p924_p9) target bundleno = 556 (0x22c), region = 56 }
 0x220   : > { %v446_v45 = vpop.f32.mrf.mxu0 }
 0x221   : > { %474 = vst [vmem:[%s298_s9 + $0x8] sm:$0xff] %v472_v44  ;;  %v471_v46 = vadd.f32 %v640_v42, %v446_v45 }
 0x223   : > { %473 = vst [vmem:[%s298_s9] sm:$0xff] %v471_v46 }
 0x228   : > { %v519_v48 = vld [vmem:[%s298_s9 + $0x8] sm:$0xff] }
 0x229   : > { %520 = vst [vmem:[%s486_s13 + $0x18] sm:$0xff] %v519_v48 }
 0x22a   : > { %v517_v47 = vld [vmem:[%s298_s9] sm:$0xff] }
 0x22b   : > { %518 = vst [vmem:[%s486_s13] sm:$0xff] %v517_v47 }
 0x22c PF: > { %s18_s23 = sadd.s32 1, %s838_s23   ;;  %s1027_s18 = smov %s822_s19 }
 0x22d   : > { %p15_p11 = scmp.ge.s32.totalorder %s18_s23, 5   ;;  %s1028_s19 = smov %s826_s20 }
 0x22e   : > { %s1029_s20 = smov %s922_s30  ;;  %s1030_s21 = smov %s834_s22 }
 0x22f   : > { %s1031_s22 = smov %s1033_s25  ;;  %17 = sbr.rel (!%p15_p11) target bundleno = 4 (0x4), region = 132 }
 0x234   :  { %536 = vsyncpa [#allocation4], 1 }
 0x235   :  { %538 = vsyncpa [#allocation4 + $0x1], 1 }

// kernel: decoder_layer.10
= control target key start
LH: loop header
LB: loop body
LE: loop exit
PB: predicated region body
PF: predicated region fallthrough
CT: control target
= control target key end

     0   :  { %s1994_s12 = smov 0   ;;  %s1996_s13 = smov 0   ;;  %s2275_s0 = inlined_call_operand.vmem [shape: s32[2,1,8], index: 0, kind: input, shape index: {}]   ;;  %s2276_s1 = inlined_call_operand.vmem [shape: f32[2,8,384], index: 1, kind: input, shape index: {}, may-alias: {1,2}]   ;;  %s2277_s2 = inlined_call_operand.vmem [shape: f32[2,8,384], index: 2, kind: input, shape index: {}, may-alias: {1,2}]   ;;  %s2278_s3 = inlined_call_operand.vmem [shape: f32[2,8,128], index: 3, kind: output, shape index: {}]  }
   0x1   :  { %s1998_s14 = smov 0  }
   0x2 LB: > { %s32_s15 = sadd.s32 1, %s1959_s13  ;;  %p1799_p0 = scmp.ge.s32.totalorder %s1963_s14, 1  ;;  %s1963_s14 = sphi %s1998_s14, %s13_s14   ;;  %s1959_s13 = sphi %s1996_s13, %s2282_s13   ;;  %s1955_s12 = sphi %s1994_s12, %s2281_s12  }
   0x3   : > { %p34_p1 = scmp.ge.s32.totalorder %s32_s15, 2  ;;  %p193_p2 = scmp.lt.s32.totalorder %s1963_s14, 3 }
   0x5   : > { %s2284_s15 = smov (%p34_p1, %s32_s15), 0  ;;  %p194_p3 = pnand %p1799_p0, %p193_p2 }
   0x6   : > { %p238_p4 = scmp.lt.s32.totalorder (!%p194_p3), %s1955_s12, 1  ;;  %s1965_s23 = smov (!%p194_p3), 32  }
   0x7   : > { %197 = sbr.rel (%p194_p3) target bundleno = 1085 (0x43d), region = 32  ;;  %s1966_s24 = smov (!%p194_p3), 96  }
   0x8   : > { %s1967_s25 = smov (!%p194_p3), 64  }
   0xc   : > { %s2286_s12 = smov (!%p238_p4, %s1955_s12), 1  ;;  %vm282_vm0 = vcmask 261120   ;;  %v1968_v3 = vmov 0.0   ;;  %vm1969_vm1 = vmmov 0   ;;  %v1970_v4 = vmov 1983009808  }
   0xd   : > { %s1881_s16 = smul.u32 24, %s2286_s12  ;;  %1841 = vmatprep.subr.mxu0 %v1968_v3  ;;  %1846 = vmatprep.subr.mxu1 %v1968_v3  ;;  %283 = vst.msk [vmem:[#allocation4] sm:$0xff] %vm282_vm0, %v1968_v3  ;;  %284 = vst.msk [vmem:[#allocation4 + $0x8] sm:$0xff] %vm282_vm0, %v1968_v3  ;;  %v304_v5 = vunpack.c.l.s4 %v1970_v4  ;;  %v306_v6 = vlaneseq  ;;  %v1971_v7 = vmov 1934713408   ;;  %vm273_vm2 = vcmask 7168   ;;  %s243_s28 = scalar_lea.vmem %s2275_s0, %s2286_s12 }
   0xe   : > { %285 = vst.msk [vmem:[#allocation4 + $0x10] sm:$0xff] %vm282_vm0, %v1968_v3  ;;  %286 = vst.msk [vmem:[#allocation4 + $0x18] sm:$0xff] %vm282_vm0, %v1968_v3  ;;  %1843 = vmatprep.mubr.msk.f32.mxu0 %vm1969_vm1, %v1968_v3  ;;  %1848 = vmatprep.mubr.msk.f32.mxu1 %vm1969_vm1, %v1968_v3  ;;  %v336_v8 = vunpack.c.l.s4 %v1971_v7  ;;  %vm1060_vm7 = vcmask 64512   ;;  %s1802_s29 = sshll.u32 %s2286_s12, 3  ;;  %vm1674_vm8 = vcmask 523264   ;;  %vm1676_vm9 = vcmask 785408  }
   0xf   : > { %s2018_s19 = scalar_lea.vmem %s2277_s2, %s1881_s16  ;;  %s252_s22 = scalar_lea.vmem %s2276_s1, %s1881_s16  ;;  %v305_v9 = vunpack.c.0.s8 %v304_v5  ;;  %v2045_v10 = vshrl.u32 %v306_v6, 7  ;;  %278 = vst.msk [vmem:[#allocation3] sm:$0xff] %vm273_vm2, %v1968_v3  ;;  %279 = vst.msk [vmem:[#allocation3 + $0x8] sm:$0xff] %vm273_vm2, %v1968_v3 }
  0x10   : > { %v289_v0 = vld [vmem:[%s2018_s19 + $0x8] sm:$0xff]  ;;  %v287_v1 = vld [vmem:[%s252_s22] sm:$0xff]  ;;  %v337_v13 = vunpack.c.0.s8 %v336_v8  ;;  %280 = vst.msk [vmem:[#allocation3 + $0x10] sm:$0xff] %vm273_vm2, %v1968_v3  ;;  %281 = vst.msk [vmem:[#allocation3 + $0x18] sm:$0xff] %vm273_vm2, %v1968_v3  ;;  %s268_s5 = scalar_lea.vmem %s2278_s3, %s1802_s29 }
  0x11   : > { %444 = vrot.lane.b32.xlu1 %v289_v0, %s1965_s23  ;;  %v288_v2 = vmul.f32 0.088388346, %v287_v1  ;;  %438 = vrot.lane.b32.xlu0 %v289_v0, %s1966_s24  ;;  %v2048_v14 = vsub.s32 %v305_v9, %v2045_v10 }
  0x12   : > { %v2051_v21 = vsub.s32 %v337_v13, %v2045_v10 }
  0x15   : > { %441 = vrot.lane.b32.xlu0 %v289_v0, %s1967_s25  ;;  %292 = vrot.lane.b32.xlu1 %v288_v2, %s1966_s24 }
  0x19   : > { %295 = vrot.lane.b32.xlu0 %v288_v2, %s1967_s25  ;;  %298 = vrot.lane.b32.xlu1 %v288_v2, %s1965_s23 }
  0x83   : > { %v445_v11 = vpop.permute.xlu1 %444  ;;  %v439_v12 = vpop.permute.xlu0 %438 }
  0x84   : > { %v463_v15 = vcombine.low %v439_v12, %v445_v11  ;;  %v464_v16 = vcombine.high %v439_v12, %v445_v11 }
  0x86   : > { %v471_v22 = vrot.slane %v463_v15, %v2048_v14  ;;  %v478_v23 = vrot.slane %v464_v16, %v2048_v14 }
  0x87   : > { %v442_v17 = vpop.permute.xlu0 %441  ;;  %v293_v18 = vpop.permute.xlu1 %292 }
  0x88   : > { %v447_v19 = vcombine.low %v289_v0, %v442_v17  ;;  %v448_v20 = vcombine.high %v289_v0, %v442_v17 }
  0x8a   : > { %v455_v24 = vrot.slane %v447_v19, %v2048_v14  ;;  %v462_v25 = vrot.slane %v448_v20, %v2048_v14 }
  0x8b   : > { %v296_v26 = vpop.permute.xlu0 %295  ;;  %v299_v27 = vpop.permute.xlu1 %298 }
  0x8c   : > { %v479_v28 = vcombine.low %v455_v24, %v471_v22  ;;  %v480_v29 = vcombine.high %v455_v24, %v471_v22  ;;  %v495_v30 = vcombine.low %v462_v25, %v478_v23  ;;  %v496_v31 = vcombine.high %v462_v25, %v478_v23 }
  0x8d   : > { %v301_v32 = vcombine.low %v288_v2, %v296_v26  ;;  %v302_v33 = vcombine.high %v288_v2, %v296_v26  ;;  %v317_v34 = vcombine.low %v293_v18, %v299_v27  ;;  %v318_v35 = vcombine.high %v293_v18, %v299_v27 }
  0x8e   : > { %v487_v36 = vrot.slane %v479_v28, %v2051_v21  ;;  %v494_v37 = vrot.slane %v480_v29, %v2051_v21  ;;  %v503_v38 = vrot.slane %v495_v30, %v2051_v21  ;;  %v510_v39 = vrot.slane %v496_v31, %v2051_v21 }
  0x8f   : > { %v309_v40 = vrot.slane %v301_v32, %v2048_v14  ;;  %v316_v41 = vrot.slane %v302_v33, %v2048_v14  ;;  %v325_v42 = vrot.slane %v317_v34, %v2048_v14  ;;  %v332_v43 = vrot.slane %v318_v35, %v2048_v14  ;;  %v1034_v35 = vld [vmem:[%s243_s28] sm:$0x1] }
  0x90   : > { %v515_v44 = vcombine.low %v487_v36, %v494_v37  ;;  %v1805_v45 = vcombine.high %v487_v36, %v494_v37  ;;  %v531_v46 = vcombine.low %v503_v38, %v510_v39  ;;  %v1806_v47 = vcombine.high %v503_v38, %v510_v39 }
  0x91   : > { %v333_v48 = vcombine.low %v309_v40, %v325_v42  ;;  %v334_v49 = vcombine.high %v309_v40, %v325_v42  ;;  %v349_v50 = vcombine.low %v316_v41, %v332_v43  ;;  %v350_v51 = vcombine.high %v316_v41, %v332_v43 }
  0x92   : > { %v522_v52 = vrot.slane %v515_v44, %v2048_v14  ;;  %v530_v53 = vrot.slane %v1805_v45, %v2048_v14  ;;  %v538_v54 = vrot.slane %v531_v46, %v2048_v14  ;;  %v546_v55 = vrot.slane %v1806_v47, %v2048_v14 }
  0x93   : > { %v341_v56 = vrot.slane %v333_v48, %v2051_v21  ;;  %v348_v57 = vrot.slane %v334_v49, %v2051_v21  ;;  %v357_v58 = vrot.slane %v349_v50, %v2051_v21  ;;  %v364_v59 = vrot.slane %v350_v51, %v2051_v21 }
  0x94   : > { %v547_v60 = vcombine.low %v522_v52, %v530_v53  ;;  %v563_v61 = vcombine.low %v538_v54, %v546_v55  ;;  %v548_v2 = vcombine.high %v522_v52, %v530_v53  ;;  %v564_v5 = vcombine.high %v538_v54, %v546_v55 }
  0x95   : > { %v369_v62 = vcombine.low %v341_v56, %v348_v57  ;;  %v1803_v63 = vcombine.high %v341_v56, %v348_v57  ;;  %v385_v0 = vcombine.low %v357_v58, %v364_v59  ;;  %v1804_v1 = vcombine.high %v357_v58, %v364_v59 }
  0x96   : > { %v555_v4 = vrot.slane %v547_v60, %v2051_v21  ;;  %v571_v7 = vrot.slane %v563_v61, %v2051_v21  ;;  %v562_v20 = vrot.slane %v548_v2, %v2051_v21  ;;  %v578_v22 = vrot.slane %v564_v5, %v2051_v21 }
  0x97   : > { %v376_v8 = vrot.slane %v369_v62, %v2048_v14  ;;  %v384_v9 = vrot.slane %v1803_v63, %v2048_v14  ;;  %v392_v11 = vrot.slane %v385_v0, %v2048_v14  ;;  %v400_v12 = vrot.slane %v1804_v1, %v2048_v14  ;;  %v290_v1 = vld [vmem:[%s2018_s19 + $0x10] sm:$0xff] }
  0x98   : > { %v579_v13 = vcombine.low %v555_v4, %v571_v7  ;;  %v580_v15 = vcombine.high %v555_v4, %v571_v7  ;;  %v581_v29 = vcombine.low %v562_v20, %v578_v22  ;;  %v582_v30 = vcombine.high %v562_v20, %v578_v22 }
  0x99   : > { %v402_v16 = vcombine.high %v376_v8, %v384_v9  ;;  %v418_v17 = vcombine.high %v392_v11, %v400_v12  ;;  %v401_v18 = vcombine.low %v376_v8, %v384_v9  ;;  %v417_v19 = vcombine.low %v392_v11, %v400_v12 }
  0x9a   : > { %1842 = vmatpush3.xpose.msk.msra.mxu0 %vm282_vm0, %v579_v13  ;;  %1847 = vmatpush3.xpose.msk.msra.mxu1 %vm282_vm0, %v580_v15  ;;  %v1972_v33 = vmov 0   ;;  %v1973_v34 = vmov -inf   ;;  %vm1035_vm3 = vcmp.ne.s32.totalorder %v1034_v35, 0  ;;  %v1039_v36 = vsub.s32 0, %v2045_v10 }
  0x9b   : > { %1851 = vmatprep.subr.mxu0 %v1968_v3  ;;  %1856 = vmatprep.subr.mxu1 %v1968_v3  ;;  %v409_v23 = vrot.slane %v401_v18, %v2051_v21  ;;  %v425_v24 = vrot.slane %v417_v19, %v2051_v21  ;;  %v416_v27 = vrot.slane %v402_v16, %v2051_v21  ;;  %v1036_v37 = vsel %vm1035_vm3, 1, %v1972_v33 }
  0x9c   : > { %v432_v28 = vrot.slane %v418_v17, %v2051_v21  ;;  %1916 = vset.pattern.permute.xlu0 %v1972_v33  ;;  %1915 = vset.pattern.permute.xlu1 %v1972_v33  ;;  %275 = vst.msk [vmem:[#allocation2 + $0x8] sm:$0xff] %vm273_vm2, %v1973_v34  ;;  %274 = vst.msk [vmem:[#allocation2] sm:$0xff] %vm273_vm2, %v1973_v34  ;;  %v1040_v38 = vrot.slane %v1036_v37, %v1039_v36  ;;  %v1049_v39 = vand.u32 127, %v306_v6 }
  0x9d   : > { %v433_v25 = vcombine.low %v409_v23, %v425_v24  ;;  %v434_v26 = vcombine.high %v409_v23, %v425_v24  ;;  %276 = vst.msk [vmem:[#allocation2 + $0x10] sm:$0xff] %vm273_vm2, %v1973_v34  ;;  %277 = vst.msk [vmem:[#allocation2 + $0x18] sm:$0xff] %vm273_vm2, %v1973_v34 }
  0x9e   : > { %v435_v31 = vcombine.low %v416_v27, %v432_v28  ;;  %v436_v32 = vcombine.high %v416_v27, %v432_v28  ;;  %vm1041_vm4 = vcmp.eq.s32.totalorder %v1040_v38, 1  ;;  %vm1052_vm5 = vcmp.gt.s32.totalorder %v1049_v39, %v2045_v10 }
  0x9f   : > { %1844 = vmatmul.mubr.msk.f32.vlgmr.msra.gmra.mxu0 %vm282_vm0, %v433_v25  ;;  %1849 = vmatmul.mubr.msk.f32.vlgmr.msra.gmra.mxu1 %vm282_vm0, %v434_v26  ;;  %vm2124_vm6 = vmor %vm1041_vm4, %vm1052_vm5 }
  0xa0   : > { %1852 = vmatpush3.xpose.msk.msra.mxu0 %vm282_vm0, %v581_v29  ;;  %1857 = vmatpush3.xpose.msk.msra.mxu1 %vm282_vm0, %v582_v30 }
  0xa1   : > { %1853 = vmatprep.mubr.msk.f32.mxu0 %vm1969_vm1, %v1968_v3  ;;  %1858 = vmatprep.mubr.msk.f32.mxu1 %vm1969_vm1, %v1968_v3 }
  0xa2   : > { %1861 = vmatprep.subr.mxu0 %v1968_v3  ;;  %1866 = vmatprep.subr.mxu1 %v1968_v3 }
  0xa3   : > { %1854 = vmatmul.mubr.msk.f32.vlgmr.msra.gmra.mxu0 %vm282_vm0, %v435_v31  ;;  %1859 = vmatmul.mubr.msk.f32.vlgmr.msra.gmra.mxu1 %vm282_vm0, %v436_v32  ;;  %v2146_v55 = vld [vmem:[#allocation2 + $0x8] sm:$0xff]  ;;  %v2148_v56 = vld [vmem:[#allocation2] sm:$0xff] }
  0xa4   : > { %1863 = vmatprep.mubr.msk.f32.mxu0 %vm1969_vm1, %v1968_v3  ;;  %1868 = vmatprep.mubr.msk.f32.mxu1 %vm1969_vm1, %v1968_v3  ;;  %v2156_v61 = vld [vmem:[#allocation2 + $0x10] sm:$0xff]  ;;  %v2172_v4 = vld [vmem:[#allocation2 + $0x18] sm:$0xff] }
 0x15f   : > { %v802_v41 = vpop.f32.mrf.mxu0  ;;  %v878_v42 = vpop.f32.mrf.mxu1 }
 0x160   : > { %v1056_v43 = vsel %vm2124_vm6, -100000.0, %v802_v41  ;;  %v1057_v44 = vsel %vm2124_vm6, -100000.0, %v878_v42 }
 0x161   : > { %v1845_v45 = vpop.f32.mrf.mxu0  ;;  %v1850_v46 = vpop.f32.mrf.mxu1  ;;  %v1064_v6 = vsel %vm1060_vm7, %v1057_v44, -inf  ;;  %v1061_v47 = vsel %vm1060_vm7, %v1056_v43, -inf }
 0x162   : > { %1065 = vmax.xlane.f32.xlu1 %v1064_v6  ;;  %1062 = vmax.xlane.f32.xlu0 %v1061_v47 }
 0x163   : > { %v954_v10 = vpop.f32.mrf.mxu0  ;;  %v1030_v48 = vpop.f32.mrf.mxu1 }
 0x164   : > { %v2136_v49 = vsel %vm2124_vm6, -100000.0, %v954_v10  ;;  %v2142_v53 = vsel %vm2124_vm6, -100000.0, %v1030_v48 }
 0x165   : > { %v1855_v50 = vpop.f32.mrf.mxu0  ;;  %v1860_v51 = vpop.f32.mrf.mxu1  ;;  %v1067_v52 = vsel %vm1060_vm7, %v2136_v49, -inf  ;;  %v1070_v54 = vsel %vm1060_vm7, %v2142_v53, -inf }
 0x166   : > { %1068 = vmax.xlane.f32.xlu0 %v1067_v52 }
 0x16a   : > { %1071 = vmax.xlane.f32.xlu0 %v1070_v54 }
 0x1eb   : > { %v1066_v57 = vpop.xlane.xlu1 %1065  ;;  %v1063_v58 = vpop.xlane.xlu0 %1062 }
 0x1ec   : > { %v2151_v59 = vmax.f32 %v2146_v55, %v1066_v57  ;;  %v2154_v60 = vmax.f32 %v2148_v56, %v1063_v58 }
 0x1ee   : > { %v1082_v62 = vsub.f32 %v2146_v55, %v2151_v59  ;;  %1155 = vst.msk [vmem:[#allocation2 + $0x8] sm:$0xff] %vm273_vm2, %v2151_v59  ;;  %v1081_v63 = vsub.f32 %v2148_v56, %v2154_v60  ;;  %1154 = vst.msk [vmem:[#allocation2] sm:$0xff] %vm273_vm2, %v2154_v60  ;;  %1100 = vperm.xlu0 %1916, %v2151_v59   ;;  %1095 = vperm.xlu1 %1915, %v2154_v60   ;;  %v1125_v55 = vld [vmem:[#allocation3] sm:$0xff]  ;;  %v1126_v59 = vld [vmem:[#allocation3 + $0x8] sm:$0xff] }
 0x1ef   : > { %v1069_v0 = vpop.xlane.xlu0 %1068 }
 0x1f0   : > { %v2170_v2 = vmax.f32 %v2156_v61, %v1069_v0 }
 0x1f2   : > { %v1083_v5 = vsub.f32 %v2156_v61, %v2170_v2  ;;  %1156 = vst.msk [vmem:[#allocation2 + $0x10] sm:$0xff] %vm273_vm2, %v2170_v2  ;;  %584 = vrot.lane.b32.xlu1 %v290_v1, %s1966_s24 }
 0x1f3   : > { %v1072_v7 = vpop.xlane.xlu0 %1071 }
 0x1f4   : > { %v2180_v8 = vmax.f32 %v2172_v4, %v1072_v7  ;;  %v1085_v7 = vmul.f32 1.442695, %v1081_v63 }
 0x1f6   : > { %v1084_v9 = vsub.f32 %v2172_v4, %v2180_v8  ;;  %1157 = vst.msk [vmem:[#allocation2 + $0x18] sm:$0xff] %vm273_vm2, %v2180_v8  ;;  %587 = vrot.lane.b32.xlu1 %v290_v1, %s1967_s25 }
 0x1fa   : > { %590 = vrot.lane.b32.xlu1 %v290_v1, %s1965_s23 }
 0x1fe   : > { %1105 = vperm.xlu1 %1915, %v2170_v2  }
 0x202   : > { %1110 = vperm.xlu1 %1915, %v2180_v8  }
 0x269   : > { %v1096_v11 = vpop.permute.xlu1 %1095  ;;  %v1101_v12 = vpop.permute.xlu0 %1100 }
 0x26a   : > { %v1113_v13 = vsub.f32 %v1056_v43, %v1096_v11  ;;  %v1114_v15 = vsub.f32 %v1057_v44, %v1101_v12 }
 0x26c   : > { %v1117_v16 = vmul.f32 1.442695, %v1113_v13  ;;  %v1119_v17 = vmul.f32 1.442695, %v1114_v15 }
 0x26d   : > { %v585_v18 = vpop.permute.xlu1 %584 }
 0x26e   : > { %1917 = vpow2.f32 %v1117_v16 }
 0x26f   : > { %1919 = vpow2.f32 %v1119_v17  ;;  %v1091_v17 = vmul.f32 1.442695, %v1084_v9  ;;  %v1087_v9 = vmul.f32 1.442695, %v1082_v62 }
 0x271   : > { %v588_v19 = vpop.permute.xlu1 %587 }
 0x272   : > { %v593_v20 = vcombine.low %v290_v1, %v588_v19  ;;  %v594_v22 = vcombine.high %v290_v1, %v588_v19 }
 0x274   : > { %v601_v26 = vrot.slane %v593_v20, %v2048_v14  ;;  %v608_v27 = vrot.slane %v594_v22, %v2048_v14 }
 0x275   : > { %v591_v23 = vpop.permute.xlu1 %590 }
 0x276   : > { %v609_v24 = vcombine.low %v585_v18, %v591_v23  ;;  %v610_v25 = vcombine.high %v585_v18, %v591_v23 }
 0x278   : > { %v617_v28 = vrot.slane %v609_v24, %v2048_v14  ;;  %v624_v29 = vrot.slane %v610_v25, %v2048_v14 }
 0x279   : > { %v1106_v30 = vpop.permute.xlu1 %1105 }
 0x27a   : > { %v625_v31 = vcombine.low %v601_v26, %v617_v28  ;;  %v626_v32 = vcombine.high %v601_v26, %v617_v28  ;;  %v641_v33 = vcombine.low %v608_v27, %v624_v29  ;;  %v642_v34 = vcombine.high %v608_v27, %v624_v29 }
 0x27b   : > { %v1918_v35 = vpop.eup %1917  ;;  %v1115_v36 = vsub.f32 %v2136_v49, %v1106_v30 }
 0x27c   : > { %v1920_v37 = vpop.eup %1919  ;;  %v633_v38 = vrot.slane %v625_v31, %v2051_v21  ;;  %v640_v39 = vrot.slane %v626_v32, %v2051_v21  ;;  %v649_v40 = vrot.slane %v641_v33, %v2051_v21  ;;  %v656_v41 = vrot.slane %v642_v34, %v2051_v21  ;;  %v1128_v31 = vld [vmem:[#allocation3 + $0x18] sm:$0xff] }
 0x27d   : > { %v1121_v42 = vmul.f32 1.442695, %v1115_v36  ;;  %v1133_v43 = vsel %vm1060_vm7, %v1918_v35, 0.0  ;;  %v1111_v44 = vpop.permute.xlu1 %1110  ;;  %v1136_v45 = vsel %vm1060_vm7, %v1920_v37, 0.0 }
 0x27e   : > { %v661_v46 = vcombine.low %v633_v38, %v640_v39  ;;  %v1807_v6 = vcombine.high %v633_v38, %v640_v39  ;;  %v677_v47 = vcombine.low %v649_v40, %v656_v41  ;;  %v1808_v10 = vcombine.high %v649_v40, %v656_v41  ;;  %1134 = vadd.xlane.f32.xlu1 %v1133_v43  ;;  %v1450_v43 = vld [vmem:[#allocation4] sm:$0xff] }
 0x27f   : > { %1921 = vpow2.f32 %v1121_v42  ;;  %v1116_v48 = vsub.f32 %v2142_v53, %v1111_v44  ;;  %1137 = vadd.xlane.f32.xlu0 %v1136_v45  ;;  %v1451_v45 = vld [vmem:[#allocation4 + $0x8] sm:$0xff] }
 0x280   : > { %v668_v49 = vrot.slane %v661_v46, %v2048_v14  ;;  %v676_v50 = vrot.slane %v1807_v6, %v2048_v14  ;;  %v684_v51 = vrot.slane %v677_v47, %v2048_v14  ;;  %v692_v52 = vrot.slane %v1808_v10, %v2048_v14  ;;  %v1452_v10 = vld [vmem:[#allocation4 + $0x10] sm:$0xff] }
 0x281   : > { %v1123_v54 = vmul.f32 1.442695, %v1116_v48 }
 0x282   : > { %v693_v57 = vcombine.low %v668_v49, %v676_v50  ;;  %v709_v58 = vcombine.low %v684_v51, %v692_v52  ;;  %v694_v0 = vcombine.high %v668_v49, %v676_v50  ;;  %v710_v1 = vcombine.high %v684_v51, %v692_v52 }
 0x283   : > { %1923 = vpow2.f32 %v1123_v54 }
 0x284   : > { %v701_v53 = vrot.slane %v693_v57, %v2051_v21  ;;  %v717_v11 = vrot.slane %v709_v58, %v2051_v21  ;;  %v708_v12 = vrot.slane %v694_v0, %v2051_v21  ;;  %v724_v13 = vrot.slane %v710_v1, %v2051_v21  ;;  %v1453_v58 = vld [vmem:[#allocation4 + $0x18] sm:$0xff] }
 0x285   : > { %1925 = vpow2.f32 %v1085_v7 }
 0x286   : > { %v725_v15 = vcombine.low %v701_v53, %v717_v11  ;;  %v726_v16 = vcombine.high %v701_v53, %v717_v11  ;;  %v727_v56 = vcombine.low %v708_v12, %v724_v13  ;;  %v728_v60 = vcombine.high %v708_v12, %v724_v13 }
 0x287   : > { %1927 = vpow2.f32 %v1091_v17 }
 0x288   : > { %1862 = vmatpush3.msra.mxu0 %v725_v15  ;;  %1867 = vmatpush3.msra.mxu1 %v726_v16  ;;  %1929 = vpow2.f32 %v1087_v9 }
 0x289   : > { %1864 = vmatmul.mubr.msk.f32.vlgmr.msra.gmra.mxu0 %vm1060_vm7, %v1918_v35  ;;  %1869 = vmatmul.mubr.msk.f32.vlgmr.msra.gmra.mxu1 %vm1060_vm7, %v1920_v37 }
 0x28a   : > { %1871 = vmatprep.subr.mxu0 %v1968_v3  ;;  %1876 = vmatprep.subr.mxu1 %v1968_v3 }
 0x28b   : > { %1872 = vmatpush3.msra.mxu0 %v727_v56  ;;  %1877 = vmatpush3.msra.mxu1 %v728_v60 }
 0x28c   : > { %v1922_v63 = vpop.eup %1921  ;;  %1873 = vmatprep.mubr.msk.f32.mxu0 %vm1969_vm1, %v1968_v3  ;;  %1878 = vmatprep.mubr.msk.f32.mxu1 %vm1969_vm1, %v1968_v3  ;;  %v1089_v3 = vmul.f32 1.442695, %v1083_v5  ;;  %v1127_v5 = vld [vmem:[#allocation3 + $0x10] sm:$0xff] }
 0x28d   : > { %1874 = vmatmul.mubr.msk.f32.vlgmr.msra.gmra.mxu0 %vm1060_vm7, %v1922_v63  ;;  %v1139_v4 = vsel %vm1060_vm7, %v1922_v63, 0.0 }
 0x28e   : > { %1140 = vadd.xlane.f32.xlu1 %v1139_v4  ;;  %1931 = vpow2.f32 %v1089_v3 }
 0x290   : > { %v1924_v8 = vpop.eup %1923 }
 0x291   : > { %1879 = vmatmul.mubr.msk.f32.vlgmr.msra.gmra.mxu1 %vm1060_vm7, %v1924_v8  ;;  %v1142_v18 = vsel %vm1060_vm7, %v1924_v8, 0.0 }
 0x292   : > { %1143 = vadd.xlane.f32.xlu1 %v1142_v18  ;;  %v1926_v19 = vpop.eup %1925 }
 0x293   : > { %v1129_v62 = vmul.f32 %v1926_v19, %v1125_v55 }
 0x294   : > { %v1928_v20 = vpop.eup %1927 }
 0x295   : > { %1456 = vperm.xlu0 %1916, %v1926_v19   ;;  %v1930_v22 = vpop.eup %1929  ;;  %v1132_v33 = vmul.f32 %v1928_v20, %v1128_v31 }
 0x296   : > { %v1130_v25 = vmul.f32 %v1930_v22, %v1126_v59 }
 0x299   : > { %1471 = vperm.xlu0 %1916, %v1928_v20  }
 0x29b   : > { %v1932_v23 = vpop.eup %1931 }
 0x29c   : > { %v1131_v29 = vmul.f32 %v1932_v23, %v1127_v5 }
 0x2a3   : > { %1461 = vperm.xlu1 %1915, %v1930_v22  }
 0x2a7   : > { %1466 = vperm.xlu1 %1915, %v1932_v23  }
 0x307   : > { %v1135_v24 = vpop.xlane.xlu1 %1134 }
 0x308   : > { %v1145_v26 = vadd.f32 %v1135_v24, %v1129_v62  ;;  %v1138_v27 = vpop.xlane.xlu0 %1137 }
 0x309   : > { %v1146_v28 = vadd.f32 %v1138_v27, %v1130_v25 }
 0x30a   : > { %1150 = vst.msk [vmem:[#allocation3] sm:$0xff] %vm273_vm2, %v1145_v26 }
 0x30b   : > { %1151 = vst.msk [vmem:[#allocation3 + $0x8] sm:$0xff] %vm273_vm2, %v1146_v28 }
 0x310   : > { %v1457_v44 = vpop.permute.xlu0 %1456 }
 0x311   : > { %v1493_v61 = vld [vmem:[#allocation3] sm:$0xff]  ;;  %v1474_v46 = vmul.f32 %v1457_v44, %v1450_v43 }
 0x312   : > { %1933 = vrcp.f32 %v1493_v61  ;;  %v1494_v2 = vld [vmem:[#allocation3 + $0x8] sm:$0xff] }
 0x313   : > { %1935 = vrcp.f32 %v1494_v2 }
 0x314   : > { %v1472_v0 = vpop.permute.xlu0 %1471 }
 0x315   : > { %v1477_v11 = vmul.f32 %v1472_v0, %v1453_v58 }
 0x317   : > { %v1141_v30 = vpop.xlane.xlu1 %1140 }
 0x318   : > { %v1147_v32 = vadd.f32 %v1141_v30, %v1131_v29 }
 0x31a   : > { %1152 = vst.msk [vmem:[#allocation3 + $0x10] sm:$0xff] %vm273_vm2, %v1147_v32 }
 0x31b   : > { %v1144_v34 = vpop.xlane.xlu1 %1143 }
 0x31c   : > { %v1148_v35 = vadd.f32 %v1144_v34, %v1132_v33 }
 0x31e   : > { %1153 = vst.msk [vmem:[#allocation3 + $0x18] sm:$0xff] %vm273_vm2, %v1148_v35 }
 0x31f   : > { %v1934_v36 = vpop.eup %1933  ;;  %v1462_v42 = vpop.permute.xlu1 %1461 }
 0x320   : > { %v1936_v37 = vpop.eup %1935  ;;  %1503 = vperm.xlu1 %1915, %v1934_v36   ;;  %v1475_v6 = vmul.f32 %v1462_v42, %v1451_v45 }
 0x321   : > { %1508 = vperm.xlu0 %1916, %v1936_v37   ;;  %v1495_v38 = vld [vmem:[#allocation3 + $0x10] sm:$0xff] }
 0x322   : > { %1937 = vrcp.f32 %v1495_v38 }
 0x323   : > { %v1467_v47 = vpop.permute.xlu1 %1466 }
 0x324   : > { %v1476_v57 = vmul.f32 %v1467_v47, %v1452_v10 }
 0x325   : > { %v1496_v39 = vld [vmem:[#allocation3 + $0x18] sm:$0xff] }
 0x326   : > { %1939 = vrcp.f32 %v1496_v39 }
 0x32f   : > { %v1938_v40 = vpop.eup %1937 }
 0x330   : > { %1513 = vperm.xlu1 %1915, %v1938_v40  }
 0x333   : > { %v1940_v41 = vpop.eup %1939 }
 0x334   : > { %1518 = vperm.xlu0 %1916, %v1940_v41  }
 0x349   : > { %v1227_v48 = vpop.f32.mrf.mxu0  ;;  %v1300_v49 = vpop.f32.mrf.mxu1 }
 0x34a   : > { %v1478_v50 = vadd.f32 %v1474_v46, %v1227_v48  ;;  %v1479_v51 = vadd.f32 %v1475_v6, %v1300_v49 }
 0x34b   : > { %v1865_v52 = vpop.f32.mrf.mxu0  ;;  %v1870_v54 = vpop.f32.mrf.mxu1 }
 0x34c   : > { %1482 = vst.msk [vmem:[#allocation4] sm:$0xff] %vm282_vm0, %v1478_v50  ;;  %1483 = vst.msk [vmem:[#allocation4 + $0x8] sm:$0xff] %vm282_vm0, %v1479_v51 }
 0x34d   : > { %v1373_v1 = vpop.f32.mrf.mxu0 }
 0x34e   : > { %v1480_v7 = vadd.f32 %v1476_v57, %v1373_v1 }
 0x34f   : > { %v1875_v53 = vpop.f32.mrf.mxu0 }
 0x350   : > { %1484 = vst.msk [vmem:[#allocation4 + $0x10] sm:$0xff] %vm282_vm0, %v1480_v7 }
 0x351   : > { %v1446_v12 = vpop.f32.mrf.mxu1 }
 0x352   : > { %v1481_v13 = vadd.f32 %v1477_v11, %v1446_v12 }
 0x353   : > { %v1880_v15 = vpop.f32.mrf.mxu1  ;;  %v1489_v4 = vld [vmem:[#allocation4] sm:$0xff]  ;;  %v1490_v9 = vld [vmem:[#allocation4 + $0x8] sm:$0xff] }
 0x354   : > { %1485 = vst.msk [vmem:[#allocation4 + $0x18] sm:$0xff] %vm282_vm0, %v1481_v13 }
 0x357   : > { %v1491_v56 = vld [vmem:[#allocation4 + $0x10] sm:$0xff] }
 0x35b   : > { %v1492_v18 = vld [vmem:[#allocation4 + $0x18] sm:$0xff] }
 0x39b   : > { %v1504_v16 = vpop.permute.xlu1 %1503 }
 0x39c   : > { %v1509_v17 = vpop.permute.xlu0 %1508  ;;  %v1521_v8 = vmul.f32 %v1504_v16, %v1489_v4 }
 0x39d   : > { %v1522_v3 = vmul.f32 %v1509_v17, %v1490_v9 }
 0x3ab   : > { %v1514_v60 = vpop.permute.xlu1 %1513 }
 0x3ac   : > { %v1523_v63 = vmul.f32 %v1514_v60, %v1491_v56 }
 0x3ae   : > { %v1525_v20 = vcombine.low %v1521_v8, %v1523_v63  ;;  %v1526_v22 = vcombine.high %v1521_v8, %v1523_v63 }
 0x3af   : > { %v1519_v19 = vpop.permute.xlu0 %1518 }
 0x3b0   : > { %v1524_v23 = vmul.f32 %v1519_v19, %v1492_v18  ;;  %v1533_v62 = vrot.slane %v1525_v20, %v2048_v14  ;;  %v1540_v24 = vrot.slane %v1526_v22, %v2048_v14 }
 0x3b2   : > { %v1541_v55 = vcombine.low %v1522_v3, %v1524_v23  ;;  %v1542_v59 = vcombine.high %v1522_v3, %v1524_v23 }
 0x3b4   : > { %v1549_v25 = vrot.slane %v1541_v55, %v2048_v14  ;;  %v1556_v26 = vrot.slane %v1542_v59, %v2048_v14 }
 0x3b6   : > { %v1557_v27 = vcombine.low %v1533_v62, %v1549_v25  ;;  %v1558_v28 = vcombine.high %v1533_v62, %v1549_v25  ;;  %v1573_v61 = vcombine.low %v1540_v24, %v1556_v26  ;;  %v1574_v2 = vcombine.high %v1540_v24, %v1556_v26 }
 0x3b8   : > { %v1565_v5 = vrot.slane %v1557_v27, %v2051_v21  ;;  %v1572_v29 = vrot.slane %v1558_v28, %v2051_v21  ;;  %v1581_v30 = vrot.slane %v1573_v61, %v2051_v21  ;;  %v1588_v31 = vrot.slane %v1574_v2, %v2051_v21 }
 0x3ba   : > { %v1593_v32 = vcombine.low %v1565_v5, %v1572_v29  ;;  %v1821_v33 = vcombine.high %v1565_v5, %v1572_v29  ;;  %v1609_v34 = vcombine.low %v1581_v30, %v1588_v31  ;;  %v1822_v35 = vcombine.high %v1581_v30, %v1588_v31 }
 0x3bc   : > { %v1600_v36 = vrot.slane %v1593_v32, %v2048_v14  ;;  %v1608_v37 = vrot.slane %v1821_v33, %v2048_v14  ;;  %v1616_v38 = vrot.slane %v1609_v34, %v2048_v14  ;;  %v1624_v39 = vrot.slane %v1822_v35, %v2048_v14 }
 0x3be   : > { %v1626_v40 = vcombine.high %v1600_v36, %v1608_v37  ;;  %v1642_v41 = vcombine.high %v1616_v38, %v1624_v39  ;;  %v1625_v42 = vcombine.low %v1600_v36, %v1608_v37  ;;  %v1641_v43 = vcombine.low %v1616_v38, %v1624_v39 }
 0x3c0   : > { %v1640_v44 = vrot.slane %v1626_v40, %v2051_v21  ;;  %v1656_v45 = vrot.slane %v1642_v41, %v2051_v21  ;;  %v1633_v46 = vrot.slane %v1625_v42, %v2051_v21  ;;  %v1649_v6 = vrot.slane %v1641_v43, %v2051_v21 }
 0x3c2   : > { %v1659_v47 = vcombine.low %v1640_v44, %v1656_v45  ;;  %v1658_v10 = vcombine.high %v1633_v46, %v1649_v6  ;;  %v1657_v48 = vcombine.low %v1633_v46, %v1649_v6  ;;  %v1660_v14 = vcombine.high %v1640_v44, %v1656_v45 }
 0x3c4   : > { %1666 = vrot.lane.b32.xlu0 %v1659_v47, %s1967_s25  ;;  %1662 = vrot.lane.b32.xlu1 %v1658_v10, %s1965_s23 }
 0x3c8   : > { %1670 = vrot.lane.b32.xlu1 %v1660_v14, %s1966_s24 }
 0x436   : > { %v1663_v49 = vpop.permute.xlu1 %1662  ;;  %v1667_v50 = vpop.permute.xlu0 %1666 }
 0x437   : > { %v1673_v51 = vsel %vm282_vm0, %v1657_v48, %v1663_v49 }
 0x438   : > { %v1675_v52 = vsel %vm1674_vm8, %v1673_v51, %v1667_v50 }
 0x43a   : > { %v1671_v21 = vpop.permute.xlu1 %1670 }
 0x43b   : > { %v1677_v54 = vsel %vm1676_vm9, %v1675_v52, %v1671_v21 }
 0x43c   : > { %1678 = vst [vmem:[%s268_s5] sm:$0xff] %v1677_v54 }
 0x43d PF: > { %s13_s14 = sadd.s32 1, %s1963_s14   ;;  %s2281_s12 = smov %s1959_s13 }
 0x43e   : > { %p10_p5 = scmp.ge.s32.totalorder %s13_s14, 4   ;;  %s2282_s13 = smov %s2284_s15 }
 0x440   :  { %12 = sbr.rel (!%p10_p5) target bundleno = 2 (0x2), region = 76 }

// kernel: decoder_layer.13
= control target key start
LH: loop header
LB: loop body
LE: loop exit
PB: predicated region body
PF: predicated region fallthrough
CT: control target
= control target key end

     0   :  { %v251_v3 = vmov 0.0   ;;  %v188_v37 = vlaneseq  ;;  %s411_s1 = inlined_call_operand.vmem [shape: f32[128,256], index: 1, kind: input, shape index: {}]   ;;  %s412_s0 = inlined_call_operand.vmem [shape: f32[32,128], index: 0, kind: input, shape index: {}]   ;;  %s413_s2 = inlined_call_operand.vmem [shape: f32[1,256], index: 2, kind: input, shape index: {}]   ;;  %s414_s3 = inlined_call_operand.vmem [shape: f32[32,256], index: 3, kind: output, shape index: {}]  }
   0x1   :  { %v69_v0 = vld [vmem:[%s411_s1 + $0xf8] sm:$0xff]  ;;  %v68_v1 = vld [vmem:[%s411_s1 + $0xf0] sm:$0xff]  ;;  %v67_v2 = vld [vmem:[%s411_s1 + $0xe8] sm:$0xff]  ;;  %134 = vmatprep.mubr.f32.mxu0 %v251_v3  ;;  %146 = vmatprep.mubr.f32.mxu1 %v251_v3 }
   0x2   :  { %70 = vmatprep.subr.mxu0 %v69_v0  ;;  %218 = vmatprep.subr.mxu1 %v69_v0  ;;  %v66_v4 = vld [vmem:[%s411_s1 + $0xe0] sm:$0xff]  ;;  %v65_v5 = vld [vmem:[%s411_s1 + $0xd8] sm:$0xff]  ;;  %v64_v6 = vld [vmem:[%s411_s1 + $0xd0] sm:$0xff]  ;;  %v189_v38 = vshrl.u32 %v188_v37, 7 }
   0x3   :  { %71 = vmatpush1.msra.mxu0 %v68_v1  ;;  %234 = vmatpush1.msra.mxu1 %v68_v1  ;;  %v63_v7 = vld [vmem:[%s411_s1 + $0xc8] sm:$0xff]  ;;  %v62_v8 = vld [vmem:[%s411_s1 + $0xc0] sm:$0xff]  ;;  %v61_v9 = vld [vmem:[%s411_s1 + $0xb8] sm:$0xff] }
   0x4   :  { %72 = vmatprep.subr.mxu0 %v67_v2  ;;  %219 = vmatprep.subr.mxu1 %v67_v2  ;;  %v60_v10 = vld [vmem:[%s411_s1 + $0xb0] sm:$0xff]  ;;  %v59_v11 = vld [vmem:[%s411_s1 + $0xa8] sm:$0xff]  ;;  %v58_v12 = vld [vmem:[%s411_s1 + $0xa0] sm:$0xff]  ;;  %v190_v39 = vsub.s32 0, %v189_v38  ;;  %v194_v41 = vsub.s32 1, %v189_v38 }
   0x5   :  { %73 = vmatpush1.msra.mxu0 %v66_v4  ;;  %235 = vmatpush1.msra.mxu1 %v66_v4  ;;  %v57_v13 = vld [vmem:[%s411_s1 + $0x98] sm:$0xff]  ;;  %v56_v14 = vld [vmem:[%s411_s1 + $0x90] sm:$0xff]  ;;  %v55_v15 = vld [vmem:[%s411_s1 + $0x88] sm:$0xff] }
   0x6   :  { %74 = vmatprep.subr.mxu0 %v65_v5  ;;  %220 = vmatprep.subr.mxu1 %v65_v5  ;;  %v54_v16 = vld [vmem:[%s411_s1 + $0x80] sm:$0xff]  ;;  %v53_v17 = vld [vmem:[%s411_s1 + $0x78] sm:$0xff]  ;;  %v52_v18 = vld [vmem:[%s411_s1 + $0x70] sm:$0xff] }
   0x7   :  { %75 = vmatpush1.msra.mxu0 %v64_v6  ;;  %236 = vmatpush1.msra.mxu1 %v64_v6  ;;  %v51_v19 = vld [vmem:[%s411_s1 + $0x68] sm:$0xff]  ;;  %v50_v20 = vld [vmem:[%s411_s1 + $0x60] sm:$0xff]  ;;  %v49_v21 = vld [vmem:[%s411_s1 + $0x58] sm:$0xff] }
   0x8   :  { %76 = vmatprep.subr.mxu0 %v63_v7  ;;  %221 = vmatprep.subr.mxu1 %v63_v7  ;;  %v48_v22 = vld [vmem:[%s411_s1 + $0x50] sm:$0xff]  ;;  %v47_v23 = vld [vmem:[%s411_s1 + $0x48] sm:$0xff]  ;;  %v46_v24 = vld [vmem:[%s411_s1 + $0x40] sm:$0xff] }
   0x9   :  { %77 = vmatpush1.msra.mxu0 %v62_v8  ;;  %237 = vmatpush1.msra.mxu1 %v62_v8  ;;  %v45_v25 = vld [vmem:[%s411_s1 + $0x38] sm:$0xff]  ;;  %v44_v26 = vld [vmem:[%s411_s1 + $0x30] sm:$0xff]  ;;  %v43_v27 = vld [vmem:[%s411_s1 + $0x28] sm:$0xff] }
   0xa   :  { %78 = vmatprep.subr.mxu0 %v61_v9  ;;  %222 = vmatprep.subr.mxu1 %v61_v9  ;;  %v42_v28 = vld [vmem:[%s411_s1 + $0x20] sm:$0xff]  ;;  %v41_v29 = vld [vmem:[%s411_s1 + $0x18] sm:$0xff]  ;;  %v40_v30 = vld [vmem:[%s411_s1 + $0x10] sm:$0xff] }
   0xb   :  { %79 = vmatpush1.msra.mxu0 %v60_v10  ;;  %238 = vmatpush1.msra.mxu1 %v60_v10  ;;  %v39_v31 = vld [vmem:[%s411_s1 + $0x8] sm:$0xff]  ;;  %v38_v32 = vld [vmem:[%s411_s1] sm:$0xff]  ;;  %v28_v34 = vld [vmem:[%s412_s0 + $0x10] sm:$0xff] }
   0xc   :  { %80 = vmatprep.subr.mxu0 %v59_v11  ;;  %223 = vmatprep.subr.mxu1 %v59_v11  ;;  %v26_v33 = vld [vmem:[%s412_s0] sm:$0xff]  ;;  %v27_v35 = vld [vmem:[%s412_s0 + $0x8] sm:$0xff]  ;;  %v29_v36 = vld [vmem:[%s412_s0 + $0x18] sm:$0xff] }
   0xd   :  { %81 = vmatpush1.msra.mxu0 %v58_v12  ;;  %239 = vmatpush1.msra.mxu1 %v58_v12  ;;  %v186_v40 = vld [vmem:[%s413_s2] sm:$0x3] }
   0xe   :  { %82 = vmatprep.subr.mxu0 %v57_v13  ;;  %224 = vmatprep.subr.mxu1 %v57_v13  ;;  %v191_v42 = vrot.slane %v186_v40, %v190_v39  ;;  %v195_v43 = vrot.slane %v186_v40, %v194_v41 }
   0xf   :  { %83 = vmatpush1.msra.mxu0 %v56_v14  ;;  %240 = vmatpush1.msra.mxu1 %v56_v14 }
  0x10   :  { %84 = vmatprep.subr.mxu0 %v55_v15  ;;  %225 = vmatprep.subr.mxu1 %v55_v15 }
  0x11   :  { %85 = vmatpush1.msra.mxu0 %v54_v16  ;;  %241 = vmatpush1.msra.mxu1 %v54_v16 }
  0x12   :  { %86 = vmatprep.subr.mxu0 %v53_v17  ;;  %226 = vmatprep.subr.mxu1 %v53_v17 }
  0x13   :  { %87 = vmatpush1.msra.mxu0 %v52_v18  ;;  %242 = vmatpush1.msra.mxu1 %v52_v18 }
  0x14   :  { %88 = vmatprep.subr.mxu0 %v51_v19  ;;  %227 = vmatprep.subr.mxu1 %v51_v19 }
  0x15   :  { %89 = vmatpush1.msra.mxu0 %v50_v20  ;;  %243 = vmatpush1.msra.mxu1 %v50_v20 }
  0x16   :  { %90 = vmatprep.subr.mxu0 %v49_v21  ;;  %228 = vmatprep.subr.mxu1 %v49_v21 }
  0x17   :  { %91 = vmatpush1.msra.mxu0 %v48_v22  ;;  %244 = vmatpush1.msra.mxu1 %v48_v22 }
  0x18   :  { %92 = vmatprep.subr.mxu0 %v47_v23  ;;  %229 = vmatprep.subr.mxu1 %v47_v23 }
  0x19   :  { %93 = vmatpush1.msra.mxu0 %v46_v24  ;;  %245 = vmatpush1.msra.mxu1 %v46_v24 }
  0x1a   :  { %94 = vmatprep.subr.mxu0 %v45_v25  ;;  %230 = vmatprep.subr.mxu1 %v45_v25 }
  0x1b   :  { %95 = vmatpush1.msra.mxu0 %v44_v26  ;;  %246 = vmatpush1.msra.mxu1 %v44_v26 }
  0x1c   :  { %96 = vmatprep.subr.mxu0 %v43_v27  ;;  %231 = vmatprep.subr.mxu1 %v43_v27 }
  0x1d   :  { %97 = vmatpush1.msra.mxu0 %v42_v28  ;;  %247 = vmatpush1.msra.mxu1 %v42_v28 }
  0x1e   :  { %98 = vmatprep.subr.mxu0 %v41_v29  ;;  %232 = vmatprep.subr.mxu1 %v41_v29 }
  0x1f   :  { %99 = vmatpush1.msra.mxu0 %v40_v30  ;;  %248 = vmatpush1.msra.mxu1 %v40_v30 }
  0x20   :  { %100 = vmatprep.subr.mxu0 %v39_v31  ;;  %233 = vmatprep.subr.mxu1 %v39_v31 }
  0x21   :  { %101 = vmatpush1.msra.mxu0 %v38_v32  ;;  %249 = vmatpush1.msra.mxu1 %v38_v32 }
  0x22   :  { %135 = vmatmul.mubr.f32.vlgmr.msra.gmra.mxu0 %v26_v33  ;;  %147 = vmatmul.mubr.f32.vlgmr.msra.gmra.mxu1 %v28_v34 }
  0x23   :  { %140 = vmatprep.mubr.f32.mxu0 %v251_v3  ;;  %152 = vmatprep.mubr.f32.mxu1 %v251_v3 }
  0x26   :  { %141 = vmatmul.mubr.f32.gmra.mxu0 %v27_v35  ;;  %153 = vmatmul.mubr.f32.gmra.mxu1 %v29_v36 }
  0xe2   :  { %v136_v44 = vpop.f32.mrf.mxu0  ;;  %v148_v45 = vpop.f32.mrf.mxu1 }
  0xe3   :  { %v198_v46 = vadd.f32 %v191_v42, %v136_v44  ;;  %v202_v47 = vadd.f32 %v191_v42, %v148_v45 }
  0xe4   :  { %v138_v48 = vpop.f32.mrf.mxu0  ;;  %v150_v49 = vpop.f32.mrf.mxu1 }
  0xe5   :  { %206 = vst [vmem:[%s414_s3] sm:$0xff] %v198_v46  ;;  %210 = vst [vmem:[%s414_s3 + $0x20] sm:$0xff] %v202_v47  ;;  %v199_v50 = vadd.f32 %v195_v43, %v138_v48  ;;  %v203_v51 = vadd.f32 %v195_v43, %v150_v49 }
  0xe6   :  { %v142_v52 = vpop.f32.mrf.mxu0  ;;  %v154_v53 = vpop.f32.mrf.mxu1 }
  0xe7   :  { %207 = vst [vmem:[%s414_s3 + $0x8] sm:$0xff] %v199_v50  ;;  %211 = vst [vmem:[%s414_s3 + $0x28] sm:$0xff] %v203_v51  ;;  %v200_v54 = vadd.f32 %v191_v42, %v142_v52  ;;  %v204_v55 = vadd.f32 %v191_v42, %v154_v53 }
  0xe8   :  { %v144_v56 = vpop.f32.mrf.mxu0  ;;  %v156_v57 = vpop.f32.mrf.mxu1 }
  0xe9   :  { %208 = vst [vmem:[%s414_s3 + $0x10] sm:$0xff] %v200_v54  ;;  %212 = vst [vmem:[%s414_s3 + $0x30] sm:$0xff] %v204_v55  ;;  %v201_v58 = vadd.f32 %v195_v43, %v144_v56  ;;  %v205_v59 = vadd.f32 %v195_v43, %v156_v57 }
  0xeb   :  { %209 = vst [vmem:[%s414_s3 + $0x18] sm:$0xff] %v201_v58  ;;  %213 = vst [vmem:[%s414_s3 + $0x38] sm:$0xff] %v205_v59 }

// kernel: decoder_layer.16
= control target key start
LH: loop header
LB: loop body
LE: loop exit
PB: predicated region body
PF: predicated region fallthrough
CT: control target
= control target key end

     0   :  { %v266_v42 = vmov 0.0   ;;  %v201_v59 = vlaneseq  ;;  %s430_s0 = inlined_call_operand.vmem [shape: f32[16,128], index: 0, kind: input, shape index: {}]   ;;  %s431_s1 = inlined_call_operand.vmem [shape: f32[128,256], index: 1, kind: input, shape index: {}]   ;;  %s432_s3 = inlined_call_operand.vmem [shape: f32[1,128], index: 3, kind: input, shape index: {}]   ;;  %s433_s4 = inlined_call_operand.vmem [shape: f32[1,128], index: 4, kind: input, shape index: {}]   ;;  %s434_s2 = inlined_call_operand.vmem [shape: f32[1,256], index: 2, kind: input, shape index: {}]   ;;  %s435_s5 = inlined_call_operand.vmem [shape: f32[16,256], index: 5, kind: output, shape index: {}]  }
   0x1   :  { %v28_v0 = vld [vmem:[%s430_s0] sm:$0xff]  ;;  %v29_v1 = vld [vmem:[%s430_s0 + $0x8] sm:$0xff]  ;;  %v106_v2 = vld [vmem:[%s431_s1 + $0xf8] sm:$0xff]  ;;  %171 = vmatprep.mubr.f32.mxu0 %v266_v42  ;;  %177 = vmatprep.mubr.f32.mxu1 %v266_v42 }
   0x2   :  { %30 = vadd.xlane.f32.xlu0 %v28_v0  ;;  %v105_v3 = vld [vmem:[%s431_s1 + $0xf0] sm:$0xff]  ;;  %v104_v4 = vld [vmem:[%s431_s1 + $0xe8] sm:$0xff]  ;;  %107 = vmatprep.subr.mxu0 %v106_v2  ;;  %v103_v5 = vld [vmem:[%s431_s1 + $0xe0] sm:$0xff]  ;;  %v202_v60 = vshrl.u32 %v201_v59, 7 }
   0x3   :  { %229 = vmatprep.subr.mxu1 %v106_v2  ;;  %108 = vmatpush1.msra.mxu0 %v105_v3  ;;  %v102_v6 = vld [vmem:[%s431_s1 + $0xd8] sm:$0xff]  ;;  %v101_v7 = vld [vmem:[%s431_s1 + $0xd0] sm:$0xff]  ;;  %v100_v8 = vld [vmem:[%s431_s1 + $0xc8] sm:$0xff] }
   0x4   :  { %245 = vmatpush1.msra.mxu1 %v105_v3  ;;  %109 = vmatprep.subr.mxu0 %v104_v4  ;;  %v99_v9 = vld [vmem:[%s431_s1 + $0xc0] sm:$0xff]  ;;  %v98_v18 = vld [vmem:[%s431_s1 + $0xb8] sm:$0xff]  ;;  %v97_v19 = vld [vmem:[%s431_s1 + $0xb0] sm:$0xff]  ;;  %v203_v61 = vsub.s32 0, %v202_v60  ;;  %v207_v63 = vsub.s32 1, %v202_v60 }
   0x5   :  { %230 = vmatprep.subr.mxu1 %v104_v4  ;;  %110 = vmatpush1.msra.mxu0 %v103_v5  ;;  %v96_v20 = vld [vmem:[%s431_s1 + $0xa8] sm:$0xff]  ;;  %v95_v21 = vld [vmem:[%s431_s1 + $0xa0] sm:$0xff]  ;;  %v94_v22 = vld [vmem:[%s431_s1 + $0x98] sm:$0xff] }
   0x6   :  { %32 = vadd.xlane.f32.xlu0 %v29_v1  ;;  %246 = vmatpush1.msra.mxu1 %v103_v5  ;;  %v93_v23 = vld [vmem:[%s431_s1 + $0x90] sm:$0xff]  ;;  %v92_v24 = vld [vmem:[%s431_s1 + $0x88] sm:$0xff]  ;;  %v91_v25 = vld [vmem:[%s431_s1 + $0x80] sm:$0xff] }
   0x7   :  { %111 = vmatprep.subr.mxu0 %v102_v6  ;;  %231 = vmatprep.subr.mxu1 %v102_v6  ;;  %v90_v26 = vld [vmem:[%s431_s1 + $0x78] sm:$0xff]  ;;  %v89_v27 = vld [vmem:[%s431_s1 + $0x70] sm:$0xff]  ;;  %v88_v28 = vld [vmem:[%s431_s1 + $0x68] sm:$0xff] }
   0x8   :  { %112 = vmatpush1.msra.mxu0 %v101_v7  ;;  %247 = vmatpush1.msra.mxu1 %v101_v7  ;;  %v87_v29 = vld [vmem:[%s431_s1 + $0x60] sm:$0xff]  ;;  %v86_v30 = vld [vmem:[%s431_s1 + $0x58] sm:$0xff]  ;;  %v85_v31 = vld [vmem:[%s431_s1 + $0x50] sm:$0xff] }
   0x9   :  { %113 = vmatprep.subr.mxu0 %v100_v8  ;;  %232 = vmatprep.subr.mxu1 %v100_v8  ;;  %v84_v32 = vld [vmem:[%s431_s1 + $0x48] sm:$0xff]  ;;  %v83_v33 = vld [vmem:[%s431_s1 + $0x40] sm:$0xff]  ;;  %v82_v34 = vld [vmem:[%s431_s1 + $0x38] sm:$0xff] }
   0xa   :  { %114 = vmatpush1.msra.mxu0 %v99_v9  ;;  %248 = vmatpush1.msra.mxu1 %v99_v9  ;;  %v81_v35 = vld [vmem:[%s431_s1 + $0x30] sm:$0xff]  ;;  %v80_v36 = vld [vmem:[%s431_s1 + $0x28] sm:$0xff]  ;;  %v79_v37 = vld [vmem:[%s431_s1 + $0x20] sm:$0xff] }
   0xb   :  { %115 = vmatprep.subr.mxu0 %v98_v18  ;;  %233 = vmatprep.subr.mxu1 %v98_v18  ;;  %v78_v38 = vld [vmem:[%s431_s1 + $0x18] sm:$0xff]  ;;  %v77_v39 = vld [vmem:[%s431_s1 + $0x10] sm:$0xff]  ;;  %v76_v40 = vld [vmem:[%s431_s1 + $0x8] sm:$0xff] }
   0xc   :  { %116 = vmatpush1.msra.mxu0 %v97_v19  ;;  %249 = vmatpush1.msra.mxu1 %v97_v19  ;;  %v75_v41 = vld [vmem:[%s431_s1] sm:$0xff] }
   0xd   :  { %117 = vmatprep.subr.mxu0 %v96_v20  ;;  %234 = vmatprep.subr.mxu1 %v96_v20  ;;  %v227_v50 = vld [vmem:[%s432_s3] ss:$0 sm:$0xff] }
   0xe   :  { %118 = vmatpush1.msra.mxu0 %v95_v21  ;;  %250 = vmatpush1.msra.mxu1 %v95_v21  ;;  %v228_v52 = vld [vmem:[%s433_s4] ss:$0 sm:$0xff] }
   0xf   :  { %119 = vmatprep.subr.mxu0 %v94_v22  ;;  %235 = vmatprep.subr.mxu1 %v94_v22  ;;  %v199_v62 = vld [vmem:[%s434_s2] sm:$0x3] }
  0x10   :  { %120 = vmatpush1.msra.mxu0 %v93_v23  ;;  %251 = vmatpush1.msra.mxu1 %v93_v23 }
  0x11   :  { %121 = vmatprep.subr.mxu0 %v92_v24  ;;  %236 = vmatprep.subr.mxu1 %v92_v24 }
  0x12   :  { %122 = vmatpush1.msra.mxu0 %v91_v25  ;;  %252 = vmatpush1.msra.mxu1 %v91_v25 }
  0x13   :  { %123 = vmatprep.subr.mxu0 %v90_v26  ;;  %237 = vmatprep.subr.mxu1 %v90_v26 }
  0x14   :  { %124 = vmatpush1.msra.mxu0 %v89_v27  ;;  %253 = vmatpush1.msra.mxu1 %v89_v27 }
  0x15   :  { %125 = vmatprep.subr.mxu0 %v88_v28  ;;  %238 = vmatprep.subr.mxu1 %v88_v28 }
  0x16   :  { %126 = vmatpush1.msra.mxu0 %v87_v29  ;;  %254 = vmatpush1.msra.mxu1 %v87_v29 }
  0x17   :  { %127 = vmatprep.subr.mxu0 %v86_v30  ;;  %239 = vmatprep.subr.mxu1 %v86_v30 }
  0x18   :  { %128 = vmatpush1.msra.mxu0 %v85_v31  ;;  %255 = vmatpush1.msra.mxu1 %v85_v31 }
  0x19   :  { %129 = vmatprep.subr.mxu0 %v84_v32  ;;  %240 = vmatprep.subr.mxu1 %v84_v32 }
  0x1a   :  { %130 = vmatpush1.msra.mxu0 %v83_v33  ;;  %256 = vmatpush1.msra.mxu1 %v83_v33 }
  0x1b   :  { %131 = vmatprep.subr.mxu0 %v82_v34  ;;  %241 = vmatprep.subr.mxu1 %v82_v34 }
  0x1c   :  { %132 = vmatpush1.msra.mxu0 %v81_v35  ;;  %257 = vmatpush1.msra.mxu1 %v81_v35 }
  0x1d   :  { %133 = vmatprep.subr.mxu0 %v80_v36  ;;  %242 = vmatprep.subr.mxu1 %v80_v36 }
  0x1e   :  { %134 = vmatpush1.msra.mxu0 %v79_v37  ;;  %258 = vmatpush1.msra.mxu1 %v79_v37 }
  0x1f   :  { %135 = vmatprep.subr.mxu0 %v78_v38  ;;  %243 = vmatprep.subr.mxu1 %v78_v38 }
  0x20   :  { %136 = vmatpush1.msra.mxu0 %v77_v39  ;;  %259 = vmatpush1.msra.mxu1 %v77_v39 }
  0x21   :  { %137 = vmatprep.subr.mxu0 %v76_v40  ;;  %244 = vmatprep.subr.mxu1 %v76_v40 }
  0x22   :  { %138 = vmatpush1.msra.mxu0 %v75_v41  ;;  %260 = vmatpush1.msra.mxu1 %v75_v41 }
  0x8b   :  { %v31_v10 = vpop.xlane.xlu0 %30 }
  0x8c   :  { %v35_v11 = vmul.f32 0.0078125, %v31_v10 }
  0x8e   :  { %v327_v12 = vsub.f32 %v28_v0, %v35_v11  ;;  %v204_v0 = vrot.slane %v199_v62, %v203_v61 }
  0x8f   :  { %v33_v13 = vpop.xlane.xlu0 %32 }
  0x90   :  { %v36_v14 = vmul.f32 0.0078125, %v33_v13  ;;  %v39_v15 = vmul.f32 %v327_v12, %v327_v12 }
  0x92   :  { %v331_v16 = vsub.f32 %v29_v1, %v36_v14  ;;  %41 = vadd.xlane.f32.xlu1 %v39_v15  ;;  %v208_v1 = vrot.slane %v199_v62, %v207_v63 }
  0x94   :  { %v40_v17 = vmul.f32 %v331_v16, %v331_v16 }
  0x96   :  { %43 = vadd.xlane.f32.xlu1 %v40_v17 }
 0x11b   :  { %v42_v43 = vpop.xlane.xlu1 %41 }
 0x11c   :  { %v45_v44 = vmul.f32 0.0078125, %v42_v43 }
 0x11e   :  { %v47_v45 = vadd.f32 1e-05, %v45_v44 }
 0x11f   :  { %v44_v46 = vpop.xlane.xlu1 %43 }
 0x120   :  { %262 = vrsqrt.f32 %v47_v45  ;;  %v46_v47 = vmul.f32 0.0078125, %v44_v46 }
 0x122   :  { %v48_v48 = vadd.f32 1e-05, %v46_v47 }
 0x124   :  { %264 = vrsqrt.f32 %v48_v48 }
 0x12d   :  { %v263_v49 = vpop.eup %262 }
 0x12e   :  { %v51_v51 = vmul.f32 %v263_v49, %v327_v12 }
 0x130   :  { %v60_v53 = vmul.f32 %v227_v50, %v51_v51 }
 0x131   :  { %v265_v54 = vpop.eup %264 }
 0x132   :  { %v69_v55 = vadd.f32 %v228_v52, %v60_v53  ;;  %v52_v56 = vmul.f32 %v265_v54, %v331_v16 }
 0x134   :  { %172 = vmatmul.mubr.f32.vlgmr.msra.gmra.mxu0 %v69_v55  ;;  %v61_v57 = vmul.f32 %v227_v50, %v52_v56 }
 0x136   :  { %v70_v58 = vadd.f32 %v228_v52, %v61_v57 }
 0x138   :  { %178 = vmatmul.mubr.f32.vlgmr.msra.gmra.mxu1 %v70_v58 }
 0x1f4   :  { %v173_v2 = vpop.f32.mrf.mxu0 }
 0x1f5   :  { %v211_v3 = vadd.f32 %v204_v0, %v173_v2 }
 0x1f6   :  { %v175_v4 = vpop.f32.mrf.mxu0 }
 0x1f7   :  { %v215_v5 = vmax.f32 %v211_v3, 0.0  ;;  %v212_v6 = vadd.f32 %v208_v1, %v175_v4 }
 0x1f8   :  { %v179_v7 = vpop.f32.mrf.mxu1 }
 0x1f9   :  { %219 = vst [vmem:[%s435_s5] sm:$0xff] %v215_v5  ;;  %v216_v8 = vmax.f32 %v212_v6, 0.0  ;;  %v213_v9 = vadd.f32 %v204_v0, %v179_v7 }
 0x1fa   :  { %v181_v10 = vpop.f32.mrf.mxu1 }
 0x1fb   :  { %220 = vst [vmem:[%s435_s5 + $0x8] sm:$0xff] %v216_v8  ;;  %v217_v11 = vmax.f32 %v213_v9, 0.0  ;;  %v214_v12 = vadd.f32 %v208_v1, %v181_v10 }
 0x1fd   :  { %221 = vst [vmem:[%s435_s5 + $0x10] sm:$0xff] %v217_v11  ;;  %v218_v13 = vmax.f32 %v214_v12, 0.0 }
 0x1ff   :  { %222 = vst [vmem:[%s435_s5 + $0x18] sm:$0xff] %v218_v13 }

// kernel: decoder_layer.14
= control target key start
LH: loop header
LB: loop body
LE: loop exit
PB: predicated region body
PF: predicated region fallthrough
CT: control target
= control target key end

     0   :  { %s2312_s12 = smov 0   ;;  %s2314_s13 = smov 0   ;;  %s2665_s0 = inlined_call_operand.vmem [shape: s32[2,1,16], index: 0, kind: input, shape index: {}]   ;;  %s2666_s1 = inlined_call_operand.vmem [shape: f32[2,8,128], index: 1, kind: input, shape index: {}]   ;;  %s2667_s2 = inlined_call_operand.vmem [shape: f32[2,16,256], index: 2, kind: input, shape index: {}]   ;;  %s2668_s3 = inlined_call_operand.vmem [shape: f32[2,8,128], index: 3, kind: output, shape index: {}]  }
   0x1   :  { %s2316_s14 = smov 0  }
   0x2 LB: > { %s32_s15 = sadd.s32 1, %s2277_s13  ;;  %p2084_p0 = scmp.ge.s32.totalorder %s2281_s14, 1  ;;  %s2281_s14 = sphi %s2316_s14, %s13_s14   ;;  %s2277_s13 = sphi %s2314_s13, %s2670_s13   ;;  %s2273_s12 = sphi %s2312_s12, %s2669_s12  }
   0x3   : > { %p34_p1 = scmp.ge.s32.totalorder %s32_s15, 2  ;;  %p193_p2 = scmp.lt.s32.totalorder %s2281_s14, 3 }
   0x5   : > { %s2672_s15 = smov (%p34_p1, %s32_s15), 0  ;;  %p194_p3 = pnand %p2084_p0, %p193_p2 }
   0x6   : > { %p237_p4 = scmp.lt.s32.totalorder (!%p194_p3), %s2273_s12, 1  ;;  %s2283_s21 = smov (!%p194_p3), 32  }
   0x7   : > { %197 = sbr.rel (%p194_p3) target bundleno = 1079 (0x437), region = 32  ;;  %s2284_s22 = smov (!%p194_p3), 96  }
   0x8   : > { %s2285_s26 = smov (!%p194_p3), 64  }
   0xc   : > { %s2674_s12 = smov (!%p237_p4, %s2273_s12), 1  ;;  %v2286_v4 = vmov 0.0   ;;  %vm281_vm0 = vcmask 261120   ;;  %vm2287_vm1 = vmmov 0   ;;  %v2288_v5 = vmov 1983009808  }
   0xd   : > { %s2119_s16 = sshll.u32 %s2674_s12, 5  ;;  %s2085_s20 = sshll.u32 %s2674_s12, 3  ;;  %2144 = vmatprep.subr.mxu0 %v2286_v4  ;;  %2151 = vmatprep.subr.mxu1 %v2286_v4  ;;  %282 = vst.msk [vmem:[#allocation4] sm:$0xff] %vm281_vm0, %v2286_v4  ;;  %283 = vst.msk [vmem:[#allocation4 + $0x8] sm:$0xff] %vm281_vm0, %v2286_v4  ;;  %v305_v6 = vunpack.c.l.s4 %v2288_v5  ;;  %v307_v7 = vlaneseq  ;;  %v2289_v8 = vmov 1934713408  }
   0xe   : > { %s2336_s19 = scalar_lea.vmem %s2667_s2, %s2119_s16  ;;  %s249_s25 = scalar_lea.vmem %s2666_s1, %s2085_s20  ;;  %284 = vst.msk [vmem:[#allocation4 + $0x10] sm:$0xff] %vm281_vm0, %v2286_v4  ;;  %285 = vst.msk [vmem:[#allocation4 + $0x18] sm:$0xff] %vm281_vm0, %v2286_v4  ;;  %2148 = vmatprep.mubr.msk.f32.mxu0 %vm2287_vm1, %v2286_v4  ;;  %2155 = vmatprep.mubr.msk.f32.mxu1 %vm2287_vm1, %v2286_v4  ;;  %v337_v9 = vunpack.c.l.s4 %v2289_v8  ;;  %vm272_vm3 = vcmask 7168   ;;  %vm1351_vm5 = vcmask 130048   ;;  %vm1965_vm6 = vcmask 523264  }
   0xf   : > { %v289_v0 = vld [vmem:[%s2336_s19 + $0x10] sm:$0xff]  ;;  %v288_v1 = vld [vmem:[%s2336_s19] sm:$0xff]  ;;  %v306_v10 = vunpack.c.0.s8 %v305_v6  ;;  %v2374_v11 = vshrl.u32 %v307_v7, 7  ;;  %s242_s29 = scalar_lea.vmem %s2665_s0, %s2674_s12  ;;  %277 = vst.msk [vmem:[#allocation3] sm:$0xff] %vm272_vm3, %v2286_v4  ;;  %278 = vst.msk [vmem:[#allocation3 + $0x8] sm:$0xff] %vm272_vm3, %v2286_v4  ;;  %vm1967_vm7 = vcmask 785408   ;;  %s267_s5 = scalar_lea.vmem %s2668_s3, %s2085_s20 }
  0x10   : > { %454 = vrot.lane.b32.xlu1 %v289_v0, %s2283_s21  ;;  %442 = vrot.lane.b32.xlu0 %v289_v0, %s2284_s22  ;;  %v286_v2 = vld [vmem:[%s249_s25] sm:$0xff]  ;;  %v338_v14 = vunpack.c.0.s8 %v337_v9  ;;  %279 = vst.msk [vmem:[#allocation3 + $0x10] sm:$0xff] %vm272_vm3, %v2286_v4  ;;  %280 = vst.msk [vmem:[#allocation3 + $0x18] sm:$0xff] %vm272_vm3, %v2286_v4 }
  0x11   : > { %v2352_v3 = vmul.f32 0.088388346, %v286_v2  ;;  %v2377_v15 = vsub.s32 %v306_v10, %v2374_v11 }
  0x12   : > { %v2380_v22 = vsub.s32 %v338_v14, %v2374_v11 }
  0x14   : > { %448 = vrot.lane.b32.xlu0 %v289_v0, %s2285_s26  ;;  %440 = vrot.lane.b32.xlu1 %v288_v1, %s2284_s22 }
  0x18   : > { %446 = vrot.lane.b32.xlu0 %v288_v1, %s2285_s26  ;;  %452 = vrot.lane.b32.xlu1 %v288_v1, %s2283_s21 }
  0x1c   : > { %293 = vrot.lane.b32.xlu0 %v2352_v3, %s2284_s22  ;;  %296 = vrot.lane.b32.xlu1 %v2352_v3, %s2285_s26 }
  0x20   : > { %299 = vrot.lane.b32.xlu0 %v2352_v3, %s2283_s21 }
  0x82   : > { %v455_v12 = vpop.permute.xlu1 %454  ;;  %v443_v13 = vpop.permute.xlu0 %442 }
  0x83   : > { %v542_v16 = vcombine.low %v443_v13, %v455_v12  ;;  %v543_v17 = vcombine.high %v443_v13, %v455_v12 }
  0x85   : > { %v550_v23 = vrot.slane %v542_v16, %v2377_v15  ;;  %v557_v24 = vrot.slane %v543_v17, %v2377_v15 }
  0x86   : > { %v449_v18 = vpop.permute.xlu0 %448  ;;  %v441_v19 = vpop.permute.xlu1 %440 }
  0x87   : > { %v526_v20 = vcombine.low %v289_v0, %v449_v18  ;;  %v527_v21 = vcombine.high %v289_v0, %v449_v18 }
  0x89   : > { %v534_v25 = vrot.slane %v526_v20, %v2377_v15  ;;  %v541_v26 = vrot.slane %v527_v21, %v2377_v15 }
  0x8a   : > { %v447_v27 = vpop.permute.xlu0 %446  ;;  %v453_v28 = vpop.permute.xlu1 %452 }
  0x8b   : > { %v558_v29 = vcombine.low %v534_v25, %v550_v23  ;;  %v559_v30 = vcombine.high %v534_v25, %v550_v23  ;;  %v574_v31 = vcombine.low %v541_v26, %v557_v24  ;;  %v575_v32 = vcombine.high %v541_v26, %v557_v24 }
  0x8c   : > { %v458_v33 = vcombine.low %v288_v1, %v447_v27  ;;  %v459_v34 = vcombine.high %v288_v1, %v447_v27  ;;  %v474_v35 = vcombine.low %v441_v19, %v453_v28  ;;  %v475_v36 = vcombine.high %v441_v19, %v453_v28 }
  0x8d   : > { %v566_v37 = vrot.slane %v558_v29, %v2380_v22  ;;  %v573_v38 = vrot.slane %v559_v30, %v2380_v22  ;;  %v582_v39 = vrot.slane %v574_v31, %v2380_v22  ;;  %v589_v40 = vrot.slane %v575_v32, %v2380_v22 }
  0x8e   : > { %v466_v41 = vrot.slane %v458_v33, %v2377_v15  ;;  %v473_v42 = vrot.slane %v459_v34, %v2377_v15  ;;  %v482_v43 = vrot.slane %v474_v35, %v2377_v15  ;;  %v489_v44 = vrot.slane %v475_v36, %v2377_v15  ;;  %v294_v45 = vpop.permute.xlu0 %293  ;;  %v297_v46 = vpop.permute.xlu1 %296 }
  0x8f   : > { %v662_v47 = vcombine.low %v566_v37, %v573_v38  ;;  %v2093_v48 = vcombine.high %v566_v37, %v573_v38  ;;  %v678_v49 = vcombine.low %v582_v39, %v589_v40  ;;  %v2094_v50 = vcombine.high %v582_v39, %v589_v40 }
  0x90   : > { %v490_v51 = vcombine.low %v466_v41, %v482_v43  ;;  %v491_v52 = vcombine.high %v466_v41, %v482_v43  ;;  %v506_v53 = vcombine.low %v473_v42, %v489_v44  ;;  %v507_v54 = vcombine.high %v473_v42, %v489_v44 }
  0x91   : > { %v302_v55 = vcombine.low %v2352_v3, %v297_v46  ;;  %v303_v56 = vcombine.high %v2352_v3, %v297_v46  ;;  %v2397_v57 = vrot.slane %v662_v47, %v2377_v15  ;;  %v2400_v58 = vrot.slane %v2093_v48, %v2377_v15 }
  0x92   : > { %v498_v59 = vrot.slane %v490_v51, %v2380_v22  ;;  %v505_v60 = vrot.slane %v491_v52, %v2380_v22  ;;  %v514_v61 = vrot.slane %v506_v53, %v2380_v22  ;;  %v521_v62 = vrot.slane %v507_v54, %v2380_v22  ;;  %v300_v63 = vpop.permute.xlu0 %299 }
  0x93   : > { %v310_v0 = vrot.slane %v302_v55, %v2377_v15  ;;  %v317_v1 = vrot.slane %v303_v56, %v2377_v15  ;;  %v318_v2 = vcombine.low %v294_v45, %v300_v63  ;;  %v319_v3 = vcombine.high %v294_v45, %v300_v63 }
  0x94   : > { %v594_v5 = vcombine.low %v498_v59, %v505_v60  ;;  %v2091_v6 = vcombine.high %v498_v59, %v505_v60  ;;  %v610_v7 = vcombine.low %v514_v61, %v521_v62  ;;  %v2092_v8 = vcombine.high %v514_v61, %v521_v62 }
  0x95   : > { %v326_v9 = vrot.slane %v318_v2, %v2377_v15  ;;  %v333_v10 = vrot.slane %v319_v3, %v2377_v15  ;;  %v685_v14 = vrot.slane %v678_v49, %v2377_v15  ;;  %v693_v16 = vrot.slane %v2094_v50, %v2377_v15 }
  0x96   : > { %v601_v12 = vrot.slane %v594_v5, %v2377_v15  ;;  %v609_v13 = vrot.slane %v2091_v6, %v2377_v15  ;;  %v617_v21 = vrot.slane %v610_v7, %v2377_v15  ;;  %v625_v23 = vrot.slane %v2092_v8, %v2377_v15 }
  0x97   : > { %v334_v17 = vcombine.low %v310_v0, %v326_v9  ;;  %v335_v18 = vcombine.high %v310_v0, %v326_v9  ;;  %v350_v19 = vcombine.low %v317_v1, %v333_v10  ;;  %v351_v20 = vcombine.high %v317_v1, %v333_v10  ;;  %v1339_v9 = vld [vmem:[%s242_s29] sm:$0x1] }
  0x98   : > { %v694_v24 = vcombine.low %v2397_v57, %v2400_v58  ;;  %v710_v30 = vcombine.low %v685_v14, %v693_v16  ;;  %v626_v31 = vcombine.low %v601_v12, %v609_v13  ;;  %v695_v36 = vcombine.high %v2397_v57, %v2400_v58 }
  0x99   : > { %v342_v25 = vrot.slane %v334_v17, %v2380_v22  ;;  %v349_v26 = vrot.slane %v335_v18, %v2380_v22  ;;  %v358_v27 = vrot.slane %v350_v19, %v2380_v22  ;;  %v365_v28 = vrot.slane %v351_v20, %v2380_v22 }
  0x9a   : > { %v702_v29 = vrot.slane %v694_v24, %v2380_v22  ;;  %v718_v37 = vrot.slane %v710_v30, %v2380_v22  ;;  %v634_v38 = vrot.slane %v626_v31, %v2380_v22  ;;  %v642_v39 = vcombine.low %v617_v21, %v625_v23 }
  0x9b   : > { %v370_v32 = vcombine.low %v342_v25, %v349_v26  ;;  %v2089_v33 = vcombine.high %v342_v25, %v349_v26  ;;  %v386_v34 = vcombine.low %v358_v27, %v365_v28  ;;  %v2090_v35 = vcombine.high %v358_v27, %v365_v28 }
  0x9c   : > { %v711_v44 = vcombine.high %v685_v14, %v693_v16  ;;  %v726_v45 = vcombine.low %v702_v29, %v718_v37  ;;  %v727_v46 = vcombine.high %v702_v29, %v718_v37  ;;  %v650_v47 = vrot.slane %v642_v39, %v2380_v22 }
  0x9d   : > { %v377_v40 = vrot.slane %v370_v32, %v2377_v15  ;;  %v385_v41 = vrot.slane %v2089_v33, %v2377_v15  ;;  %v393_v42 = vrot.slane %v386_v34, %v2377_v15  ;;  %v401_v43 = vrot.slane %v2090_v35, %v2377_v15  ;;  %v291_v33 = vld [vmem:[%s2336_s19 + $0x18] sm:$0xff]  ;;  %v290_v34 = vld [vmem:[%s2336_s19 + $0x8] sm:$0xff] }
  0x9e   : > { %2145 = vmatpush3.xpose.msk.msra.mxu0 %vm281_vm0, %v726_v45  ;;  %2152 = vmatpush3.xpose.msk.msra.mxu1 %vm281_vm0, %v727_v46  ;;  %v658_v50 = vcombine.low %v634_v38, %v650_v47  ;;  %v659_v51 = vcombine.high %v634_v38, %v650_v47  ;;  %v627_v54 = vcombine.high %v601_v12, %v609_v13  ;;  %vm1340_vm2 = vcmp.ne.s32.totalorder %v1339_v9, 0 }
  0x9f   : > { %v402_v48 = vcombine.low %v377_v40, %v385_v41  ;;  %v418_v49 = vcombine.low %v393_v42, %v401_v43  ;;  %2146 = vmatprep.subr.mxu0 %v2286_v4  ;;  %2153 = vmatprep.subr.mxu1 %v2286_v4  ;;  %v643_v55 = vcombine.high %v617_v21, %v625_v23  ;;  %v2290_v10 = vmov 0  }
  0xa0   : > { %v709_v56 = vrot.slane %v695_v36, %v2380_v22  ;;  %v725_v57 = vrot.slane %v711_v44, %v2380_v22  ;;  %v403_v60 = vcombine.high %v377_v40, %v385_v41  ;;  %v419_v61 = vcombine.high %v393_v42, %v401_v43  ;;  %2234 = vset.pattern.permute.xlu1 %v2290_v10 }
  0xa1   : > { %v410_v52 = vrot.slane %v402_v48, %v2380_v22  ;;  %v426_v53 = vrot.slane %v418_v49, %v2380_v22  ;;  %v641_v0 = vrot.slane %v627_v54, %v2380_v22  ;;  %v657_v1 = vrot.slane %v643_v55, %v2380_v22  ;;  %2233 = vset.pattern.permute.xlu0 %v2290_v10 }
  0xa2   : > { %2147 = vmatpush3.xpose.msk.msra.mxu0 %vm281_vm0, %v658_v50  ;;  %2154 = vmatpush3.xpose.msk.msra.mxu1 %vm281_vm0, %v659_v51  ;;  %v728_v62 = vcombine.low %v709_v56, %v725_v57  ;;  %v729_v63 = vcombine.high %v709_v56, %v725_v57  ;;  %v417_v2 = vrot.slane %v403_v60, %v2380_v22  ;;  %v1341_v12 = vsel %vm1340_vm2, 1, %v2290_v10 }
  0xa3   : > { %v434_v58 = vcombine.low %v410_v52, %v426_v53  ;;  %v435_v59 = vcombine.high %v410_v52, %v426_v53  ;;  %2158 = vmatprep.subr.mxu0 %v2286_v4  ;;  %2165 = vmatprep.subr.mxu1 %v2286_v4  ;;  %v433_v3 = vrot.slane %v419_v61, %v2380_v22  ;;  %v2291_v13 = vmov -inf  }
  0xa4   : > { %v660_v5 = vcombine.low %v641_v0, %v657_v1  ;;  %v661_v6 = vcombine.high %v641_v0, %v657_v1  ;;  %274 = vst.msk [vmem:[#allocation2 + $0x8] sm:$0xff] %vm272_vm3, %v2291_v13  ;;  %273 = vst.msk [vmem:[#allocation2] sm:$0xff] %vm272_vm3, %v2291_v13  ;;  %v1344_v14 = vsub.s32 0, %v2374_v11 }
  0xa5   : > { %2149 = vmatmul.mubr.msk.f32.vlgmr.msra.gmra.mxu0 %vm281_vm0, %v434_v58  ;;  %2156 = vmatmul.mubr.msk.f32.vlgmr.msra.gmra.mxu1 %vm281_vm0, %v435_v59  ;;  %v436_v7 = vcombine.low %v417_v2, %v433_v3  ;;  %v437_v8 = vcombine.high %v417_v2, %v433_v3  ;;  %275 = vst.msk [vmem:[#allocation2 + $0x10] sm:$0xff] %vm272_vm3, %v2291_v13  ;;  %276 = vst.msk [vmem:[#allocation2 + $0x18] sm:$0xff] %vm272_vm3, %v2291_v13 }
  0xa6   : > { %2159 = vmatpush3.xpose.msk.msra.mxu0 %vm281_vm0, %v728_v62  ;;  %2166 = vmatpush3.xpose.msk.msra.mxu1 %vm281_vm0, %v729_v63  ;;  %v1345_v16 = vrot.slane %v1341_v12, %v1344_v14 }
  0xa7   : > { %2160 = vmatprep.subr.mxu0 %v2286_v4  ;;  %2167 = vmatprep.subr.mxu1 %v2286_v4 }
  0xa8   : > { %2162 = vmatprep.mubr.msk.f32.mxu0 %vm2287_vm1, %v2286_v4  ;;  %2169 = vmatprep.mubr.msk.f32.mxu1 %vm2287_vm1, %v2286_v4  ;;  %vm1346_vm4 = vcmp.eq.s32.totalorder %v1345_v16, 1 }
  0xaa   : > { %2161 = vmatpush3.xpose.msk.msra.mxu0 %vm281_vm0, %v660_v5  ;;  %2168 = vmatpush3.xpose.msk.msra.mxu1 %vm281_vm0, %v661_v6 }
  0xab   : > { %2172 = vmatprep.subr.mxu0 %v2286_v4  ;;  %2179 = vmatprep.subr.mxu1 %v2286_v4  ;;  %v2509_v35 = vld [vmem:[#allocation2 + $0x8] sm:$0xff]  ;;  %v2511_v36 = vld [vmem:[#allocation2] sm:$0xff] }
  0xac   : > { %v2529_v43 = vld [vmem:[#allocation2 + $0x10] sm:$0xff]  ;;  %v2531_v44 = vld [vmem:[#allocation2 + $0x18] sm:$0xff] }
  0xad   : > { %2163 = vmatmul.mubr.msk.f32.vlgmr.msra.gmra.mxu0 %vm281_vm0, %v436_v7  ;;  %2170 = vmatmul.mubr.msk.f32.vlgmr.msra.gmra.mxu1 %vm281_vm0, %v437_v8 }
  0xae   : > { %2176 = vmatprep.mubr.msk.f32.mxu0 %vm2287_vm1, %v2286_v4  ;;  %2183 = vmatprep.mubr.msk.f32.mxu1 %vm2287_vm1, %v2286_v4 }
 0x165   : > { %v1098_v17 = vpop.f32.mrf.mxu0  ;;  %v1177_v18 = vpop.f32.mrf.mxu1 }
 0x166   : > { %v2485_v19 = vsel %vm1346_vm4, -100000.0, %v1098_v17  ;;  %v2487_v20 = vsel %vm1346_vm4, -100000.0, %v1177_v18 }
 0x167   : > { %v2150_v21 = vpop.f32.mrf.mxu0  ;;  %v2157_v23 = vpop.f32.mrf.mxu1  ;;  %v1355_v24 = vsel %vm1351_vm5, %v2487_v20, -inf  ;;  %v1352_v25 = vsel %vm1351_vm5, %v2485_v19, -inf }
 0x168   : > { %1356 = vmax.xlane.f32.xlu0 %v1355_v24  ;;  %1353 = vmax.xlane.f32.xlu1 %v1352_v25 }
 0x16d   : > { %v1256_v11 = vpop.f32.mrf.mxu0  ;;  %v1335_v26 = vpop.f32.mrf.mxu1 }
 0x16e   : > { %v2493_v27 = vsel %vm1346_vm4, -100000.0, %v1256_v11  ;;  %v2495_v28 = vsel %vm1346_vm4, -100000.0, %v1335_v26 }
 0x16f   : > { %v2164_v29 = vpop.f32.mrf.mxu0  ;;  %v2171_v30 = vpop.f32.mrf.mxu1  ;;  %v1358_v31 = vsel %vm1351_vm5, %v2493_v27, -inf  ;;  %v1361_v32 = vsel %vm1351_vm5, %v2495_v28, -inf }
 0x170   : > { %1359 = vmax.xlane.f32.xlu0 %v1358_v31  ;;  %1362 = vmax.xlane.f32.xlu1 %v1361_v32 }
 0x181   : > { %734 = vrot.lane.b32.xlu1 %v291_v33, %s2284_s22 }
 0x185   : > { %740 = vrot.lane.b32.xlu1 %v291_v33, %s2285_s26 }
 0x189   : > { %746 = vrot.lane.b32.xlu1 %v291_v33, %s2283_s21 }
 0x18d   : > { %732 = vrot.lane.b32.xlu1 %v290_v34, %s2284_s22 }
 0x191   : > { %738 = vrot.lane.b32.xlu1 %v290_v34, %s2285_s26 }
 0x195   : > { %744 = vrot.lane.b32.xlu1 %v290_v34, %s2283_s21 }
 0x1f1   : > { %v1357_v37 = vpop.xlane.xlu0 %1356  ;;  %v1354_v38 = vpop.xlane.xlu1 %1353 }
 0x1f2   : > { %v2514_v39 = vmax.f32 %v2509_v35, %v1357_v37  ;;  %v2517_v40 = vmax.f32 %v2511_v36, %v1354_v38 }
 0x1f4   : > { %v1373_v41 = vsub.f32 %v2509_v35, %v2514_v39  ;;  %1446 = vst.msk [vmem:[#allocation2 + $0x8] sm:$0xff] %vm272_vm3, %v2514_v39  ;;  %v1372_v42 = vsub.f32 %v2511_v36, %v2517_v40  ;;  %1445 = vst.msk [vmem:[#allocation2] sm:$0xff] %vm272_vm3, %v2517_v40  ;;  %1391 = vperm.xlu1 %2234, %v2514_v39   ;;  %1386 = vperm.xlu0 %2233, %v2517_v40  }
 0x1f6   : > { %v1376_v35 = vmul.f32 1.442695, %v1372_v42 }
 0x1f9   : > { %v1360_v45 = vpop.xlane.xlu0 %1359  ;;  %v1363_v46 = vpop.xlane.xlu1 %1362 }
 0x1fa   : > { %v2534_v47 = vmax.f32 %v2529_v43, %v1360_v45  ;;  %v2537_v48 = vmax.f32 %v2531_v44, %v1363_v46 }
 0x1fc   : > { %v1374_v49 = vsub.f32 %v2529_v43, %v2534_v47  ;;  %1447 = vst.msk [vmem:[#allocation2 + $0x10] sm:$0xff] %vm272_vm3, %v2534_v47  ;;  %v1375_v50 = vsub.f32 %v2531_v44, %v2537_v48  ;;  %1448 = vst.msk [vmem:[#allocation2 + $0x18] sm:$0xff] %vm272_vm3, %v2537_v48  ;;  %1396 = vperm.xlu1 %2234, %v2534_v47   ;;  %1401 = vperm.xlu0 %2233, %v2537_v48   ;;  %v1416_v43 = vld [vmem:[#allocation3] sm:$0xff]  ;;  %v1417_v47 = vld [vmem:[#allocation3 + $0x8] sm:$0xff] }
 0x1fd   : > { %v735_v51 = vpop.permute.xlu1 %734  ;;  %v1419_v44 = vld [vmem:[#allocation3 + $0x18] sm:$0xff]  ;;  %v1418_v48 = vld [vmem:[#allocation3 + $0x10] sm:$0xff] }
 0x1fe   : > { %v1382_v39 = vmul.f32 1.442695, %v1375_v50 }
 0x201   : > { %v741_v52 = vpop.permute.xlu1 %740 }
 0x202   : > { %v818_v53 = vcombine.low %v291_v33, %v741_v52  ;;  %v819_v54 = vcombine.high %v291_v33, %v741_v52 }
 0x204   : > { %v826_v56 = vrot.slane %v818_v53, %v2377_v15  ;;  %v833_v57 = vrot.slane %v819_v54, %v2377_v15 }
 0x205   : > { %v747_v55 = vpop.permute.xlu1 %746 }
 0x206   : > { %v834_v58 = vcombine.low %v735_v51, %v747_v55  ;;  %v835_v59 = vcombine.high %v735_v51, %v747_v55 }
 0x208   : > { %v842_v60 = vrot.slane %v834_v58, %v2377_v15  ;;  %v849_v61 = vrot.slane %v835_v59, %v2377_v15 }
 0x209   : > { %v733_v62 = vpop.permute.xlu1 %732 }
 0x20a   : > { %v850_v63 = vcombine.low %v826_v56, %v842_v60  ;;  %v851_v0 = vcombine.high %v826_v56, %v842_v60  ;;  %v866_v1 = vcombine.low %v833_v57, %v849_v61  ;;  %v867_v2 = vcombine.high %v833_v57, %v849_v61 }
 0x20c   : > { %v858_v3 = vrot.slane %v850_v63, %v2380_v22  ;;  %v865_v5 = vrot.slane %v851_v0, %v2380_v22  ;;  %v874_v6 = vrot.slane %v866_v1, %v2380_v22  ;;  %v881_v7 = vrot.slane %v867_v2, %v2380_v22 }
 0x20d   : > { %v739_v8 = vpop.permute.xlu1 %738 }
 0x20e   : > { %v954_v9 = vcombine.low %v858_v3, %v865_v5  ;;  %v2097_v10 = vcombine.high %v858_v3, %v865_v5  ;;  %v970_v12 = vcombine.low %v874_v6, %v881_v7  ;;  %v2098_v13 = vcombine.high %v874_v6, %v881_v7 }
 0x20f   : > { %v750_v14 = vcombine.low %v290_v34, %v739_v8  ;;  %v751_v16 = vcombine.high %v290_v34, %v739_v8 }
 0x210   : > { %v961_v17 = vrot.slane %v954_v9, %v2377_v15  ;;  %v969_v18 = vrot.slane %v2097_v10, %v2377_v15  ;;  %v977_v21 = vrot.slane %v970_v12, %v2377_v15  ;;  %v985_v23 = vrot.slane %v2098_v13, %v2377_v15 }
 0x211   : > { %v758_v24 = vrot.slane %v750_v14, %v2377_v15  ;;  %v765_v25 = vrot.slane %v751_v16, %v2377_v15  ;;  %v745_v11 = vpop.permute.xlu1 %744 }
 0x212   : > { %v766_v26 = vcombine.low %v733_v62, %v745_v11  ;;  %v767_v29 = vcombine.high %v733_v62, %v745_v11  ;;  %v986_v30 = vcombine.low %v961_v17, %v969_v18  ;;  %v1002_v31 = vcombine.low %v977_v21, %v985_v23 }
 0x213   : > { %v987_v32 = vcombine.high %v961_v17, %v969_v18  ;;  %v1003_v33 = vcombine.high %v977_v21, %v985_v23 }
 0x214   : > { %v774_v34 = vrot.slane %v766_v26, %v2377_v15  ;;  %v781_v37 = vrot.slane %v767_v29, %v2377_v15  ;;  %v994_v38 = vrot.slane %v986_v30, %v2380_v22  ;;  %v1010_v45 = vrot.slane %v1002_v31, %v2380_v22 }
 0x215   : > { %v2568_v46 = vrot.slane %v987_v32, %v2380_v22  ;;  %v2571_v51 = vrot.slane %v1003_v33, %v2380_v22 }
 0x216   : > { %v782_v52 = vcombine.low %v758_v24, %v774_v34  ;;  %v783_v53 = vcombine.high %v758_v24, %v774_v34  ;;  %v798_v54 = vcombine.low %v765_v25, %v781_v37  ;;  %v799_v55 = vcombine.high %v765_v25, %v781_v37 }
 0x217   : > { %v1018_v56 = vcombine.low %v994_v38, %v1010_v45  ;;  %v1019_v57 = vcombine.high %v994_v38, %v1010_v45  ;;  %v1020_v58 = vcombine.low %v2568_v46, %v2571_v51  ;;  %v1021_v59 = vcombine.high %v2568_v46, %v2571_v51 }
 0x218   : > { %v790_v60 = vrot.slane %v782_v52, %v2380_v22  ;;  %v797_v61 = vrot.slane %v783_v53, %v2380_v22  ;;  %v806_v62 = vrot.slane %v798_v54, %v2380_v22  ;;  %v813_v63 = vrot.slane %v799_v55, %v2380_v22 }
 0x219   : > { %2173 = vmatpush3.msra.mxu0 %v1018_v56  ;;  %2180 = vmatpush3.msra.mxu1 %v1019_v57  ;;  %v1378_v53 = vmul.f32 1.442695, %v1373_v41 }
 0x21a   : > { %v886_v0 = vcombine.low %v790_v60, %v797_v61  ;;  %v2095_v1 = vcombine.high %v790_v60, %v797_v61  ;;  %v902_v2 = vcombine.low %v806_v62, %v813_v63  ;;  %v2096_v3 = vcombine.high %v806_v62, %v813_v63  ;;  %2174 = vmatprep.subr.mxu0 %v2286_v4 }
 0x21b   : > { %2181 = vmatprep.subr.mxu1 %v2286_v4 }
 0x21c   : > { %v893_v5 = vrot.slane %v886_v0, %v2377_v15  ;;  %v901_v6 = vrot.slane %v2095_v1, %v2377_v15  ;;  %v909_v7 = vrot.slane %v902_v2, %v2377_v15  ;;  %v917_v8 = vrot.slane %v2096_v3, %v2377_v15 }
 0x21e   : > { %v918_v9 = vcombine.low %v893_v5, %v901_v6  ;;  %v934_v10 = vcombine.low %v909_v7, %v917_v8  ;;  %v919_v12 = vcombine.high %v893_v5, %v901_v6  ;;  %v935_v13 = vcombine.high %v909_v7, %v917_v8 }
 0x220   : > { %v926_v14 = vrot.slane %v918_v9, %v2380_v22  ;;  %v942_v16 = vrot.slane %v934_v10, %v2380_v22  ;;  %v933_v17 = vrot.slane %v919_v12, %v2380_v22  ;;  %v949_v18 = vrot.slane %v935_v13, %v2380_v22  ;;  %v1741_v12 = vld [vmem:[#allocation4] sm:$0xff] }
 0x222   : > { %v950_v21 = vcombine.low %v926_v14, %v942_v16  ;;  %v951_v23 = vcombine.high %v926_v14, %v942_v16  ;;  %v952_v24 = vcombine.low %v933_v17, %v949_v18  ;;  %v953_v25 = vcombine.high %v933_v17, %v949_v18  ;;  %v1742_v14 = vld [vmem:[#allocation4 + $0x8] sm:$0xff] }
 0x224   : > { %2175 = vmatpush3.msra.mxu0 %v950_v21  ;;  %2182 = vmatpush3.msra.mxu1 %v951_v23 }
 0x225   : > { %2186 = vmatprep.subr.mxu0 %v2286_v4  ;;  %2193 = vmatprep.subr.mxu1 %v2286_v4 }
 0x26f   : > { %v1387_v11 = vpop.permute.xlu0 %1386  ;;  %v1392_v26 = vpop.permute.xlu1 %1391 }
 0x270   : > { %v1404_v29 = vsub.f32 %v2485_v19, %v1387_v11  ;;  %v1405_v30 = vsub.f32 %v2487_v20, %v1392_v26 }
 0x272   : > { %v1408_v31 = vmul.f32 1.442695, %v1404_v29  ;;  %v1410_v32 = vmul.f32 1.442695, %v1405_v30  ;;  %v1744_v29 = vld [vmem:[#allocation4 + $0x18] sm:$0xff] }
 0x274   : > { %2235 = vpow2.f32 %v1408_v31  ;;  %v1743_v31 = vld [vmem:[#allocation4 + $0x10] sm:$0xff] }
 0x275   : > { %2237 = vpow2.f32 %v1410_v32 }
 0x277   : > { %v1402_v33 = vpop.permute.xlu0 %1401  ;;  %v1397_v34 = vpop.permute.xlu1 %1396 }
 0x278   : > { %v1407_v37 = vsub.f32 %v2495_v28, %v1402_v33  ;;  %v1406_v38 = vsub.f32 %v2493_v27, %v1397_v34 }
 0x27a   : > { %v1414_v45 = vmul.f32 1.442695, %v1407_v37  ;;  %v1412_v46 = vmul.f32 1.442695, %v1406_v38 }
 0x27c   : > { %2239 = vpow2.f32 %v1414_v45 }
 0x27d   : > { %2241 = vpow2.f32 %v1412_v46 }
 0x27e   : > { %2243 = vpow2.f32 %v1378_v53 }
 0x281   : > { %v2236_v51 = vpop.eup %2235 }
 0x282   : > { %v2238_v52 = vpop.eup %2237  ;;  %2177 = vmatmul.mubr.msk.f32.vlgmr.msra.gmra.mxu0 %vm1351_vm5, %v2236_v51  ;;  %v1424_v19 = vsel %vm1351_vm5, %v2236_v51, 0.0 }
 0x283   : > { %2184 = vmatmul.mubr.msk.f32.vlgmr.msra.gmra.mxu1 %vm1351_vm5, %v2238_v52  ;;  %2187 = vmatpush3.msra.mxu0 %v1020_v58  ;;  %v1427_v20 = vsel %vm1351_vm5, %v2238_v52, 0.0 }
 0x284   : > { %2194 = vmatpush3.msra.mxu1 %v1021_v59  ;;  %1425 = vadd.xlane.f32.xlu1 %v1424_v19 }
 0x285   : > { %2188 = vmatprep.subr.mxu0 %v2286_v4  ;;  %2195 = vmatprep.subr.mxu1 %v2286_v4 }
 0x286   : > { %1428 = vadd.xlane.f32.xlu0 %v1427_v20  ;;  %2189 = vmatpush3.msra.mxu0 %v952_v24 }
 0x287   : > { %2196 = vmatpush3.msra.mxu1 %v953_v25  ;;  %2190 = vmatprep.mubr.msk.f32.mxu0 %vm2287_vm1, %v2286_v4 }
 0x288   : > { %2197 = vmatprep.mubr.msk.f32.mxu1 %vm2287_vm1, %v2286_v4  ;;  %v1380_v4 = vmul.f32 1.442695, %v1374_v49 }
 0x289   : > { %v2240_v27 = vpop.eup %2239 }
 0x28a   : > { %v2242_v28 = vpop.eup %2241  ;;  %2198 = vmatmul.mubr.msk.f32.vlgmr.msra.gmra.mxu1 %vm1351_vm5, %v2240_v27  ;;  %v1433_v54 = vsel %vm1351_vm5, %v2240_v27, 0.0  ;;  %2245 = vpow2.f32 %v1380_v4 }
 0x28b   : > { %2191 = vmatmul.mubr.msk.f32.vlgmr.msra.gmra.mxu0 %vm1351_vm5, %v2242_v28  ;;  %1434 = vadd.xlane.f32.xlu1 %v1433_v54  ;;  %v1430_v55 = vsel %vm1351_vm5, %v2242_v28, 0.0  ;;  %2247 = vpow2.f32 %v1376_v35  ;;  %v2244_v41 = vpop.eup %2243 }
 0x28c   : > { %1431 = vadd.xlane.f32.xlu0 %v1430_v55  ;;  %2249 = vpow2.f32 %v1382_v39  ;;  %v1421_v40 = vmul.f32 %v2244_v41, %v1417_v47 }
 0x297   : > { %v2246_v56 = vpop.eup %2245 }
 0x298   : > { %v2248_v57 = vpop.eup %2247  ;;  %v1422_v61 = vmul.f32 %v2246_v56, %v1418_v48 }
 0x299   : > { %v2250_v58 = vpop.eup %2249  ;;  %v1420_v49 = vmul.f32 %v2248_v57, %v1416_v43 }
 0x29a   : > { %v1423_v50 = vmul.f32 %v2250_v58, %v1419_v44 }
 0x29c   : > { %1752 = vperm.xlu1 %2234, %v2244_v41  }
 0x2a0   : > { %1757 = vperm.xlu1 %2234, %v2246_v56  }
 0x2a2   : > { %1747 = vperm.xlu0 %2233, %v2248_v57  }
 0x2a6   : > { %1762 = vperm.xlu0 %2233, %v2250_v58  }
 0x30d   : > { %v1426_v36 = vpop.xlane.xlu1 %1425 }
 0x30e   : > { %v1436_v42 = vadd.f32 %v1426_v36, %v1420_v49 }
 0x30f   : > { %v1429_v59 = vpop.xlane.xlu0 %1428 }
 0x310   : > { %v1437_v60 = vadd.f32 %v1429_v59, %v1421_v40  ;;  %1441 = vst.msk [vmem:[#allocation3] sm:$0xff] %vm272_vm3, %v1436_v42 }
 0x312   : > { %1442 = vst.msk [vmem:[#allocation3 + $0x8] sm:$0xff] %vm272_vm3, %v1437_v60 }
 0x314   : > { %v1435_v62 = vpop.xlane.xlu1 %1434 }
 0x315   : > { %v1432_v63 = vpop.xlane.xlu0 %1431  ;;  %v1439_v0 = vadd.f32 %v1435_v62, %v1423_v50 }
 0x316   : > { %v1438_v1 = vadd.f32 %v1432_v63, %v1422_v61 }
 0x317   : > { %1444 = vst.msk [vmem:[#allocation3 + $0x18] sm:$0xff] %vm272_vm3, %v1439_v0  ;;  %v1784_v2 = vld [vmem:[#allocation3] sm:$0xff] }
 0x318   : > { %1443 = vst.msk [vmem:[#allocation3 + $0x10] sm:$0xff] %vm272_vm3, %v1438_v1  ;;  %2251 = vrcp.f32 %v1784_v2  ;;  %v1753_v16 = vpop.permute.xlu1 %1752 }
 0x319   : > { %v1785_v3 = vld [vmem:[#allocation3 + $0x8] sm:$0xff]  ;;  %v1766_v18 = vmul.f32 %v1753_v16, %v1742_v14 }
 0x31a   : > { %2253 = vrcp.f32 %v1785_v3 }
 0x31c   : > { %v1758_v32 = vpop.permute.xlu1 %1757 }
 0x31d   : > { %v1748_v13 = vpop.permute.xlu0 %1747  ;;  %v1767_v34 = vmul.f32 %v1758_v32, %v1743_v31 }
 0x31e   : > { %v1787_v5 = vld [vmem:[#allocation3 + $0x18] sm:$0xff]  ;;  %v1765_v17 = vmul.f32 %v1748_v13, %v1741_v12 }
 0x31f   : > { %v1786_v6 = vld [vmem:[#allocation3 + $0x10] sm:$0xff]  ;;  %2255 = vrcp.f32 %v1787_v5 }
 0x320   : > { %2257 = vrcp.f32 %v1786_v6 }
 0x321   : > { %v1763_v30 = vpop.permute.xlu0 %1762 }
 0x322   : > { %v1768_v33 = vmul.f32 %v1763_v30, %v1744_v29 }
 0x325   : > { %v2252_v7 = vpop.eup %2251 }
 0x326   : > { %1794 = vperm.xlu1 %2234, %v2252_v7  }
 0x327   : > { %v2254_v8 = vpop.eup %2253 }
 0x328   : > { %1799 = vperm.xlu0 %2233, %v2254_v8  }
 0x32c   : > { %v2256_v9 = vpop.eup %2255 }
 0x32d   : > { %v2258_v10 = vpop.eup %2257  ;;  %1809 = vperm.xlu0 %2233, %v2256_v9  }
 0x32e   : > { %1804 = vperm.xlu1 %2234, %v2258_v10  }
 0x342   : > { %v1518_v21 = vpop.f32.mrf.mxu0 }
 0x343   : > { %v1769_v23 = vadd.f32 %v1765_v17, %v1518_v21  ;;  %v1591_v24 = vpop.f32.mrf.mxu1 }
 0x344   : > { %v1770_v25 = vadd.f32 %v1766_v18, %v1591_v24  ;;  %v2178_v11 = vpop.f32.mrf.mxu0 }
 0x345   : > { %1773 = vst.msk [vmem:[#allocation4] sm:$0xff] %vm281_vm0, %v1769_v23  ;;  %v2185_v26 = vpop.f32.mrf.mxu1 }
 0x346   : > { %1774 = vst.msk [vmem:[#allocation4 + $0x8] sm:$0xff] %vm281_vm0, %v1770_v25 }
 0x34a   : > { %v1737_v37 = vpop.f32.mrf.mxu1 }
 0x34b   : > { %v1664_v38 = vpop.f32.mrf.mxu0  ;;  %v1772_v45 = vadd.f32 %v1768_v33, %v1737_v37 }
 0x34c   : > { %v1771_v46 = vadd.f32 %v1767_v34, %v1664_v38  ;;  %v2199_v51 = vpop.f32.mrf.mxu1  ;;  %v1780_v55 = vld [vmem:[#allocation4] sm:$0xff] }
 0x34d   : > { %1776 = vst.msk [vmem:[#allocation4 + $0x18] sm:$0xff] %vm281_vm0, %v1772_v45  ;;  %v2192_v52 = vpop.f32.mrf.mxu0  ;;  %v1781_v27 = vld [vmem:[#allocation4 + $0x8] sm:$0xff] }
 0x34e   : > { %1775 = vst.msk [vmem:[#allocation4 + $0x10] sm:$0xff] %vm281_vm0, %v1771_v46 }
 0x354   : > { %v1783_v28 = vld [vmem:[#allocation4 + $0x18] sm:$0xff] }
 0x355   : > { %v1782_v35 = vld [vmem:[#allocation4 + $0x10] sm:$0xff] }
 0x3a1   : > { %v1795_v20 = vpop.permute.xlu1 %1794 }
 0x3a2   : > { %v1812_v41 = vmul.f32 %v1795_v20, %v1780_v55 }
 0x3a3   : > { %v1800_v19 = vpop.permute.xlu0 %1799 }
 0x3a4   : > { %v1813_v54 = vmul.f32 %v1800_v19, %v1781_v27 }
 0x3a8   : > { %v1810_v53 = vpop.permute.xlu0 %1809 }
 0x3a9   : > { %v1815_v4 = vmul.f32 %v1810_v53, %v1783_v28  ;;  %v1805_v39 = vpop.permute.xlu1 %1804 }
 0x3aa   : > { %v1814_v56 = vmul.f32 %v1805_v39, %v1782_v35 }
 0x3ab   : > { %v1832_v57 = vcombine.low %v1813_v54, %v1815_v4  ;;  %v1833_v58 = vcombine.high %v1813_v54, %v1815_v4 }
 0x3ac   : > { %v1816_v43 = vcombine.low %v1812_v41, %v1814_v56  ;;  %v1817_v47 = vcombine.high %v1812_v41, %v1814_v56 }
 0x3ad   : > { %v1840_v49 = vrot.slane %v1832_v57, %v2377_v15  ;;  %v1847_v36 = vrot.slane %v1833_v58, %v2377_v15 }
 0x3ae   : > { %v1824_v40 = vrot.slane %v1816_v43, %v2377_v15  ;;  %v1831_v42 = vrot.slane %v1817_v47, %v2377_v15 }
 0x3b0   : > { %v1848_v59 = vcombine.low %v1824_v40, %v1840_v49  ;;  %v1849_v60 = vcombine.high %v1824_v40, %v1840_v49  ;;  %v1864_v44 = vcombine.low %v1831_v42, %v1847_v36  ;;  %v1865_v48 = vcombine.high %v1831_v42, %v1847_v36 }
 0x3b2   : > { %v1856_v50 = vrot.slane %v1848_v59, %v2380_v22  ;;  %v1863_v61 = vrot.slane %v1849_v60, %v2380_v22  ;;  %v1872_v62 = vrot.slane %v1864_v44, %v2380_v22  ;;  %v1879_v63 = vrot.slane %v1865_v48, %v2380_v22 }
 0x3b4   : > { %v1884_v0 = vcombine.low %v1856_v50, %v1863_v61  ;;  %v2115_v1 = vcombine.high %v1856_v50, %v1863_v61  ;;  %v1900_v2 = vcombine.low %v1872_v62, %v1879_v63  ;;  %v2116_v3 = vcombine.high %v1872_v62, %v1879_v63 }
 0x3b6   : > { %v1891_v5 = vrot.slane %v1884_v0, %v2377_v15  ;;  %v1899_v6 = vrot.slane %v2115_v1, %v2377_v15  ;;  %v1907_v7 = vrot.slane %v1900_v2, %v2377_v15  ;;  %v1915_v8 = vrot.slane %v2116_v3, %v2377_v15 }
 0x3b8   : > { %v1917_v9 = vcombine.high %v1891_v5, %v1899_v6  ;;  %v1933_v10 = vcombine.high %v1907_v7, %v1915_v8  ;;  %v1916_v12 = vcombine.low %v1891_v5, %v1899_v6  ;;  %v1932_v13 = vcombine.low %v1907_v7, %v1915_v8 }
 0x3ba   : > { %v1931_v14 = vrot.slane %v1917_v9, %v2380_v22  ;;  %v1947_v16 = vrot.slane %v1933_v10, %v2380_v22  ;;  %v1924_v17 = vrot.slane %v1916_v12, %v2380_v22  ;;  %v1940_v18 = vrot.slane %v1932_v13, %v2380_v22 }
 0x3bc   : > { %v1950_v21 = vcombine.low %v1931_v14, %v1947_v16  ;;  %v1949_v23 = vcombine.high %v1924_v17, %v1940_v18  ;;  %v1948_v24 = vcombine.low %v1924_v17, %v1940_v18  ;;  %v1951_v15 = vcombine.high %v1931_v14, %v1947_v16 }
 0x3be   : > { %1957 = vrot.lane.b32.xlu0 %v1950_v21, %s2285_s26  ;;  %1953 = vrot.lane.b32.xlu1 %v1949_v23, %s2283_s21 }
 0x3c2   : > { %1961 = vrot.lane.b32.xlu1 %v1951_v15, %s2284_s22 }
 0x430   : > { %v1954_v25 = vpop.permute.xlu1 %1953  ;;  %v1958_v11 = vpop.permute.xlu0 %1957 }
 0x431   : > { %v1964_v26 = vsel %vm281_vm0, %v1948_v24, %v1954_v25 }
 0x432   : > { %v1966_v29 = vsel %vm1965_vm6, %v1964_v26, %v1958_v11 }
 0x434   : > { %v1962_v22 = vpop.permute.xlu1 %1961 }
 0x435   : > { %v1968_v30 = vsel %vm1967_vm7, %v1966_v29, %v1962_v22 }
 0x436   : > { %1969 = vst [vmem:[%s267_s5] sm:$0xff] %v1968_v30 }
 0x437 PF: > { %s13_s14 = sadd.s32 1, %s2281_s14   ;;  %s2669_s12 = smov %s2277_s13 }
 0x438   : > { %p10_p5 = scmp.ge.s32.totalorder %s13_s14, 4   ;;  %s2670_s13 = smov %s2672_s15 }
 0x43a   :  { %12 = sbr.rel (!%p10_p5) target bundleno = 2 (0x2), region = 76 }

// kernel: decoder_layer.17
= control target key start
LH: loop header
LB: loop body
LE: loop exit
PB: predicated region body
PF: predicated region fallthrough
CT: control target
= control target key end

     0   :  { %s383_s1 = inlined_call_operand.vmem [shape: f32[256,128], index: 1, kind: input, shape index: {}]   ;;  %s384_s0 = inlined_call_operand.vmem [shape: f32[16,256], index: 0, kind: input, shape index: {}]   ;;  %s385_s2 = inlined_call_operand.vmem [shape: f32[1,128], index: 2, kind: input, shape index: {}]   ;;  %s386_s3 = inlined_call_operand.vmem [shape: f32[16,128], index: 3, kind: input, shape index: {}]   ;;  %s387_s4 = inlined_call_operand.vmem [shape: f32[16,128], index: 4, kind: output, shape index: {}]  }
   0x1   :  { %v60_v0 = vld [vmem:[%s383_s1 + $0xf8] sm:$0xff]  ;;  %v59_v2 = vld [vmem:[%s383_s1 + $0xf0] sm:$0xff]  ;;  %v58_v4 = vld [vmem:[%s383_s1 + $0xe8] sm:$0xff] }
   0x2   :  { %v44_v1 = vld [vmem:[%s383_s1 + $0x78] sm:$0xff]  ;;  %165 = vmatprep.subr.mxu0 %v60_v0  ;;  %203 = vmatprep.subr.mxu1 %v60_v0  ;;  %v43_v3 = vld [vmem:[%s383_s1 + $0x70] sm:$0xff]  ;;  %v42_v5 = vld [vmem:[%s383_s1 + $0x68] sm:$0xff] }
   0x3   :  { %166 = vmatpush3.msra.mxu0 %v44_v1  ;;  %219 = vmatpush3.msra.mxu1 %v44_v1  ;;  %v57_v6 = vld [vmem:[%s383_s1 + $0xe0] sm:$0xff]  ;;  %v56_v8 = vld [vmem:[%s383_s1 + $0xd8] sm:$0xff]  ;;  %v55_v10 = vld [vmem:[%s383_s1 + $0xd0] sm:$0xff] }
   0x4   :  { %167 = vmatprep.subr.mxu0 %v59_v2  ;;  %204 = vmatprep.subr.mxu1 %v59_v2  ;;  %v41_v7 = vld [vmem:[%s383_s1 + $0x60] sm:$0xff]  ;;  %v40_v9 = vld [vmem:[%s383_s1 + $0x58] sm:$0xff]  ;;  %v39_v11 = vld [vmem:[%s383_s1 + $0x50] sm:$0xff] }
   0x5   :  { %168 = vmatpush3.msra.mxu0 %v43_v3  ;;  %220 = vmatpush3.msra.mxu1 %v43_v3  ;;  %v54_v12 = vld [vmem:[%s383_s1 + $0xc8] sm:$0xff]  ;;  %v53_v14 = vld [vmem:[%s383_s1 + $0xc0] sm:$0xff]  ;;  %v52_v16 = vld [vmem:[%s383_s1 + $0xb8] sm:$0xff] }
   0x6   :  { %169 = vmatprep.subr.mxu0 %v58_v4  ;;  %205 = vmatprep.subr.mxu1 %v58_v4  ;;  %v38_v13 = vld [vmem:[%s383_s1 + $0x48] sm:$0xff]  ;;  %v37_v15 = vld [vmem:[%s383_s1 + $0x40] sm:$0xff]  ;;  %v36_v17 = vld [vmem:[%s383_s1 + $0x38] sm:$0xff] }
   0x7   :  { %170 = vmatpush3.msra.mxu0 %v42_v5  ;;  %221 = vmatpush3.msra.mxu1 %v42_v5  ;;  %v51_v18 = vld [vmem:[%s383_s1 + $0xb0] sm:$0xff]  ;;  %v50_v20 = vld [vmem:[%s383_s1 + $0xa8] sm:$0xff]  ;;  %v49_v22 = vld [vmem:[%s383_s1 + $0xa0] sm:$0xff] }
   0x8   :  { %171 = vmatprep.subr.mxu0 %v57_v6  ;;  %206 = vmatprep.subr.mxu1 %v57_v6  ;;  %v35_v19 = vld [vmem:[%s383_s1 + $0x30] sm:$0xff]  ;;  %v34_v21 = vld [vmem:[%s383_s1 + $0x28] sm:$0xff]  ;;  %v33_v23 = vld [vmem:[%s383_s1 + $0x20] sm:$0xff] }
   0x9   :  { %172 = vmatpush3.msra.mxu0 %v41_v7  ;;  %222 = vmatpush3.msra.mxu1 %v41_v7  ;;  %v48_v24 = vld [vmem:[%s383_s1 + $0x98] sm:$0xff]  ;;  %v47_v26 = vld [vmem:[%s383_s1 + $0x90] sm:$0xff]  ;;  %v46_v28 = vld [vmem:[%s383_s1 + $0x88] sm:$0xff] }
   0xa   :  { %173 = vmatprep.subr.mxu0 %v56_v8  ;;  %207 = vmatprep.subr.mxu1 %v56_v8  ;;  %v32_v25 = vld [vmem:[%s383_s1 + $0x18] sm:$0xff]  ;;  %v31_v27 = vld [vmem:[%s383_s1 + $0x10] sm:$0xff]  ;;  %v30_v29 = vld [vmem:[%s383_s1 + $0x8] sm:$0xff] }
   0xb   :  { %174 = vmatpush3.msra.mxu0 %v40_v9  ;;  %223 = vmatpush3.msra.mxu1 %v40_v9  ;;  %v45_v30 = vld [vmem:[%s383_s1 + $0x80] sm:$0xff]  ;;  %v24_v32 = vld [vmem:[%s384_s0 + $0x8] sm:$0xff]  ;;  %v26_v33 = vld [vmem:[%s384_s0 + $0x18] sm:$0xff] }
   0xc   :  { %175 = vmatprep.subr.mxu0 %v55_v10  ;;  %208 = vmatprep.subr.mxu1 %v55_v10  ;;  %v29_v31 = vld [vmem:[%s383_s1] sm:$0xff]  ;;  %v25_v35 = vld [vmem:[%s384_s0 + $0x10] sm:$0xff]  ;;  %v155_v44 = vld [vmem:[%s386_s3 + $0x8] sm:$0xff] }
   0xd   :  { %176 = vmatpush3.msra.mxu0 %v39_v11  ;;  %224 = vmatpush3.msra.mxu1 %v39_v11  ;;  %v23_v34 = vld [vmem:[%s384_s0] sm:$0xff] }
   0xe   :  { %177 = vmatprep.subr.mxu0 %v54_v12  ;;  %209 = vmatprep.subr.mxu1 %v54_v12  ;;  %v164_v39 = vld [vmem:[%s385_s2] ss:$0 sm:$0xff] }
   0xf   :  { %178 = vmatpush3.msra.mxu0 %v38_v13  ;;  %225 = vmatpush3.msra.mxu1 %v38_v13  ;;  %v154_v43 = vld [vmem:[%s386_s3] sm:$0xff] }
  0x10   :  { %179 = vmatprep.subr.mxu0 %v53_v14  ;;  %210 = vmatprep.subr.mxu1 %v53_v14 }
  0x11   :  { %180 = vmatpush3.msra.mxu0 %v37_v15  ;;  %226 = vmatpush3.msra.mxu1 %v37_v15 }
  0x12   :  { %181 = vmatprep.subr.mxu0 %v52_v16  ;;  %211 = vmatprep.subr.mxu1 %v52_v16 }
  0x13   :  { %182 = vmatpush3.msra.mxu0 %v36_v17  ;;  %227 = vmatpush3.msra.mxu1 %v36_v17 }
  0x14   :  { %183 = vmatprep.subr.mxu0 %v51_v18  ;;  %212 = vmatprep.subr.mxu1 %v51_v18 }
  0x15   :  { %184 = vmatpush3.msra.mxu0 %v35_v19  ;;  %228 = vmatpush3.msra.mxu1 %v35_v19 }
  0x16   :  { %185 = vmatprep.subr.mxu0 %v50_v20  ;;  %213 = vmatprep.subr.mxu1 %v50_v20 }
  0x17   :  { %186 = vmatpush3.msra.mxu0 %v34_v21  ;;  %229 = vmatpush3.msra.mxu1 %v34_v21 }
  0x18   :  { %187 = vmatprep.subr.mxu0 %v49_v22  ;;  %214 = vmatprep.subr.mxu1 %v49_v22 }
  0x19   :  { %188 = vmatpush3.msra.mxu0 %v33_v23  ;;  %230 = vmatpush3.msra.mxu1 %v33_v23 }
  0x1a   :  { %189 = vmatprep.subr.mxu0 %v48_v24  ;;  %215 = vmatprep.subr.mxu1 %v48_v24 }
  0x1b   :  { %190 = vmatpush3.msra.mxu0 %v32_v25  ;;  %231 = vmatpush3.msra.mxu1 %v32_v25 }
  0x1c   :  { %191 = vmatprep.subr.mxu0 %v47_v26  ;;  %216 = vmatprep.subr.mxu1 %v47_v26 }
  0x1d   :  { %192 = vmatpush3.msra.mxu0 %v31_v27  ;;  %232 = vmatpush3.msra.mxu1 %v31_v27 }
  0x1e   :  { %193 = vmatprep.subr.mxu0 %v46_v28  ;;  %217 = vmatprep.subr.mxu1 %v46_v28 }
  0x1f   :  { %194 = vmatpush3.msra.mxu0 %v30_v29  ;;  %233 = vmatpush3.msra.mxu1 %v30_v29 }
  0x20   :  { %195 = vmatprep.subr.mxu0 %v45_v30  ;;  %218 = vmatprep.subr.mxu1 %v45_v30 }
  0x21   :  { %196 = vmatpush3.msra.mxu0 %v29_v31  ;;  %234 = vmatpush3.msra.mxu1 %v29_v31 }
  0x22   :  { %125 = vmatprep.mubr.f32.mxu0 %v24_v32  ;;  %130 = vmatprep.mubr.f32.mxu1 %v26_v33 }
  0x23   :  { %126 = vmatmul.mubr.f32.vlgmr.msra.gmra.mxu0 %v23_v34  ;;  %131 = vmatmul.mubr.f32.vlgmr.msra.gmra.mxu1 %v25_v35 }
  0xe3   :  { %v197_v36 = vpop.f32.mrf.mxu0  ;;  %v200_v37 = vpop.f32.mrf.mxu1 }
  0xe5   :  { %v198_v38 = vpop.f32.mrf.mxu0  ;;  %v201_v40 = vpop.f32.mrf.mxu1 }
  0xe6   :  { %v199_v41 = vadd.f32 %v198_v38, %v197_v36  ;;  %v202_v42 = vadd.f32 %v201_v40, %v200_v37 }
  0xe8   :  { %v152_v45 = vadd.f32 %v199_v41, %v164_v39  ;;  %v153_v46 = vadd.f32 %v202_v42, %v164_v39 }
  0xea   :  { %v156_v47 = vadd.f32 %v154_v43, %v152_v45  ;;  %v157_v48 = vadd.f32 %v155_v44, %v153_v46 }
  0xec   :  { %158 = vst [vmem:[%s387_s4] sm:$0xff] %v156_v47  ;;  %159 = vst [vmem:[%s387_s4 + $0x8] sm:$0xff] %v157_v48 }

</bundles_post_ra>
